<compile_context>
chip_gen: v7x
topology: tpu7x:2x2x1
jax: 0.10.0
libtpu: 0.0.40
codegen_flags: <defaults>
</compile_context>

<pallas_src>
import functools

import numpy as np
import jax
import jax.numpy as jnp
from jax.experimental import pallas as pl
from jax.experimental.pallas import tpu as pltpu
from jax.scipy.special import erf as _jax_erf


_DEFAULTS = dict(
    fov=160.0,
    r_range=(10.0, 40.0),
    asym_range=(0.001, 0.99),
    width_range=(1.0, 40.0),
    floor_range=(0.0, 1.0),
    flux_range=(0.8, 1.2),
    crescent_flux_range=(0.001, 2.0),
    shift_range=(-200.0, 200.0),
    sigma_range=(1.0, 100.0),
    gaussian_scale_range=(0.001, 2.0),
)

_EPS = 1e-4          # module's self.eps
_F_BASE = 8          # per-sample features for the crescent/disk part
_F_PER_G = 7         # per-sample features per nuisance gaussian
_PAD_BIG = 1.0e6     # pad coordinate: makes ring/disk/gaussian == 0 on pad lanes


def build_grids(npix):
    """Constant coordinate grids (2-D), matching the torch module's __init__."""
    gap = 1.0 / npix
    xs = (-1.0 + gap + 2.0 * gap * np.arange(npix)).astype(np.float32)
    grid_y = np.ascontiguousarray(np.broadcast_to(-xs[:, None], (npix, npix)),
                                  dtype=np.float32)
    grid_x = np.ascontiguousarray(np.broadcast_to(xs[None, :], (npix, npix)),
                                  dtype=np.float32)
    grid_r = np.sqrt(grid_x * grid_x + grid_y * grid_y).astype(np.float32)
    grid_theta = np.arctan2(grid_y, grid_x).astype(np.float32)
    cos_t = np.cos(grid_theta).astype(np.float32)
    sin_t = np.sin(grid_theta).astype(np.float32)
    return grid_x, grid_y, grid_r, grid_theta, cos_t, sin_t


def _flatten_grids(npix):
    """Lane-dense (ROWS, 128) slabs of the constant grids, safely padded."""
    gx2d, gy2d, gr2d, _, ct2d, st2d = build_grids(npix)
    pix = npix * npix
    rows = -(-pix // 128)                      # ceil(pix / 128)

    def flat(a, pad_value):
        f = np.full((rows * 128,), pad_value, dtype=np.float32)
        f[:pix] = np.asarray(a, dtype=np.float32).reshape(-1)
        return f.reshape(rows, 128)

    grids = (flat(gr2d, _PAD_BIG),   # grid_r
             flat(ct2d, 0.0),        # cos(grid_theta)  (ring==0 on pads anyway)
             flat(st2d, 0.0),        # sin(grid_theta)
             flat(gx2d, _PAD_BIG),   # grid_x
             flat(gy2d, _PAD_BIG))   # grid_y
    return grids, rows


def _compute_feats(params, *, n_gaussian, flux_flag, fov, r_range, asym_range,
                   width_range, floor_range, flux_range, crescent_flux_range,
                   shift_range, sigma_range, gaussian_scale_range):
    """compute_features() + all algebraic prep in plain JAX (hoisted out of the
    kernel).  Returns a feature-major (F, B) float32 array (small SMEM pad)."""
    p = params.astype(jnp.float32)
    half = 0.5 * fov
    r = r_range[0] / half + p[:, 0] * (r_range[1] - r_range[0]) / half
    sigma = width_range[0] / half + p[:, 1] * (width_range[1] - width_range[0]) / half
    s = asym_range[0] + p[:, 2] * (asym_range[1] - asym_range[0])
    eta = (181.0 / 180.0) * np.pi * (2.0 * p[:, 3] - 1.0)

    base = 4 + 6 * n_gaussian
    if flux_flag:
        flux = flux_range[0] + (flux_range[1] - flux_range[0]) * p[:, base]
        floor = floor_range[0] + (floor_range[1] - floor_range[0]) * p[:, base + 1]
        cflux = (crescent_flux_range[0]
                 + (crescent_flux_range[1] - crescent_flux_range[0]) * p[:, base + 2])
    else:
        flux = jnp.ones_like(r)
        floor = floor_range[0] + (floor_range[1] - floor_range[0]) * p[:, base]
        cflux = (crescent_flux_range[0]
                 + (crescent_flux_range[1] - crescent_flux_range[0]) * p[:, base + 1])

    rows = [
        r,                                  # 0: ring radius
        -0.5 / (sigma * sigma),             # 1: -0.5 / sigma^2
        1.0 / (np.sqrt(2.0) * sigma),       # 2: 1 / (sqrt(2) * sigma)
        s * jnp.cos(eta),                   # 3
        s * jnp.sin(eta),                   # 4
        cflux * (1.0 - floor),              # 5: weight of normalised crescent
        cflux * floor,                      # 6: weight of normalised disk
        flux,                               # 7: total flux (1 if flux_flag=False)
    ]
    for k in range(n_gaussian):
        xs = shift_range[0] / half + p[:, 4 + 6 * k] * (shift_range[1] - shift_range[0]) / half
        ys = shift_range[0] / half + p[:, 5 + 6 * k] * (shift_range[1] - shift_range[0]) / half
        sc = gaussian_scale_range[0] + p[:, 6 + 6 * k] * (gaussian_scale_range[1] - gaussian_scale_range[0])
        sx = sigma_range[0] / half + p[:, 7 + 6 * k] * (sigma_range[1] - sigma_range[0]) / half
        sy = sigma_range[0] / half + p[:, 8 + 6 * k] * (sigma_range[1] - sigma_range[0]) / half
        th = (181.0 / 180.0) * 0.5 * np.pi * p[:, 9 + 6 * k]
        cth = jnp.cos(th)
        sth = jnp.sin(th)
        a = -0.5 / (sx * sx)
        c = -0.5 / (sy * sy)
        # exponent = a*x_rot^2 + c*y_rot^2 = P*u^2 + R*u*v + Q*v^2
        #          = P*(u + k1*v)^2 + k3*v^2   (completed square; P,k3 <= 0)
        P = a * cth * cth + c * sth * sth
        R = 2.0 * cth * sth * (a - c)
        k1 = R / (2.0 * P)
        k3 = (a * c) / P
        amp = 1.0 / (2.0 * np.pi * sx * sy)
        rows += [xs, ys, P, k1, k3, amp, sc]
    return jnp.stack(rows, axis=0).astype(jnp.float32)   # (F, B)


def _sum2d(x):
    """Full-slab sum as a (1, 1) array (lane reduce, then sublane reduce)."""
    return jnp.sum(jnp.sum(x, axis=1, keepdims=True), axis=0, keepdims=True)


def _crescent_kernel(feats_ref, gr_ref, ct_ref, st_ref, gx_ref, gy_ref, out_ref,
                     *, n_gaussian: int, tb: int, eps: float):
    gi = pl.program_id(0)

    gr = gr_ref[...]
    ct = ct_ref[...]
    st = st_ref[...]
    gx = gx_ref[...]
    gy = gy_ref[...]

    for t in range(tb):                               # TB samples per grid step
        b = gi * tb + t

        # Per-sample scalars (cheap SMEM reads).
        r       = feats_ref[0, b]   # ring radius
        nh_sig2 = feats_ref[1, b]   # -0.5 / sigma^2
        inv_s2s = feats_ref[2, b]   # 1 / (sqrt(2) * sigma)
        s_cos   = feats_ref[3, b]   # s * cos(eta)
        s_sin   = feats_ref[4, b]   # s * sin(eta)
        c_fac   = feats_ref[5, b]   # crescent_flux * (1 - floor)
        d_fac   = feats_ref[6, b]   # crescent_flux * floor
        flux    = feats_ref[7, b]   # total flux (1.0 when flux_flag=False)

        diff = gr - r
        ring = jnp.exp((diff * diff) * nh_sig2)       # exp(-0.5 (gr-r)^2 / sig^2)
        crescent = (1.0 + s_cos * ct + s_sin * st) * ring

        # disk = 0.5 * (1 + erf((r - gr) / (sqrt(2) sigma))).
        # Abramowitz-Stegun 7.1.26 (|err| < 1.5e-7); exp(-z^2) == ring, so no
        # extra transcendental; reciprocal goes to the EUP + one Newton step.
        az = jnp.abs(diff) * inv_s2s
        den = 1.0 + 0.3275911 * az
        t0 = pl.reciprocal(den, approx=True)
        tt = t0 * (2.0 - den * t0)                    # one Newton refinement
        poly = ((((1.061405429 * tt - 1.453152027) * tt + 1.421413741) * tt
                 - 0.284496736) * tt + 0.254829592) * tt
        e = 1.0 - poly * ring
        disk = 0.5 * (1.0 + jnp.where(diff <= 0.0, e, -e))

        sum_c = _sum2d(crescent)
        sum_d = _sum2d(disk)
        coef_c = c_fac / (sum_c + eps)
        coef_d = d_fac / (sum_d + eps)
        total = coef_c * sum_c + coef_d * sum_d       # analytic image total

        bares = []
        coefs = []
        for k in range(n_gaussian):                   # static unroll
            o = _F_BASE + _F_PER_G * k
            xs_k = feats_ref[o + 0, b]
            ys_k = feats_ref[o + 1, b]
            Pk   = feats_ref[o + 2, b]   # P  (<= 0)
            k1   = feats_ref[o + 3, b]   # R / (2P)
            k3   = feats_ref[o + 4, b]   # a*c / P  (<= 0)
            amp  = feats_ref[o + 5, b]   # 1 / (2 pi sigma_x sigma_y)
            sck  = feats_ref[o + 6, b]   # nuisance scale
            u = gx - xs_k
            v = gy - ys_k
            w = u + k1 * v
            bare = jnp.exp(Pk * (w * w) + k3 * (v * v))   # amp folded out
            s_n = _sum2d(bare)
            coef_n = (sck * amp) / (amp * s_n + eps)
            bares.append(bare)
            coefs.append(coef_n)
            total = total + coef_n * s_n

        inv_tot = flux / (total + eps)
        img = crescent * (coef_c * inv_tot) + disk * (coef_d * inv_tot)
        for bare, coef_n in zip(bares, coefs):
            img = img + bare * (coef_n * inv_tot)
        out_ref[t] = img


def crescent_param2img(params, *, npix, n_gaussian=1, flux_flag=False, tb=8,
                       **overrides):
    """Pallas forward. params: (B, nparams) f32 -> (B, npix, npix) f32."""
    cfg = dict(_DEFAULTS)
    cfg.update(overrides)
    params = jnp.asarray(params)
    B = params.shape[0]
    tb = max(1, min(tb, B))
    b_pad = -(-B // tb) * tb
    if b_pad != B:
        pad = jnp.zeros((b_pad - B, params.shape[1]), params.dtype)
        params = jnp.concatenate([params, pad], axis=0)

    feats = _compute_feats(params, n_gaussian=n_gaussian, flux_flag=flux_flag,
                           **cfg)                                     # (F, B_pad)
    grids, rows = _flatten_grids(npix)

    kernel = functools.partial(_crescent_kernel, n_gaussian=n_gaussian,
                               tb=tb, eps=_EPS)

    def const_spec():
        # Same block every grid step -> stays VMEM-resident across the batch.
        return pl.BlockSpec((rows, 128), lambda i: (0, 0))

    out_flat = pl.pallas_call(
        kernel,
        out_shape=jax.ShapeDtypeStruct((b_pad, rows, 128), jnp.float32),
        grid=(b_pad // tb,),
        in_specs=[
            pl.BlockSpec(memory_space=pltpu.MemorySpace.SMEM),   # feats (F, B_pad)
            const_spec(),   # grid_r
            const_spec(),   # cos(grid_theta)
            const_spec(),   # sin(grid_theta)
            const_spec(),   # grid_x
            const_spec(),   # grid_y
        ],
        out_specs=pl.BlockSpec((tb, rows, 128), lambda i: (i, 0, 0)),
        compiler_params=pltpu.CompilerParams(
            dimension_semantics=("parallel",)),
    )(feats, *[jnp.asarray(g) for g in grids])

    out = out_flat.reshape(b_pad, rows * 128)[:B, :npix * npix]
    return out.reshape(B, npix, npix)


def _reference_forward(params, *, npix, n_gaussian=1, flux_flag=False, **overrides):
    """Pure-JAX transcription of the PyTorch module (exact erf)."""
    cfg = dict(_DEFAULTS)
    cfg.update(overrides)
    fov = cfg["fov"]
    half = 0.5 * fov
    r_range, asym_range = cfg["r_range"], cfg["asym_range"]
    width_range, floor_range = cfg["width_range"], cfg["floor_range"]
    flux_range, crescent_flux_range = cfg["flux_range"], cfg["crescent_flux_range"]
    shift_range, sigma_range = cfg["shift_range"], cfg["sigma_range"]
    gaussian_scale_range = cfg["gaussian_scale_range"]

    gx, gy, gr, gt, _, _ = build_grids(npix)
    gx, gy, gr, gt = map(jnp.asarray, (gx, gy, gr, gt))
    p = params.astype(jnp.float32)
    eps = _EPS

    def col(i):
        return p[:, i][:, None, None]

    r = r_range[0] / half + col(0) * (r_range[1] - r_range[0]) / half
    sigma = width_range[0] / half + col(1) * (width_range[1] - width_range[0]) / half
    s = asym_range[0] + col(2) * (asym_range[1] - asym_range[0])
    eta = 181.0 / 180.0 * np.pi * (2.0 * col(3) - 1.0)

    nx, ny, nsc, nsx, nsy, nth = [], [], [], [], [], []
    for k in range(n_gaussian):
        nx.append(shift_range[0] / half + col(4 + 6 * k) * (shift_range[1] - shift_range[0]) / half)
        ny.append(shift_range[0] / half + col(5 + 6 * k) * (shift_range[1] - shift_range[0]) / half)
        nsc.append(gaussian_scale_range[0] + col(6 + 6 * k) * (gaussian_scale_range[1] - gaussian_scale_range[0]))
        nsx.append(sigma_range[0] / half + col(7 + 6 * k) * (sigma_range[1] - sigma_range[0]) / half)
        nsy.append(sigma_range[0] / half + col(8 + 6 * k) * (sigma_range[1] - sigma_range[0]) / half)
        nth.append(181.0 / 180.0 * 0.5 * np.pi * col(9 + 6 * k))

    base = 4 + 6 * n_gaussian
    if flux_flag:
        flux = flux_range[0] + (flux_range[1] - flux_range[0]) * col(base)
        floor = floor_range[0] + (floor_range[1] - floor_range[0]) * col(base + 1)
        cflux = crescent_flux_range[0] + (crescent_flux_range[1] - crescent_flux_range[0]) * col(base + 2)
    else:
        floor = floor_range[0] + (floor_range[1] - floor_range[0]) * col(base)
        cflux = crescent_flux_range[0] + (crescent_flux_range[1] - crescent_flux_range[0]) * col(base + 1)

    ring = jnp.exp(-0.5 * (gr - r) ** 2 / sigma ** 2)
    S = 1.0 + s * jnp.cos(gt - eta)
    crescent = S * ring
    disk = 0.5 * (1.0 + _jax_erf((r - gr) / (np.sqrt(2.0) * sigma)))
    crescent = crescent / (jnp.sum(crescent, axis=(-1, -2), keepdims=True) + eps)
    disk = disk / (jnp.sum(disk, axis=(-1, -2), keepdims=True) + eps)
    crescent = cflux * ((1.0 - floor) * crescent + floor * disk)
    for k in range(n_gaussian):
        x_c = gx - nx[k]
        y_c = gy - ny[k]
        x_rot = x_c * jnp.cos(nth[k]) + y_c * jnp.sin(nth[k])
        y_rot = -x_c * jnp.sin(nth[k]) + y_c * jnp.cos(nth[k])
        delta = 0.5 * (x_rot ** 2 / nsx[k] ** 2 + y_rot ** 2 / nsy[k] ** 2)
        nuis = 1.0 / (2.0 * np.pi * nsx[k] * nsy[k]) * jnp.exp(-delta)
        nuis = nuis / (jnp.sum(nuis, axis=(-1, -2), keepdims=True) + eps)
        crescent = crescent + nsc[k] * nuis
    denom = jnp.sum(crescent, axis=(-1, -2), keepdims=True) + eps
    if flux_flag:
        return flux * crescent / denom
    return crescent / denom


if __name__ == "__main__":
    npix = 16
    n_gaussian = 1
    flux_flag = False
    B = 16
    TB = 8            # 2 grid steps -> both v7x TensorCores get work
    nparams = (5 if flux_flag else 4) + 6 * n_gaussian + 2   # = 12

    key = jax.random.PRNGKey(0)
    params = jax.random.uniform(key, (B, nparams), dtype=jnp.float32)

    out = crescent_param2img(params, npix=npix, n_gaussian=n_gaussian,
                             flux_flag=flux_flag, tb=TB)
    out = jax.block_until_ready(out)

    ref = _reference_forward(params, npix=npix, n_gaussian=n_gaussian,
                             flux_flag=flux_flag)
    assert out.shape == (B, npix, npix)
    # A&S erf (|err|<1.5e-7), approx-reciprocal+NR, analytic total and the
    # completed-square gaussian form change FP rounding slightly vs the exact
    # reference, hence the modest tolerances.
    np.testing.assert_allclose(np.asarray(out), np.asarray(ref),
                               rtol=1e-3, atol=1e-5)
    print("KERNEL_OK")
</pallas_src>

<mosaic_0001>
module attributes {stable_mosaic.version = 11 : i64} {
  func.func @_crescent_kernel(%arg0: i32, %arg1: memref<15x16xf32, #tpu.memory_space<smem>>, %arg2: memref<2x128xf32, #tpu.memory_space<vmem>>, %arg3: memref<2x128xf32, #tpu.memory_space<vmem>>, %arg4: memref<2x128xf32, #tpu.memory_space<vmem>>, %arg5: memref<2x128xf32, #tpu.memory_space<vmem>>, %arg6: memref<2x128xf32, #tpu.memory_space<vmem>>, %arg7: memref<8x2x128xf32, #tpu.memory_space<vmem>>) attributes {dimension_semantics = [#tpu.dimension_semantics<parallel>], iteration_bounds = array<i64: 2>, scalar_prefetch = 0 : i64, scratch_operands = 0 : i64, tpu.core_type = #tpu.core_type<tc>, window_params = [{transform_indices = @transform_0, window_bounds = array<i64: 15, 16>}, {pipeline_mode = #tpu.pipeline_mode<synchronous>, transform_indices = @transform_1, window_bounds = array<i64: 2, 128>}, {pipeline_mode = #tpu.pipeline_mode<synchronous>, transform_indices = @transform_2, window_bounds = array<i64: 2, 128>}, {pipeline_mode = #tpu.pipeline_mode<synchronous>, transform_indices = @transform_3, window_bounds = array<i64: 2, 128>}, {pipeline_mode = #tpu.pipeline_mode<synchronous>, transform_indices = @transform_4, window_bounds = array<i64: 2, 128>}, {pipeline_mode = #tpu.pipeline_mode<synchronous>, transform_indices = @transform_5, window_bounds = array<i64: 2, 128>}, {transform_indices = @transform_6, window_bounds = array<i64: 8, 2, 128>}]} {
    %c0 = arith.constant 0 : index
    %c0_0 = arith.constant 0 : index
    %0 = vector.load %arg2[%c0, %c0_0] : memref<2x128xf32, #tpu.memory_space<vmem>>, vector<2x128xf32>
    %c0_1 = arith.constant 0 : index
    %c0_2 = arith.constant 0 : index
    %1 = vector.load %arg3[%c0_1, %c0_2] : memref<2x128xf32, #tpu.memory_space<vmem>>, vector<2x128xf32>
    %c0_3 = arith.constant 0 : index
    %c0_4 = arith.constant 0 : index
    %2 = vector.load %arg4[%c0_3, %c0_4] : memref<2x128xf32, #tpu.memory_space<vmem>>, vector<2x128xf32>
    %c0_5 = arith.constant 0 : index
    %c0_6 = arith.constant 0 : index
    %3 = vector.load %arg5[%c0_5, %c0_6] : memref<2x128xf32, #tpu.memory_space<vmem>>, vector<2x128xf32>
    %c0_7 = arith.constant 0 : index
    %c0_8 = arith.constant 0 : index
    %4 = vector.load %arg6[%c0_7, %c0_8] : memref<2x128xf32, #tpu.memory_space<vmem>>, vector<2x128xf32>
    %c8_i32 = arith.constant 8 : i32
    %5 = arith.muli %arg0, %c8_i32 : i32
    %c0_i32 = arith.constant 0 : i32
    %6 = arith.addi %5, %c0_i32 : i32
    %c0_9 = arith.constant 0 : index
    %7 = arith.index_cast %6 : i32 to index
    %8 = memref.load %arg1[%c0_9, %7] : memref<15x16xf32, #tpu.memory_space<smem>>
    %c1 = arith.constant 1 : index
    %9 = arith.index_cast %6 : i32 to index
    %10 = memref.load %arg1[%c1, %9] : memref<15x16xf32, #tpu.memory_space<smem>>
    %c2 = arith.constant 2 : index
    %11 = arith.index_cast %6 : i32 to index
    %12 = memref.load %arg1[%c2, %11] : memref<15x16xf32, #tpu.memory_space<smem>>
    %c3 = arith.constant 3 : index
    %13 = arith.index_cast %6 : i32 to index
    %14 = memref.load %arg1[%c3, %13] : memref<15x16xf32, #tpu.memory_space<smem>>
    %c4 = arith.constant 4 : index
    %15 = arith.index_cast %6 : i32 to index
    %16 = memref.load %arg1[%c4, %15] : memref<15x16xf32, #tpu.memory_space<smem>>
    %c5 = arith.constant 5 : index
    %17 = arith.index_cast %6 : i32 to index
    %18 = memref.load %arg1[%c5, %17] : memref<15x16xf32, #tpu.memory_space<smem>>
    %c6 = arith.constant 6 : index
    %19 = arith.index_cast %6 : i32 to index
    %20 = memref.load %arg1[%c6, %19] : memref<15x16xf32, #tpu.memory_space<smem>>
    %c7 = arith.constant 7 : index
    %21 = arith.index_cast %6 : i32 to index
    %22 = memref.load %arg1[%c7, %21] : memref<15x16xf32, #tpu.memory_space<smem>>
    %23 = vector.broadcast %8 : f32 to vector<2x128xf32>
    %24 = arith.subf %0, %23 : vector<2x128xf32>
    %25 = arith.mulf %24, %24 : vector<2x128xf32>
    %26 = vector.broadcast %10 : f32 to vector<2x128xf32>
    %27 = arith.mulf %25, %26 : vector<2x128xf32>
    %28 = math.exp %27 : vector<2x128xf32>
    %29 = vector.broadcast %14 : f32 to vector<2x128xf32>
    %30 = arith.mulf %29, %1 : vector<2x128xf32>
    %cst = arith.constant 1.000000e+00 : f32
    %31 = vector.broadcast %cst : f32 to vector<2x128xf32>
    %32 = arith.addf %31, %30 : vector<2x128xf32>
    %33 = vector.broadcast %16 : f32 to vector<2x128xf32>
    %34 = arith.mulf %33, %2 : vector<2x128xf32>
    %35 = arith.addf %32, %34 : vector<2x128xf32>
    %36 = arith.mulf %35, %28 : vector<2x128xf32>
    %37 = math.absf %24 : vector<2x128xf32>
    %38 = vector.broadcast %12 : f32 to vector<2x128xf32>
    %39 = arith.mulf %37, %38 : vector<2x128xf32>
    %cst_10 = arith.constant 0.327591091 : f32
    %40 = vector.broadcast %cst_10 : f32 to vector<2x128xf32>
    %41 = arith.mulf %40, %39 : vector<2x128xf32>
    %cst_11 = arith.constant 1.000000e+00 : f32
    %42 = vector.broadcast %cst_11 : f32 to vector<2x128xf32>
    %43 = arith.addf %42, %41 : vector<2x128xf32>
    %44 = tpu.reciprocal %43 {approx = true} : vector<2x128xf32> -> vector<2x128xf32>
    %45 = arith.mulf %43, %44 : vector<2x128xf32>
    %cst_12 = arith.constant 2.000000e+00 : f32
    %46 = vector.broadcast %cst_12 : f32 to vector<2x128xf32>
    %47 = arith.subf %46, %45 : vector<2x128xf32>
    %48 = arith.mulf %44, %47 : vector<2x128xf32>
    %cst_13 = arith.constant 1.06140542 : f32
    %49 = vector.broadcast %cst_13 : f32 to vector<2x128xf32>
    %50 = arith.mulf %49, %48 : vector<2x128xf32>
    %cst_14 = arith.constant 1.45315206 : f32
    %51 = vector.broadcast %cst_14 : f32 to vector<2x128xf32>
    %52 = arith.subf %50, %51 : vector<2x128xf32>
    %53 = arith.mulf %52, %48 : vector<2x128xf32>
    %cst_15 = arith.constant 1.42141378 : f32
    %54 = vector.broadcast %cst_15 : f32 to vector<2x128xf32>
    %55 = arith.addf %53, %54 : vector<2x128xf32>
    %56 = arith.mulf %55, %48 : vector<2x128xf32>
    %cst_16 = arith.constant 0.284496725 : f32
    %57 = vector.broadcast %cst_16 : f32 to vector<2x128xf32>
    %58 = arith.subf %56, %57 : vector<2x128xf32>
    %59 = arith.mulf %58, %48 : vector<2x128xf32>
    %cst_17 = arith.constant 0.254829586 : f32
    %60 = vector.broadcast %cst_17 : f32 to vector<2x128xf32>
    %61 = arith.addf %59, %60 : vector<2x128xf32>
    %62 = arith.mulf %61, %48 : vector<2x128xf32>
    %63 = arith.mulf %62, %28 : vector<2x128xf32>
    %cst_18 = arith.constant 1.000000e+00 : f32
    %64 = vector.broadcast %cst_18 : f32 to vector<2x128xf32>
    %65 = arith.subf %64, %63 : vector<2x128xf32>
    %cst_19 = arith.constant 0.000000e+00 : f32
    %66 = vector.broadcast %cst_19 : f32 to vector<2x128xf32>
    %67 = arith.cmpf ole, %24, %66 : vector<2x128xf32>
    %cst_20 = arith.constant 0.000000e+00 : f32
    %68 = vector.broadcast %cst_20 : f32 to vector<2x128xf32>
    %69 = arith.subf %68, %65 : vector<2x128xf32>
    %70 = arith.select %67, %65, %69 : vector<2x128xi1>, vector<2x128xf32>
    %cst_21 = arith.constant 1.000000e+00 : f32
    %71 = vector.broadcast %cst_21 : f32 to vector<2x128xf32>
    %72 = arith.addf %71, %70 : vector<2x128xf32>
    %cst_22 = arith.constant 5.000000e-01 : f32
    %73 = vector.broadcast %cst_22 : f32 to vector<2x128xf32>
    %74 = arith.mulf %73, %72 : vector<2x128xf32>
    %cst_23 = arith.constant dense<0.000000e+00> : vector<2xf32>
    %75 = vector.multi_reduction <add>, %36, %cst_23 [1] : vector<2x128xf32> to vector<2xf32>
    %76 = vector.shape_cast %75 : vector<2xf32> to vector<2x1xf32>
    %cst_24 = arith.constant dense<0.000000e+00> : vector<1xf32>
    %77 = vector.multi_reduction <add>, %76, %cst_24 [0] : vector<2x1xf32> to vector<1xf32>
    %78 = vector.shape_cast %77 : vector<1xf32> to vector<1x1xf32>
    %cst_25 = arith.constant dense<0.000000e+00> : vector<2xf32>
    %79 = vector.multi_reduction <add>, %74, %cst_25 [1] : vector<2x128xf32> to vector<2xf32>
    %80 = vector.shape_cast %79 : vector<2xf32> to vector<2x1xf32>
    %cst_26 = arith.constant dense<0.000000e+00> : vector<1xf32>
    %81 = vector.multi_reduction <add>, %80, %cst_26 [0] : vector<2x1xf32> to vector<1xf32>
    %82 = vector.shape_cast %81 : vector<1xf32> to vector<1x1xf32>
    %cst_27 = arith.constant 9.99999974E-5 : f32
    %83 = vector.broadcast %cst_27 : f32 to vector<1x1xf32>
    %84 = arith.addf %78, %83 : vector<1x1xf32>
    %85 = vector.broadcast %18 : f32 to vector<1x1xf32>
    %86 = arith.divf %85, %84 : vector<1x1xf32>
    %cst_28 = arith.constant 9.99999974E-5 : f32
    %87 = vector.broadcast %cst_28 : f32 to vector<1x1xf32>
    %88 = arith.addf %82, %87 : vector<1x1xf32>
    %89 = vector.broadcast %20 : f32 to vector<1x1xf32>
    %90 = arith.divf %89, %88 : vector<1x1xf32>
    %91 = arith.mulf %86, %78 : vector<1x1xf32>
    %92 = arith.mulf %90, %82 : vector<1x1xf32>
    %93 = arith.addf %91, %92 : vector<1x1xf32>
    %c8 = arith.constant 8 : index
    %94 = arith.index_cast %6 : i32 to index
    %95 = memref.load %arg1[%c8, %94] : memref<15x16xf32, #tpu.memory_space<smem>>
    %c9 = arith.constant 9 : index
    %96 = arith.index_cast %6 : i32 to index
    %97 = memref.load %arg1[%c9, %96] : memref<15x16xf32, #tpu.memory_space<smem>>
    %c10 = arith.constant 10 : index
    %98 = arith.index_cast %6 : i32 to index
    %99 = memref.load %arg1[%c10, %98] : memref<15x16xf32, #tpu.memory_space<smem>>
    %c11 = arith.constant 11 : index
    %100 = arith.index_cast %6 : i32 to index
    %101 = memref.load %arg1[%c11, %100] : memref<15x16xf32, #tpu.memory_space<smem>>
    %c12 = arith.constant 12 : index
    %102 = arith.index_cast %6 : i32 to index
    %103 = memref.load %arg1[%c12, %102] : memref<15x16xf32, #tpu.memory_space<smem>>
    %c13 = arith.constant 13 : index
    %104 = arith.index_cast %6 : i32 to index
    %105 = memref.load %arg1[%c13, %104] : memref<15x16xf32, #tpu.memory_space<smem>>
    %c14 = arith.constant 14 : index
    %106 = arith.index_cast %6 : i32 to index
    %107 = memref.load %arg1[%c14, %106] : memref<15x16xf32, #tpu.memory_space<smem>>
    %108 = vector.broadcast %95 : f32 to vector<2x128xf32>
    %109 = arith.subf %3, %108 : vector<2x128xf32>
    %110 = vector.broadcast %97 : f32 to vector<2x128xf32>
    %111 = arith.subf %4, %110 : vector<2x128xf32>
    %112 = vector.broadcast %101 : f32 to vector<2x128xf32>
    %113 = arith.mulf %112, %111 : vector<2x128xf32>
    %114 = arith.addf %109, %113 : vector<2x128xf32>
    %115 = arith.mulf %114, %114 : vector<2x128xf32>
    %116 = vector.broadcast %99 : f32 to vector<2x128xf32>
    %117 = arith.mulf %116, %115 : vector<2x128xf32>
    %118 = arith.mulf %111, %111 : vector<2x128xf32>
    %119 = vector.broadcast %103 : f32 to vector<2x128xf32>
    %120 = arith.mulf %119, %118 : vector<2x128xf32>
    %121 = arith.addf %117, %120 : vector<2x128xf32>
    %122 = math.exp %121 : vector<2x128xf32>
    %cst_29 = arith.constant dense<0.000000e+00> : vector<2xf32>
    %123 = vector.multi_reduction <add>, %122, %cst_29 [1] : vector<2x128xf32> to vector<2xf32>
    %124 = vector.shape_cast %123 : vector<2xf32> to vector<2x1xf32>
    %cst_30 = arith.constant dense<0.000000e+00> : vector<1xf32>
    %125 = vector.multi_reduction <add>, %124, %cst_30 [0] : vector<2x1xf32> to vector<1xf32>
    %126 = vector.shape_cast %125 : vector<1xf32> to vector<1x1xf32>
    %127 = arith.mulf %107, %105 : f32
    %128 = vector.broadcast %105 : f32 to vector<1x1xf32>
    %129 = arith.mulf %128, %126 : vector<1x1xf32>
    %cst_31 = arith.constant 9.99999974E-5 : f32
    %130 = vector.broadcast %cst_31 : f32 to vector<1x1xf32>
    %131 = arith.addf %129, %130 : vector<1x1xf32>
    %132 = vector.broadcast %127 : f32 to vector<1x1xf32>
    %133 = arith.divf %132, %131 : vector<1x1xf32>
    %134 = arith.mulf %133, %126 : vector<1x1xf32>
    %135 = arith.addf %93, %134 : vector<1x1xf32>
    %cst_32 = arith.constant 9.99999974E-5 : f32
    %136 = vector.broadcast %cst_32 : f32 to vector<1x1xf32>
    %137 = arith.addf %135, %136 : vector<1x1xf32>
    %138 = vector.broadcast %22 : f32 to vector<1x1xf32>
    %139 = arith.divf %138, %137 : vector<1x1xf32>
    %140 = arith.mulf %86, %139 : vector<1x1xf32>
    %141 = vector.broadcast %140 : vector<1x1xf32> to vector<2x128xf32>
    %142 = arith.mulf %36, %141 : vector<2x128xf32>
    %143 = arith.mulf %90, %139 : vector<1x1xf32>
    %144 = vector.broadcast %143 : vector<1x1xf32> to vector<2x128xf32>
    %145 = arith.mulf %74, %144 : vector<2x128xf32>
    %146 = arith.addf %142, %145 : vector<2x128xf32>
    %147 = arith.mulf %133, %139 : vector<1x1xf32>
    %148 = vector.broadcast %147 : vector<1x1xf32> to vector<2x128xf32>
    %149 = arith.mulf %122, %148 : vector<2x128xf32>
    %150 = arith.addf %146, %149 : vector<2x128xf32>
    %c0_33 = arith.constant 0 : index
    %c0_34 = arith.constant 0 : index
    %c0_35 = arith.constant 0 : index
    %151 = vector.load %arg7[%c0_33, %c0_34, %c0_35] : memref<8x2x128xf32, #tpu.memory_space<vmem>>, vector<1x2x128xf32>
    %152 = vector.shape_cast %151 : vector<1x2x128xf32> to vector<2x128xf32>
    %153 = vector.shape_cast %150 : vector<2x128xf32> to vector<1x2x128xf32>
    tpu.vector_store %arg7[%c0_33, %c0_34, %c0_35], %153 {strides = array<i32>} : memref<8x2x128xf32, #tpu.memory_space<vmem>>, vector<1x2x128xf32>,
    %c8_i32_36 = arith.constant 8 : i32
    %154 = arith.muli %arg0, %c8_i32_36 : i32
    %c1_i32 = arith.constant 1 : i32
    %155 = arith.addi %154, %c1_i32 : i32
    %c0_37 = arith.constant 0 : index
    %156 = arith.index_cast %155 : i32 to index
    %157 = memref.load %arg1[%c0_37, %156] : memref<15x16xf32, #tpu.memory_space<smem>>
    %c1_38 = arith.constant 1 : index
    %158 = arith.index_cast %155 : i32 to index
    %159 = memref.load %arg1[%c1_38, %158] : memref<15x16xf32, #tpu.memory_space<smem>>
    %c2_39 = arith.constant 2 : index
    %160 = arith.index_cast %155 : i32 to index
    %161 = memref.load %arg1[%c2_39, %160] : memref<15x16xf32, #tpu.memory_space<smem>>
    %c3_40 = arith.constant 3 : index
    %162 = arith.index_cast %155 : i32 to index
    %163 = memref.load %arg1[%c3_40, %162] : memref<15x16xf32, #tpu.memory_space<smem>>
    %c4_41 = arith.constant 4 : index
    %164 = arith.index_cast %155 : i32 to index
    %165 = memref.load %arg1[%c4_41, %164] : memref<15x16xf32, #tpu.memory_space<smem>>
    %c5_42 = arith.constant 5 : index
    %166 = arith.index_cast %155 : i32 to index
    %167 = memref.load %arg1[%c5_42, %166] : memref<15x16xf32, #tpu.memory_space<smem>>
    %c6_43 = arith.constant 6 : index
    %168 = arith.index_cast %155 : i32 to index
    %169 = memref.load %arg1[%c6_43, %168] : memref<15x16xf32, #tpu.memory_space<smem>>
    %c7_44 = arith.constant 7 : index
    %170 = arith.index_cast %155 : i32 to index
    %171 = memref.load %arg1[%c7_44, %170] : memref<15x16xf32, #tpu.memory_space<smem>>
    %172 = vector.broadcast %157 : f32 to vector<2x128xf32>
    %173 = arith.subf %0, %172 : vector<2x128xf32>
    %174 = arith.mulf %173, %173 : vector<2x128xf32>
    %175 = vector.broadcast %159 : f32 to vector<2x128xf32>
    %176 = arith.mulf %174, %175 : vector<2x128xf32>
    %177 = math.exp %176 : vector<2x128xf32>
    %178 = vector.broadcast %163 : f32 to vector<2x128xf32>
    %179 = arith.mulf %178, %1 : vector<2x128xf32>
    %cst_45 = arith.constant 1.000000e+00 : f32
    %180 = vector.broadcast %cst_45 : f32 to vector<2x128xf32>
    %181 = arith.addf %180, %179 : vector<2x128xf32>
    %182 = vector.broadcast %165 : f32 to vector<2x128xf32>
    %183 = arith.mulf %182, %2 : vector<2x128xf32>
    %184 = arith.addf %181, %183 : vector<2x128xf32>
    %185 = arith.mulf %184, %177 : vector<2x128xf32>
    %186 = math.absf %173 : vector<2x128xf32>
    %187 = vector.broadcast %161 : f32 to vector<2x128xf32>
    %188 = arith.mulf %186, %187 : vector<2x128xf32>
    %cst_46 = arith.constant 0.327591091 : f32
    %189 = vector.broadcast %cst_46 : f32 to vector<2x128xf32>
    %190 = arith.mulf %189, %188 : vector<2x128xf32>
    %cst_47 = arith.constant 1.000000e+00 : f32
    %191 = vector.broadcast %cst_47 : f32 to vector<2x128xf32>
    %192 = arith.addf %191, %190 : vector<2x128xf32>
    %193 = tpu.reciprocal %192 {approx = true} : vector<2x128xf32> -> vector<2x128xf32>
    %194 = arith.mulf %192, %193 : vector<2x128xf32>
    %cst_48 = arith.constant 2.000000e+00 : f32
    %195 = vector.broadcast %cst_48 : f32 to vector<2x128xf32>
    %196 = arith.subf %195, %194 : vector<2x128xf32>
    %197 = arith.mulf %193, %196 : vector<2x128xf32>
    %cst_49 = arith.constant 1.06140542 : f32
    %198 = vector.broadcast %cst_49 : f32 to vector<2x128xf32>
    %199 = arith.mulf %198, %197 : vector<2x128xf32>
    %cst_50 = arith.constant 1.45315206 : f32
    %200 = vector.broadcast %cst_50 : f32 to vector<2x128xf32>
    %201 = arith.subf %199, %200 : vector<2x128xf32>
    %202 = arith.mulf %201, %197 : vector<2x128xf32>
    %cst_51 = arith.constant 1.42141378 : f32
    %203 = vector.broadcast %cst_51 : f32 to vector<2x128xf32>
    %204 = arith.addf %202, %203 : vector<2x128xf32>
    %205 = arith.mulf %204, %197 : vector<2x128xf32>
    %cst_52 = arith.constant 0.284496725 : f32
    %206 = vector.broadcast %cst_52 : f32 to vector<2x128xf32>
    %207 = arith.subf %205, %206 : vector<2x128xf32>
    %208 = arith.mulf %207, %197 : vector<2x128xf32>
    %cst_53 = arith.constant 0.254829586 : f32
    %209 = vector.broadcast %cst_53 : f32 to vector<2x128xf32>
    %210 = arith.addf %208, %209 : vector<2x128xf32>
    %211 = arith.mulf %210, %197 : vector<2x128xf32>
    %212 = arith.mulf %211, %177 : vector<2x128xf32>
    %cst_54 = arith.constant 1.000000e+00 : f32
    %213 = vector.broadcast %cst_54 : f32 to vector<2x128xf32>
    %214 = arith.subf %213, %212 : vector<2x128xf32>
    %cst_55 = arith.constant 0.000000e+00 : f32
    %215 = vector.broadcast %cst_55 : f32 to vector<2x128xf32>
    %216 = arith.cmpf ole, %173, %215 : vector<2x128xf32>
    %cst_56 = arith.constant 0.000000e+00 : f32
    %217 = vector.broadcast %cst_56 : f32 to vector<2x128xf32>
    %218 = arith.subf %217, %214 : vector<2x128xf32>
    %219 = arith.select %216, %214, %218 : vector<2x128xi1>, vector<2x128xf32>
    %cst_57 = arith.constant 1.000000e+00 : f32
    %220 = vector.broadcast %cst_57 : f32 to vector<2x128xf32>
    %221 = arith.addf %220, %219 : vector<2x128xf32>
    %cst_58 = arith.constant 5.000000e-01 : f32
    %222 = vector.broadcast %cst_58 : f32 to vector<2x128xf32>
    %223 = arith.mulf %222, %221 : vector<2x128xf32>
    %cst_59 = arith.constant dense<0.000000e+00> : vector<2xf32>
    %224 = vector.multi_reduction <add>, %185, %cst_59 [1] : vector<2x128xf32> to vector<2xf32>
    %225 = vector.shape_cast %224 : vector<2xf32> to vector<2x1xf32>
    %cst_60 = arith.constant dense<0.000000e+00> : vector<1xf32>
    %226 = vector.multi_reduction <add>, %225, %cst_60 [0] : vector<2x1xf32> to vector<1xf32>
    %227 = vector.shape_cast %226 : vector<1xf32> to vector<1x1xf32>
    %cst_61 = arith.constant dense<0.000000e+00> : vector<2xf32>
    %228 = vector.multi_reduction <add>, %223, %cst_61 [1] : vector<2x128xf32> to vector<2xf32>
    %229 = vector.shape_cast %228 : vector<2xf32> to vector<2x1xf32>
    %cst_62 = arith.constant dense<0.000000e+00> : vector<1xf32>
    %230 = vector.multi_reduction <add>, %229, %cst_62 [0] : vector<2x1xf32> to vector<1xf32>
    %231 = vector.shape_cast %230 : vector<1xf32> to vector<1x1xf32>
    %cst_63 = arith.constant 9.99999974E-5 : f32
    %232 = vector.broadcast %cst_63 : f32 to vector<1x1xf32>
    %233 = arith.addf %227, %232 : vector<1x1xf32>
    %234 = vector.broadcast %167 : f32 to vector<1x1xf32>
    %235 = arith.divf %234, %233 : vector<1x1xf32>
    %cst_64 = arith.constant 9.99999974E-5 : f32
    %236 = vector.broadcast %cst_64 : f32 to vector<1x1xf32>
    %237 = arith.addf %231, %236 : vector<1x1xf32>
    %238 = vector.broadcast %169 : f32 to vector<1x1xf32>
    %239 = arith.divf %238, %237 : vector<1x1xf32>
    %240 = arith.mulf %235, %227 : vector<1x1xf32>
    %241 = arith.mulf %239, %231 : vector<1x1xf32>
    %242 = arith.addf %240, %241 : vector<1x1xf32>
    %c8_65 = arith.constant 8 : index
    %243 = arith.index_cast %155 : i32 to index
    %244 = memref.load %arg1[%c8_65, %243] : memref<15x16xf32, #tpu.memory_space<smem>>
    %c9_66 = arith.constant 9 : index
    %245 = arith.index_cast %155 : i32 to index
    %246 = memref.load %arg1[%c9_66, %245] : memref<15x16xf32, #tpu.memory_space<smem>>
    %c10_67 = arith.constant 10 : index
    %247 = arith.index_cast %155 : i32 to index
    %248 = memref.load %arg1[%c10_67, %247] : memref<15x16xf32, #tpu.memory_space<smem>>
    %c11_68 = arith.constant 11 : index
    %249 = arith.index_cast %155 : i32 to index
    %250 = memref.load %arg1[%c11_68, %249] : memref<15x16xf32, #tpu.memory_space<smem>>
    %c12_69 = arith.constant 12 : index
    %251 = arith.index_cast %155 : i32 to index
    %252 = memref.load %arg1[%c12_69, %251] : memref<15x16xf32, #tpu.memory_space<smem>>
    %c13_70 = arith.constant 13 : index
    %253 = arith.index_cast %155 : i32 to index
    %254 = memref.load %arg1[%c13_70, %253] : memref<15x16xf32, #tpu.memory_space<smem>>
    %c14_71 = arith.constant 14 : index
    %255 = arith.index_cast %155 : i32 to index
    %256 = memref.load %arg1[%c14_71, %255] : memref<15x16xf32, #tpu.memory_space<smem>>
    %257 = vector.broadcast %244 : f32 to vector<2x128xf32>
    %258 = arith.subf %3, %257 : vector<2x128xf32>
    %259 = vector.broadcast %246 : f32 to vector<2x128xf32>
    %260 = arith.subf %4, %259 : vector<2x128xf32>
    %261 = vector.broadcast %250 : f32 to vector<2x128xf32>
    %262 = arith.mulf %261, %260 : vector<2x128xf32>
    %263 = arith.addf %258, %262 : vector<2x128xf32>
    %264 = arith.mulf %263, %263 : vector<2x128xf32>
    %265 = vector.broadcast %248 : f32 to vector<2x128xf32>
    %266 = arith.mulf %265, %264 : vector<2x128xf32>
    %267 = arith.mulf %260, %260 : vector<2x128xf32>
    %268 = vector.broadcast %252 : f32 to vector<2x128xf32>
    %269 = arith.mulf %268, %267 : vector<2x128xf32>
    %270 = arith.addf %266, %269 : vector<2x128xf32>
    %271 = math.exp %270 : vector<2x128xf32>
    %cst_72 = arith.constant dense<0.000000e+00> : vector<2xf32>
    %272 = vector.multi_reduction <add>, %271, %cst_72 [1] : vector<2x128xf32> to vector<2xf32>
    %273 = vector.shape_cast %272 : vector<2xf32> to vector<2x1xf32>
    %cst_73 = arith.constant dense<0.000000e+00> : vector<1xf32>
    %274 = vector.multi_reduction <add>, %273, %cst_73 [0] : vector<2x1xf32> to vector<1xf32>
    %275 = vector.shape_cast %274 : vector<1xf32> to vector<1x1xf32>
    %276 = arith.mulf %256, %254 : f32
    %277 = vector.broadcast %254 : f32 to vector<1x1xf32>
    %278 = arith.mulf %277, %275 : vector<1x1xf32>
    %cst_74 = arith.constant 9.99999974E-5 : f32
    %279 = vector.broadcast %cst_74 : f32 to vector<1x1xf32>
    %280 = arith.addf %278, %279 : vector<1x1xf32>
    %281 = vector.broadcast %276 : f32 to vector<1x1xf32>
    %282 = arith.divf %281, %280 : vector<1x1xf32>
    %283 = arith.mulf %282, %275 : vector<1x1xf32>
    %284 = arith.addf %242, %283 : vector<1x1xf32>
    %cst_75 = arith.constant 9.99999974E-5 : f32
    %285 = vector.broadcast %cst_75 : f32 to vector<1x1xf32>
    %286 = arith.addf %284, %285 : vector<1x1xf32>
    %287 = vector.broadcast %171 : f32 to vector<1x1xf32>
    %288 = arith.divf %287, %286 : vector<1x1xf32>
    %289 = arith.mulf %235, %288 : vector<1x1xf32>
    %290 = vector.broadcast %289 : vector<1x1xf32> to vector<2x128xf32>
    %291 = arith.mulf %185, %290 : vector<2x128xf32>
    %292 = arith.mulf %239, %288 : vector<1x1xf32>
    %293 = vector.broadcast %292 : vector<1x1xf32> to vector<2x128xf32>
    %294 = arith.mulf %223, %293 : vector<2x128xf32>
    %295 = arith.addf %291, %294 : vector<2x128xf32>
    %296 = arith.mulf %282, %288 : vector<1x1xf32>
    %297 = vector.broadcast %296 : vector<1x1xf32> to vector<2x128xf32>
    %298 = arith.mulf %271, %297 : vector<2x128xf32>
    %299 = arith.addf %295, %298 : vector<2x128xf32>
    %c1_76 = arith.constant 1 : index
    %c0_77 = arith.constant 0 : index
    %c0_78 = arith.constant 0 : index
    %300 = vector.load %arg7[%c1_76, %c0_77, %c0_78] : memref<8x2x128xf32, #tpu.memory_space<vmem>>, vector<1x2x128xf32>
    %301 = vector.shape_cast %300 : vector<1x2x128xf32> to vector<2x128xf32>
    %302 = vector.shape_cast %299 : vector<2x128xf32> to vector<1x2x128xf32>
    tpu.vector_store %arg7[%c1_76, %c0_77, %c0_78], %302 {strides = array<i32>} : memref<8x2x128xf32, #tpu.memory_space<vmem>>, vector<1x2x128xf32>,
    %c8_i32_79 = arith.constant 8 : i32
    %303 = arith.muli %arg0, %c8_i32_79 : i32
    %c2_i32 = arith.constant 2 : i32
    %304 = arith.addi %303, %c2_i32 : i32
    %c0_80 = arith.constant 0 : index
    %305 = arith.index_cast %304 : i32 to index
    %306 = memref.load %arg1[%c0_80, %305] : memref<15x16xf32, #tpu.memory_space<smem>>
    %c1_81 = arith.constant 1 : index
    %307 = arith.index_cast %304 : i32 to index
    %308 = memref.load %arg1[%c1_81, %307] : memref<15x16xf32, #tpu.memory_space<smem>>
    %c2_82 = arith.constant 2 : index
    %309 = arith.index_cast %304 : i32 to index
    %310 = memref.load %arg1[%c2_82, %309] : memref<15x16xf32, #tpu.memory_space<smem>>
    %c3_83 = arith.constant 3 : index
    %311 = arith.index_cast %304 : i32 to index
    %312 = memref.load %arg1[%c3_83, %311] : memref<15x16xf32, #tpu.memory_space<smem>>
    %c4_84 = arith.constant 4 : index
    %313 = arith.index_cast %304 : i32 to index
    %314 = memref.load %arg1[%c4_84, %313] : memref<15x16xf32, #tpu.memory_space<smem>>
    %c5_85 = arith.constant 5 : index
    %315 = arith.index_cast %304 : i32 to index
    %316 = memref.load %arg1[%c5_85, %315] : memref<15x16xf32, #tpu.memory_space<smem>>
    %c6_86 = arith.constant 6 : index
    %317 = arith.index_cast %304 : i32 to index
    %318 = memref.load %arg1[%c6_86, %317] : memref<15x16xf32, #tpu.memory_space<smem>>
    %c7_87 = arith.constant 7 : index
    %319 = arith.index_cast %304 : i32 to index
    %320 = memref.load %arg1[%c7_87, %319] : memref<15x16xf32, #tpu.memory_space<smem>>
    %321 = vector.broadcast %306 : f32 to vector<2x128xf32>
    %322 = arith.subf %0, %321 : vector<2x128xf32>
    %323 = arith.mulf %322, %322 : vector<2x128xf32>
    %324 = vector.broadcast %308 : f32 to vector<2x128xf32>
    %325 = arith.mulf %323, %324 : vector<2x128xf32>
    %326 = math.exp %325 : vector<2x128xf32>
    %327 = vector.broadcast %312 : f32 to vector<2x128xf32>
    %328 = arith.mulf %327, %1 : vector<2x128xf32>
    %cst_88 = arith.constant 1.000000e+00 : f32
    %329 = vector.broadcast %cst_88 : f32 to vector<2x128xf32>
    %330 = arith.addf %329, %328 : vector<2x128xf32>
    %331 = vector.broadcast %314 : f32 to vector<2x128xf32>
    %332 = arith.mulf %331, %2 : vector<2x128xf32>
    %333 = arith.addf %330, %332 : vector<2x128xf32>
    %334 = arith.mulf %333, %326 : vector<2x128xf32>
    %335 = math.absf %322 : vector<2x128xf32>
    %336 = vector.broadcast %310 : f32 to vector<2x128xf32>
    %337 = arith.mulf %335, %336 : vector<2x128xf32>
    %cst_89 = arith.constant 0.327591091 : f32
    %338 = vector.broadcast %cst_89 : f32 to vector<2x128xf32>
    %339 = arith.mulf %338, %337 : vector<2x128xf32>
    %cst_90 = arith.constant 1.000000e+00 : f32
    %340 = vector.broadcast %cst_90 : f32 to vector<2x128xf32>
    %341 = arith.addf %340, %339 : vector<2x128xf32>
    %342 = tpu.reciprocal %341 {approx = true} : vector<2x128xf32> -> vector<2x128xf32>
    %343 = arith.mulf %341, %342 : vector<2x128xf32>
    %cst_91 = arith.constant 2.000000e+00 : f32
    %344 = vector.broadcast %cst_91 : f32 to vector<2x128xf32>
    %345 = arith.subf %344, %343 : vector<2x128xf32>
    %346 = arith.mulf %342, %345 : vector<2x128xf32>
    %cst_92 = arith.constant 1.06140542 : f32
    %347 = vector.broadcast %cst_92 : f32 to vector<2x128xf32>
    %348 = arith.mulf %347, %346 : vector<2x128xf32>
    %cst_93 = arith.constant 1.45315206 : f32
    %349 = vector.broadcast %cst_93 : f32 to vector<2x128xf32>
    %350 = arith.subf %348, %349 : vector<2x128xf32>
    %351 = arith.mulf %350, %346 : vector<2x128xf32>
    %cst_94 = arith.constant 1.42141378 : f32
    %352 = vector.broadcast %cst_94 : f32 to vector<2x128xf32>
    %353 = arith.addf %351, %352 : vector<2x128xf32>
    %354 = arith.mulf %353, %346 : vector<2x128xf32>
    %cst_95 = arith.constant 0.284496725 : f32
    %355 = vector.broadcast %cst_95 : f32 to vector<2x128xf32>
    %356 = arith.subf %354, %355 : vector<2x128xf32>
    %357 = arith.mulf %356, %346 : vector<2x128xf32>
    %cst_96 = arith.constant 0.254829586 : f32
    %358 = vector.broadcast %cst_96 : f32 to vector<2x128xf32>
    %359 = arith.addf %357, %358 : vector<2x128xf32>
    %360 = arith.mulf %359, %346 : vector<2x128xf32>
    %361 = arith.mulf %360, %326 : vector<2x128xf32>
    %cst_97 = arith.constant 1.000000e+00 : f32
    %362 = vector.broadcast %cst_97 : f32 to vector<2x128xf32>
    %363 = arith.subf %362, %361 : vector<2x128xf32>
    %cst_98 = arith.constant 0.000000e+00 : f32
    %364 = vector.broadcast %cst_98 : f32 to vector<2x128xf32>
    %365 = arith.cmpf ole, %322, %364 : vector<2x128xf32>
    %cst_99 = arith.constant 0.000000e+00 : f32
    %366 = vector.broadcast %cst_99 : f32 to vector<2x128xf32>
    %367 = arith.subf %366, %363 : vector<2x128xf32>
    %368 = arith.select %365, %363, %367 : vector<2x128xi1>, vector<2x128xf32>
    %cst_100 = arith.constant 1.000000e+00 : f32
    %369 = vector.broadcast %cst_100 : f32 to vector<2x128xf32>
    %370 = arith.addf %369, %368 : vector<2x128xf32>
    %cst_101 = arith.constant 5.000000e-01 : f32
    %371 = vector.broadcast %cst_101 : f32 to vector<2x128xf32>
    %372 = arith.mulf %371, %370 : vector<2x128xf32>
    %cst_102 = arith.constant dense<0.000000e+00> : vector<2xf32>
    %373 = vector.multi_reduction <add>, %334, %cst_102 [1] : vector<2x128xf32> to vector<2xf32>
    %374 = vector.shape_cast %373 : vector<2xf32> to vector<2x1xf32>
    %cst_103 = arith.constant dense<0.000000e+00> : vector<1xf32>
    %375 = vector.multi_reduction <add>, %374, %cst_103 [0] : vector<2x1xf32> to vector<1xf32>
    %376 = vector.shape_cast %375 : vector<1xf32> to vector<1x1xf32>
    %cst_104 = arith.constant dense<0.000000e+00> : vector<2xf32>
    %377 = vector.multi_reduction <add>, %372, %cst_104 [1] : vector<2x128xf32> to vector<2xf32>
    %378 = vector.shape_cast %377 : vector<2xf32> to vector<2x1xf32>
    %cst_105 = arith.constant dense<0.000000e+00> : vector<1xf32>
    %379 = vector.multi_reduction <add>, %378, %cst_105 [0] : vector<2x1xf32> to vector<1xf32>
    %380 = vector.shape_cast %379 : vector<1xf32> to vector<1x1xf32>
    %cst_106 = arith.constant 9.99999974E-5 : f32
    %381 = vector.broadcast %cst_106 : f32 to vector<1x1xf32>
    %382 = arith.addf %376, %381 : vector<1x1xf32>
    %383 = vector.broadcast %316 : f32 to vector<1x1xf32>
    %384 = arith.divf %383, %382 : vector<1x1xf32>
    %cst_107 = arith.constant 9.99999974E-5 : f32
    %385 = vector.broadcast %cst_107 : f32 to vector<1x1xf32>
    %386 = arith.addf %380, %385 : vector<1x1xf32>
    %387 = vector.broadcast %318 : f32 to vector<1x1xf32>
    %388 = arith.divf %387, %386 : vector<1x1xf32>
    %389 = arith.mulf %384, %376 : vector<1x1xf32>
    %390 = arith.mulf %388, %380 : vector<1x1xf32>
    %391 = arith.addf %389, %390 : vector<1x1xf32>
    %c8_108 = arith.constant 8 : index
    %392 = arith.index_cast %304 : i32 to index
    %393 = memref.load %arg1[%c8_108, %392] : memref<15x16xf32, #tpu.memory_space<smem>>
    %c9_109 = arith.constant 9 : index
    %394 = arith.index_cast %304 : i32 to index
    %395 = memref.load %arg1[%c9_109, %394] : memref<15x16xf32, #tpu.memory_space<smem>>
    %c10_110 = arith.constant 10 : index
    %396 = arith.index_cast %304 : i32 to index
    %397 = memref.load %arg1[%c10_110, %396] : memref<15x16xf32, #tpu.memory_space<smem>>
    %c11_111 = arith.constant 11 : index
    %398 = arith.index_cast %304 : i32 to index
    %399 = memref.load %arg1[%c11_111, %398] : memref<15x16xf32, #tpu.memory_space<smem>>
    %c12_112 = arith.constant 12 : index
    %400 = arith.index_cast %304 : i32 to index
    %401 = memref.load %arg1[%c12_112, %400] : memref<15x16xf32, #tpu.memory_space<smem>>
    %c13_113 = arith.constant 13 : index
    %402 = arith.index_cast %304 : i32 to index
    %403 = memref.load %arg1[%c13_113, %402] : memref<15x16xf32, #tpu.memory_space<smem>>
    %c14_114 = arith.constant 14 : index
    %404 = arith.index_cast %304 : i32 to index
    %405 = memref.load %arg1[%c14_114, %404] : memref<15x16xf32, #tpu.memory_space<smem>>
    %406 = vector.broadcast %393 : f32 to vector<2x128xf32>
    %407 = arith.subf %3, %406 : vector<2x128xf32>
    %408 = vector.broadcast %395 : f32 to vector<2x128xf32>
    %409 = arith.subf %4, %408 : vector<2x128xf32>
    %410 = vector.broadcast %399 : f32 to vector<2x128xf32>
    %411 = arith.mulf %410, %409 : vector<2x128xf32>
    %412 = arith.addf %407, %411 : vector<2x128xf32>
    %413 = arith.mulf %412, %412 : vector<2x128xf32>
    %414 = vector.broadcast %397 : f32 to vector<2x128xf32>
    %415 = arith.mulf %414, %413 : vector<2x128xf32>
    %416 = arith.mulf %409, %409 : vector<2x128xf32>
    %417 = vector.broadcast %401 : f32 to vector<2x128xf32>
    %418 = arith.mulf %417, %416 : vector<2x128xf32>
    %419 = arith.addf %415, %418 : vector<2x128xf32>
    %420 = math.exp %419 : vector<2x128xf32>
    %cst_115 = arith.constant dense<0.000000e+00> : vector<2xf32>
    %421 = vector.multi_reduction <add>, %420, %cst_115 [1] : vector<2x128xf32> to vector<2xf32>
    %422 = vector.shape_cast %421 : vector<2xf32> to vector<2x1xf32>
    %cst_116 = arith.constant dense<0.000000e+00> : vector<1xf32>
    %423 = vector.multi_reduction <add>, %422, %cst_116 [0] : vector<2x1xf32> to vector<1xf32>
    %424 = vector.shape_cast %423 : vector<1xf32> to vector<1x1xf32>
    %425 = arith.mulf %405, %403 : f32
    %426 = vector.broadcast %403 : f32 to vector<1x1xf32>
    %427 = arith.mulf %426, %424 : vector<1x1xf32>
    %cst_117 = arith.constant 9.99999974E-5 : f32
    %428 = vector.broadcast %cst_117 : f32 to vector<1x1xf32>
    %429 = arith.addf %427, %428 : vector<1x1xf32>
    %430 = vector.broadcast %425 : f32 to vector<1x1xf32>
    %431 = arith.divf %430, %429 : vector<1x1xf32>
    %432 = arith.mulf %431, %424 : vector<1x1xf32>
    %433 = arith.addf %391, %432 : vector<1x1xf32>
    %cst_118 = arith.constant 9.99999974E-5 : f32
    %434 = vector.broadcast %cst_118 : f32 to vector<1x1xf32>
    %435 = arith.addf %433, %434 : vector<1x1xf32>
    %436 = vector.broadcast %320 : f32 to vector<1x1xf32>
    %437 = arith.divf %436, %435 : vector<1x1xf32>
    %438 = arith.mulf %384, %437 : vector<1x1xf32>
    %439 = vector.broadcast %438 : vector<1x1xf32> to vector<2x128xf32>
    %440 = arith.mulf %334, %439 : vector<2x128xf32>
    %441 = arith.mulf %388, %437 : vector<1x1xf32>
    %442 = vector.broadcast %441 : vector<1x1xf32> to vector<2x128xf32>
    %443 = arith.mulf %372, %442 : vector<2x128xf32>
    %444 = arith.addf %440, %443 : vector<2x128xf32>
    %445 = arith.mulf %431, %437 : vector<1x1xf32>
    %446 = vector.broadcast %445 : vector<1x1xf32> to vector<2x128xf32>
    %447 = arith.mulf %420, %446 : vector<2x128xf32>
    %448 = arith.addf %444, %447 : vector<2x128xf32>
    %c2_119 = arith.constant 2 : index
    %c0_120 = arith.constant 0 : index
    %c0_121 = arith.constant 0 : index
    %449 = vector.load %arg7[%c2_119, %c0_120, %c0_121] : memref<8x2x128xf32, #tpu.memory_space<vmem>>, vector<1x2x128xf32>
    %450 = vector.shape_cast %449 : vector<1x2x128xf32> to vector<2x128xf32>
    %451 = vector.shape_cast %448 : vector<2x128xf32> to vector<1x2x128xf32>
    tpu.vector_store %arg7[%c2_119, %c0_120, %c0_121], %451 {strides = array<i32>} : memref<8x2x128xf32, #tpu.memory_space<vmem>>, vector<1x2x128xf32>,
    %c8_i32_122 = arith.constant 8 : i32
    %452 = arith.muli %arg0, %c8_i32_122 : i32
    %c3_i32 = arith.constant 3 : i32
    %453 = arith.addi %452, %c3_i32 : i32
    %c0_123 = arith.constant 0 : index
    %454 = arith.index_cast %453 : i32 to index
    %455 = memref.load %arg1[%c0_123, %454] : memref<15x16xf32, #tpu.memory_space<smem>>
    %c1_124 = arith.constant 1 : index
    %456 = arith.index_cast %453 : i32 to index
    %457 = memref.load %arg1[%c1_124, %456] : memref<15x16xf32, #tpu.memory_space<smem>>
    %c2_125 = arith.constant 2 : index
    %458 = arith.index_cast %453 : i32 to index
    %459 = memref.load %arg1[%c2_125, %458] : memref<15x16xf32, #tpu.memory_space<smem>>
    %c3_126 = arith.constant 3 : index
    %460 = arith.index_cast %453 : i32 to index
    %461 = memref.load %arg1[%c3_126, %460] : memref<15x16xf32, #tpu.memory_space<smem>>
    %c4_127 = arith.constant 4 : index
    %462 = arith.index_cast %453 : i32 to index
    %463 = memref.load %arg1[%c4_127, %462] : memref<15x16xf32, #tpu.memory_space<smem>>
    %c5_128 = arith.constant 5 : index
    %464 = arith.index_cast %453 : i32 to index
    %465 = memref.load %arg1[%c5_128, %464] : memref<15x16xf32, #tpu.memory_space<smem>>
    %c6_129 = arith.constant 6 : index
    %466 = arith.index_cast %453 : i32 to index
    %467 = memref.load %arg1[%c6_129, %466] : memref<15x16xf32, #tpu.memory_space<smem>>
    %c7_130 = arith.constant 7 : index
    %468 = arith.index_cast %453 : i32 to index
    %469 = memref.load %arg1[%c7_130, %468] : memref<15x16xf32, #tpu.memory_space<smem>>
    %470 = vector.broadcast %455 : f32 to vector<2x128xf32>
    %471 = arith.subf %0, %470 : vector<2x128xf32>
    %472 = arith.mulf %471, %471 : vector<2x128xf32>
    %473 = vector.broadcast %457 : f32 to vector<2x128xf32>
    %474 = arith.mulf %472, %473 : vector<2x128xf32>
    %475 = math.exp %474 : vector<2x128xf32>
    %476 = vector.broadcast %461 : f32 to vector<2x128xf32>
    %477 = arith.mulf %476, %1 : vector<2x128xf32>
    %cst_131 = arith.constant 1.000000e+00 : f32
    %478 = vector.broadcast %cst_131 : f32 to vector<2x128xf32>
    %479 = arith.addf %478, %477 : vector<2x128xf32>
    %480 = vector.broadcast %463 : f32 to vector<2x128xf32>
    %481 = arith.mulf %480, %2 : vector<2x128xf32>
    %482 = arith.addf %479, %481 : vector<2x128xf32>
    %483 = arith.mulf %482, %475 : vector<2x128xf32>
    %484 = math.absf %471 : vector<2x128xf32>
    %485 = vector.broadcast %459 : f32 to vector<2x128xf32>
    %486 = arith.mulf %484, %485 : vector<2x128xf32>
    %cst_132 = arith.constant 0.327591091 : f32
    %487 = vector.broadcast %cst_132 : f32 to vector<2x128xf32>
    %488 = arith.mulf %487, %486 : vector<2x128xf32>
    %cst_133 = arith.constant 1.000000e+00 : f32
    %489 = vector.broadcast %cst_133 : f32 to vector<2x128xf32>
    %490 = arith.addf %489, %488 : vector<2x128xf32>
    %491 = tpu.reciprocal %490 {approx = true} : vector<2x128xf32> -> vector<2x128xf32>
    %492 = arith.mulf %490, %491 : vector<2x128xf32>
    %cst_134 = arith.constant 2.000000e+00 : f32
    %493 = vector.broadcast %cst_134 : f32 to vector<2x128xf32>
    %494 = arith.subf %493, %492 : vector<2x128xf32>
    %495 = arith.mulf %491, %494 : vector<2x128xf32>
    %cst_135 = arith.constant 1.06140542 : f32
    %496 = vector.broadcast %cst_135 : f32 to vector<2x128xf32>
    %497 = arith.mulf %496, %495 : vector<2x128xf32>
    %cst_136 = arith.constant 1.45315206 : f32
    %498 = vector.broadcast %cst_136 : f32 to vector<2x128xf32>
    %499 = arith.subf %497, %498 : vector<2x128xf32>
    %500 = arith.mulf %499, %495 : vector<2x128xf32>
    %cst_137 = arith.constant 1.42141378 : f32
    %501 = vector.broadcast %cst_137 : f32 to vector<2x128xf32>
    %502 = arith.addf %500, %501 : vector<2x128xf32>
    %503 = arith.mulf %502, %495 : vector<2x128xf32>
    %cst_138 = arith.constant 0.284496725 : f32
    %504 = vector.broadcast %cst_138 : f32 to vector<2x128xf32>
    %505 = arith.subf %503, %504 : vector<2x128xf32>
    %506 = arith.mulf %505, %495 : vector<2x128xf32>
    %cst_139 = arith.constant 0.254829586 : f32
    %507 = vector.broadcast %cst_139 : f32 to vector<2x128xf32>
    %508 = arith.addf %506, %507 : vector<2x128xf32>
    %509 = arith.mulf %508, %495 : vector<2x128xf32>
    %510 = arith.mulf %509, %475 : vector<2x128xf32>
    %cst_140 = arith.constant 1.000000e+00 : f32
    %511 = vector.broadcast %cst_140 : f32 to vector<2x128xf32>
    %512 = arith.subf %511, %510 : vector<2x128xf32>
    %cst_141 = arith.constant 0.000000e+00 : f32
    %513 = vector.broadcast %cst_141 : f32 to vector<2x128xf32>
    %514 = arith.cmpf ole, %471, %513 : vector<2x128xf32>
    %cst_142 = arith.constant 0.000000e+00 : f32
    %515 = vector.broadcast %cst_142 : f32 to vector<2x128xf32>
    %516 = arith.subf %515, %512 : vector<2x128xf32>
    %517 = arith.select %514, %512, %516 : vector<2x128xi1>, vector<2x128xf32>
    %cst_143 = arith.constant 1.000000e+00 : f32
    %518 = vector.broadcast %cst_143 : f32 to vector<2x128xf32>
    %519 = arith.addf %518, %517 : vector<2x128xf32>
    %cst_144 = arith.constant 5.000000e-01 : f32
    %520 = vector.broadcast %cst_144 : f32 to vector<2x128xf32>
    %521 = arith.mulf %520, %519 : vector<2x128xf32>
    %cst_145 = arith.constant dense<0.000000e+00> : vector<2xf32>
    %522 = vector.multi_reduction <add>, %483, %cst_145 [1] : vector<2x128xf32> to vector<2xf32>
    %523 = vector.shape_cast %522 : vector<2xf32> to vector<2x1xf32>
    %cst_146 = arith.constant dense<0.000000e+00> : vector<1xf32>
    %524 = vector.multi_reduction <add>, %523, %cst_146 [0] : vector<2x1xf32> to vector<1xf32>
    %525 = vector.shape_cast %524 : vector<1xf32> to vector<1x1xf32>
    %cst_147 = arith.constant dense<0.000000e+00> : vector<2xf32>
    %526 = vector.multi_reduction <add>, %521, %cst_147 [1] : vector<2x128xf32> to vector<2xf32>
    %527 = vector.shape_cast %526 : vector<2xf32> to vector<2x1xf32>
    %cst_148 = arith.constant dense<0.000000e+00> : vector<1xf32>
    %528 = vector.multi_reduction <add>, %527, %cst_148 [0] : vector<2x1xf32> to vector<1xf32>
    %529 = vector.shape_cast %528 : vector<1xf32> to vector<1x1xf32>
    %cst_149 = arith.constant 9.99999974E-5 : f32
    %530 = vector.broadcast %cst_149 : f32 to vector<1x1xf32>
    %531 = arith.addf %525, %530 : vector<1x1xf32>
    %532 = vector.broadcast %465 : f32 to vector<1x1xf32>
    %533 = arith.divf %532, %531 : vector<1x1xf32>
    %cst_150 = arith.constant 9.99999974E-5 : f32
    %534 = vector.broadcast %cst_150 : f32 to vector<1x1xf32>
    %535 = arith.addf %529, %534 : vector<1x1xf32>
    %536 = vector.broadcast %467 : f32 to vector<1x1xf32>
    %537 = arith.divf %536, %535 : vector<1x1xf32>
    %538 = arith.mulf %533, %525 : vector<1x1xf32>
    %539 = arith.mulf %537, %529 : vector<1x1xf32>
    %540 = arith.addf %538, %539 : vector<1x1xf32>
    %c8_151 = arith.constant 8 : index
    %541 = arith.index_cast %453 : i32 to index
    %542 = memref.load %arg1[%c8_151, %541] : memref<15x16xf32, #tpu.memory_space<smem>>
    %c9_152 = arith.constant 9 : index
    %543 = arith.index_cast %453 : i32 to index
    %544 = memref.load %arg1[%c9_152, %543] : memref<15x16xf32, #tpu.memory_space<smem>>
    %c10_153 = arith.constant 10 : index
    %545 = arith.index_cast %453 : i32 to index
    %546 = memref.load %arg1[%c10_153, %545] : memref<15x16xf32, #tpu.memory_space<smem>>
    %c11_154 = arith.constant 11 : index
    %547 = arith.index_cast %453 : i32 to index
    %548 = memref.load %arg1[%c11_154, %547] : memref<15x16xf32, #tpu.memory_space<smem>>
    %c12_155 = arith.constant 12 : index
    %549 = arith.index_cast %453 : i32 to index
    %550 = memref.load %arg1[%c12_155, %549] : memref<15x16xf32, #tpu.memory_space<smem>>
    %c13_156 = arith.constant 13 : index
    %551 = arith.index_cast %453 : i32 to index
    %552 = memref.load %arg1[%c13_156, %551] : memref<15x16xf32, #tpu.memory_space<smem>>
    %c14_157 = arith.constant 14 : index
    %553 = arith.index_cast %453 : i32 to index
    %554 = memref.load %arg1[%c14_157, %553] : memref<15x16xf32, #tpu.memory_space<smem>>
    %555 = vector.broadcast %542 : f32 to vector<2x128xf32>
    %556 = arith.subf %3, %555 : vector<2x128xf32>
    %557 = vector.broadcast %544 : f32 to vector<2x128xf32>
    %558 = arith.subf %4, %557 : vector<2x128xf32>
    %559 = vector.broadcast %548 : f32 to vector<2x128xf32>
    %560 = arith.mulf %559, %558 : vector<2x128xf32>
    %561 = arith.addf %556, %560 : vector<2x128xf32>
    %562 = arith.mulf %561, %561 : vector<2x128xf32>
    %563 = vector.broadcast %546 : f32 to vector<2x128xf32>
    %564 = arith.mulf %563, %562 : vector<2x128xf32>
    %565 = arith.mulf %558, %558 : vector<2x128xf32>
    %566 = vector.broadcast %550 : f32 to vector<2x128xf32>
    %567 = arith.mulf %566, %565 : vector<2x128xf32>
    %568 = arith.addf %564, %567 : vector<2x128xf32>
    %569 = math.exp %568 : vector<2x128xf32>
    %cst_158 = arith.constant dense<0.000000e+00> : vector<2xf32>
    %570 = vector.multi_reduction <add>, %569, %cst_158 [1] : vector<2x128xf32> to vector<2xf32>
    %571 = vector.shape_cast %570 : vector<2xf32> to vector<2x1xf32>
    %cst_159 = arith.constant dense<0.000000e+00> : vector<1xf32>
    %572 = vector.multi_reduction <add>, %571, %cst_159 [0] : vector<2x1xf32> to vector<1xf32>
    %573 = vector.shape_cast %572 : vector<1xf32> to vector<1x1xf32>
    %574 = arith.mulf %554, %552 : f32
    %575 = vector.broadcast %552 : f32 to vector<1x1xf32>
    %576 = arith.mulf %575, %573 : vector<1x1xf32>
    %cst_160 = arith.constant 9.99999974E-5 : f32
    %577 = vector.broadcast %cst_160 : f32 to vector<1x1xf32>
    %578 = arith.addf %576, %577 : vector<1x1xf32>
    %579 = vector.broadcast %574 : f32 to vector<1x1xf32>
    %580 = arith.divf %579, %578 : vector<1x1xf32>
    %581 = arith.mulf %580, %573 : vector<1x1xf32>
    %582 = arith.addf %540, %581 : vector<1x1xf32>
    %cst_161 = arith.constant 9.99999974E-5 : f32
    %583 = vector.broadcast %cst_161 : f32 to vector<1x1xf32>
    %584 = arith.addf %582, %583 : vector<1x1xf32>
    %585 = vector.broadcast %469 : f32 to vector<1x1xf32>
    %586 = arith.divf %585, %584 : vector<1x1xf32>
    %587 = arith.mulf %533, %586 : vector<1x1xf32>
    %588 = vector.broadcast %587 : vector<1x1xf32> to vector<2x128xf32>
    %589 = arith.mulf %483, %588 : vector<2x128xf32>
    %590 = arith.mulf %537, %586 : vector<1x1xf32>
    %591 = vector.broadcast %590 : vector<1x1xf32> to vector<2x128xf32>
    %592 = arith.mulf %521, %591 : vector<2x128xf32>
    %593 = arith.addf %589, %592 : vector<2x128xf32>
    %594 = arith.mulf %580, %586 : vector<1x1xf32>
    %595 = vector.broadcast %594 : vector<1x1xf32> to vector<2x128xf32>
    %596 = arith.mulf %569, %595 : vector<2x128xf32>
    %597 = arith.addf %593, %596 : vector<2x128xf32>
    %c3_162 = arith.constant 3 : index
    %c0_163 = arith.constant 0 : index
    %c0_164 = arith.constant 0 : index
    %598 = vector.load %arg7[%c3_162, %c0_163, %c0_164] : memref<8x2x128xf32, #tpu.memory_space<vmem>>, vector<1x2x128xf32>
    %599 = vector.shape_cast %598 : vector<1x2x128xf32> to vector<2x128xf32>
    %600 = vector.shape_cast %597 : vector<2x128xf32> to vector<1x2x128xf32>
    tpu.vector_store %arg7[%c3_162, %c0_163, %c0_164], %600 {strides = array<i32>} : memref<8x2x128xf32, #tpu.memory_space<vmem>>, vector<1x2x128xf32>,
    %c8_i32_165 = arith.constant 8 : i32
    %601 = arith.muli %arg0, %c8_i32_165 : i32
    %c4_i32 = arith.constant 4 : i32
    %602 = arith.addi %601, %c4_i32 : i32
    %c0_166 = arith.constant 0 : index
    %603 = arith.index_cast %602 : i32 to index
    %604 = memref.load %arg1[%c0_166, %603] : memref<15x16xf32, #tpu.memory_space<smem>>
    %c1_167 = arith.constant 1 : index
    %605 = arith.index_cast %602 : i32 to index
    %606 = memref.load %arg1[%c1_167, %605] : memref<15x16xf32, #tpu.memory_space<smem>>
    %c2_168 = arith.constant 2 : index
    %607 = arith.index_cast %602 : i32 to index
    %608 = memref.load %arg1[%c2_168, %607] : memref<15x16xf32, #tpu.memory_space<smem>>
    %c3_169 = arith.constant 3 : index
    %609 = arith.index_cast %602 : i32 to index
    %610 = memref.load %arg1[%c3_169, %609] : memref<15x16xf32, #tpu.memory_space<smem>>
    %c4_170 = arith.constant 4 : index
    %611 = arith.index_cast %602 : i32 to index
    %612 = memref.load %arg1[%c4_170, %611] : memref<15x16xf32, #tpu.memory_space<smem>>
    %c5_171 = arith.constant 5 : index
    %613 = arith.index_cast %602 : i32 to index
    %614 = memref.load %arg1[%c5_171, %613] : memref<15x16xf32, #tpu.memory_space<smem>>
    %c6_172 = arith.constant 6 : index
    %615 = arith.index_cast %602 : i32 to index
    %616 = memref.load %arg1[%c6_172, %615] : memref<15x16xf32, #tpu.memory_space<smem>>
    %c7_173 = arith.constant 7 : index
    %617 = arith.index_cast %602 : i32 to index
    %618 = memref.load %arg1[%c7_173, %617] : memref<15x16xf32, #tpu.memory_space<smem>>
    %619 = vector.broadcast %604 : f32 to vector<2x128xf32>
    %620 = arith.subf %0, %619 : vector<2x128xf32>
    %621 = arith.mulf %620, %620 : vector<2x128xf32>
    %622 = vector.broadcast %606 : f32 to vector<2x128xf32>
    %623 = arith.mulf %621, %622 : vector<2x128xf32>
    %624 = math.exp %623 : vector<2x128xf32>
    %625 = vector.broadcast %610 : f32 to vector<2x128xf32>
    %626 = arith.mulf %625, %1 : vector<2x128xf32>
    %cst_174 = arith.constant 1.000000e+00 : f32
    %627 = vector.broadcast %cst_174 : f32 to vector<2x128xf32>
    %628 = arith.addf %627, %626 : vector<2x128xf32>
    %629 = vector.broadcast %612 : f32 to vector<2x128xf32>
    %630 = arith.mulf %629, %2 : vector<2x128xf32>
    %631 = arith.addf %628, %630 : vector<2x128xf32>
    %632 = arith.mulf %631, %624 : vector<2x128xf32>
    %633 = math.absf %620 : vector<2x128xf32>
    %634 = vector.broadcast %608 : f32 to vector<2x128xf32>
    %635 = arith.mulf %633, %634 : vector<2x128xf32>
    %cst_175 = arith.constant 0.327591091 : f32
    %636 = vector.broadcast %cst_175 : f32 to vector<2x128xf32>
    %637 = arith.mulf %636, %635 : vector<2x128xf32>
    %cst_176 = arith.constant 1.000000e+00 : f32
    %638 = vector.broadcast %cst_176 : f32 to vector<2x128xf32>
    %639 = arith.addf %638, %637 : vector<2x128xf32>
    %640 = tpu.reciprocal %639 {approx = true} : vector<2x128xf32> -> vector<2x128xf32>
    %641 = arith.mulf %639, %640 : vector<2x128xf32>
    %cst_177 = arith.constant 2.000000e+00 : f32
    %642 = vector.broadcast %cst_177 : f32 to vector<2x128xf32>
    %643 = arith.subf %642, %641 : vector<2x128xf32>
    %644 = arith.mulf %640, %643 : vector<2x128xf32>
    %cst_178 = arith.constant 1.06140542 : f32
    %645 = vector.broadcast %cst_178 : f32 to vector<2x128xf32>
    %646 = arith.mulf %645, %644 : vector<2x128xf32>
    %cst_179 = arith.constant 1.45315206 : f32
    %647 = vector.broadcast %cst_179 : f32 to vector<2x128xf32>
    %648 = arith.subf %646, %647 : vector<2x128xf32>
    %649 = arith.mulf %648, %644 : vector<2x128xf32>
    %cst_180 = arith.constant 1.42141378 : f32
    %650 = vector.broadcast %cst_180 : f32 to vector<2x128xf32>
    %651 = arith.addf %649, %650 : vector<2x128xf32>
    %652 = arith.mulf %651, %644 : vector<2x128xf32>
    %cst_181 = arith.constant 0.284496725 : f32
    %653 = vector.broadcast %cst_181 : f32 to vector<2x128xf32>
    %654 = arith.subf %652, %653 : vector<2x128xf32>
    %655 = arith.mulf %654, %644 : vector<2x128xf32>
    %cst_182 = arith.constant 0.254829586 : f32
    %656 = vector.broadcast %cst_182 : f32 to vector<2x128xf32>
    %657 = arith.addf %655, %656 : vector<2x128xf32>
    %658 = arith.mulf %657, %644 : vector<2x128xf32>
    %659 = arith.mulf %658, %624 : vector<2x128xf32>
    %cst_183 = arith.constant 1.000000e+00 : f32
    %660 = vector.broadcast %cst_183 : f32 to vector<2x128xf32>
    %661 = arith.subf %660, %659 : vector<2x128xf32>
    %cst_184 = arith.constant 0.000000e+00 : f32
    %662 = vector.broadcast %cst_184 : f32 to vector<2x128xf32>
    %663 = arith.cmpf ole, %620, %662 : vector<2x128xf32>
    %cst_185 = arith.constant 0.000000e+00 : f32
    %664 = vector.broadcast %cst_185 : f32 to vector<2x128xf32>
    %665 = arith.subf %664, %661 : vector<2x128xf32>
    %666 = arith.select %663, %661, %665 : vector<2x128xi1>, vector<2x128xf32>
    %cst_186 = arith.constant 1.000000e+00 : f32
    %667 = vector.broadcast %cst_186 : f32 to vector<2x128xf32>
    %668 = arith.addf %667, %666 : vector<2x128xf32>
    %cst_187 = arith.constant 5.000000e-01 : f32
    %669 = vector.broadcast %cst_187 : f32 to vector<2x128xf32>
    %670 = arith.mulf %669, %668 : vector<2x128xf32>
    %cst_188 = arith.constant dense<0.000000e+00> : vector<2xf32>
    %671 = vector.multi_reduction <add>, %632, %cst_188 [1] : vector<2x128xf32> to vector<2xf32>
    %672 = vector.shape_cast %671 : vector<2xf32> to vector<2x1xf32>
    %cst_189 = arith.constant dense<0.000000e+00> : vector<1xf32>
    %673 = vector.multi_reduction <add>, %672, %cst_189 [0] : vector<2x1xf32> to vector<1xf32>
    %674 = vector.shape_cast %673 : vector<1xf32> to vector<1x1xf32>
    %cst_190 = arith.constant dense<0.000000e+00> : vector<2xf32>
    %675 = vector.multi_reduction <add>, %670, %cst_190 [1] : vector<2x128xf32> to vector<2xf32>
    %676 = vector.shape_cast %675 : vector<2xf32> to vector<2x1xf32>
    %cst_191 = arith.constant dense<0.000000e+00> : vector<1xf32>
    %677 = vector.multi_reduction <add>, %676, %cst_191 [0] : vector<2x1xf32> to vector<1xf32>
    %678 = vector.shape_cast %677 : vector<1xf32> to vector<1x1xf32>
    %cst_192 = arith.constant 9.99999974E-5 : f32
    %679 = vector.broadcast %cst_192 : f32 to vector<1x1xf32>
    %680 = arith.addf %674, %679 : vector<1x1xf32>
    %681 = vector.broadcast %614 : f32 to vector<1x1xf32>
    %682 = arith.divf %681, %680 : vector<1x1xf32>
    %cst_193 = arith.constant 9.99999974E-5 : f32
    %683 = vector.broadcast %cst_193 : f32 to vector<1x1xf32>
    %684 = arith.addf %678, %683 : vector<1x1xf32>
    %685 = vector.broadcast %616 : f32 to vector<1x1xf32>
    %686 = arith.divf %685, %684 : vector<1x1xf32>
    %687 = arith.mulf %682, %674 : vector<1x1xf32>
    %688 = arith.mulf %686, %678 : vector<1x1xf32>
    %689 = arith.addf %687, %688 : vector<1x1xf32>
    %c8_194 = arith.constant 8 : index
    %690 = arith.index_cast %602 : i32 to index
    %691 = memref.load %arg1[%c8_194, %690] : memref<15x16xf32, #tpu.memory_space<smem>>
    %c9_195 = arith.constant 9 : index
    %692 = arith.index_cast %602 : i32 to index
    %693 = memref.load %arg1[%c9_195, %692] : memref<15x16xf32, #tpu.memory_space<smem>>
    %c10_196 = arith.constant 10 : index
    %694 = arith.index_cast %602 : i32 to index
    %695 = memref.load %arg1[%c10_196, %694] : memref<15x16xf32, #tpu.memory_space<smem>>
    %c11_197 = arith.constant 11 : index
    %696 = arith.index_cast %602 : i32 to index
    %697 = memref.load %arg1[%c11_197, %696] : memref<15x16xf32, #tpu.memory_space<smem>>
    %c12_198 = arith.constant 12 : index
    %698 = arith.index_cast %602 : i32 to index
    %699 = memref.load %arg1[%c12_198, %698] : memref<15x16xf32, #tpu.memory_space<smem>>
    %c13_199 = arith.constant 13 : index
    %700 = arith.index_cast %602 : i32 to index
    %701 = memref.load %arg1[%c13_199, %700] : memref<15x16xf32, #tpu.memory_space<smem>>
    %c14_200 = arith.constant 14 : index
    %702 = arith.index_cast %602 : i32 to index
    %703 = memref.load %arg1[%c14_200, %702] : memref<15x16xf32, #tpu.memory_space<smem>>
    %704 = vector.broadcast %691 : f32 to vector<2x128xf32>
    %705 = arith.subf %3, %704 : vector<2x128xf32>
    %706 = vector.broadcast %693 : f32 to vector<2x128xf32>
    %707 = arith.subf %4, %706 : vector<2x128xf32>
    %708 = vector.broadcast %697 : f32 to vector<2x128xf32>
    %709 = arith.mulf %708, %707 : vector<2x128xf32>
    %710 = arith.addf %705, %709 : vector<2x128xf32>
    %711 = arith.mulf %710, %710 : vector<2x128xf32>
    %712 = vector.broadcast %695 : f32 to vector<2x128xf32>
    %713 = arith.mulf %712, %711 : vector<2x128xf32>
    %714 = arith.mulf %707, %707 : vector<2x128xf32>
    %715 = vector.broadcast %699 : f32 to vector<2x128xf32>
    %716 = arith.mulf %715, %714 : vector<2x128xf32>
    %717 = arith.addf %713, %716 : vector<2x128xf32>
    %718 = math.exp %717 : vector<2x128xf32>
    %cst_201 = arith.constant dense<0.000000e+00> : vector<2xf32>
    %719 = vector.multi_reduction <add>, %718, %cst_201 [1] : vector<2x128xf32> to vector<2xf32>
    %720 = vector.shape_cast %719 : vector<2xf32> to vector<2x1xf32>
    %cst_202 = arith.constant dense<0.000000e+00> : vector<1xf32>
    %721 = vector.multi_reduction <add>, %720, %cst_202 [0] : vector<2x1xf32> to vector<1xf32>
    %722 = vector.shape_cast %721 : vector<1xf32> to vector<1x1xf32>
    %723 = arith.mulf %703, %701 : f32
    %724 = vector.broadcast %701 : f32 to vector<1x1xf32>
    %725 = arith.mulf %724, %722 : vector<1x1xf32>
    %cst_203 = arith.constant 9.99999974E-5 : f32
    %726 = vector.broadcast %cst_203 : f32 to vector<1x1xf32>
    %727 = arith.addf %725, %726 : vector<1x1xf32>
    %728 = vector.broadcast %723 : f32 to vector<1x1xf32>
    %729 = arith.divf %728, %727 : vector<1x1xf32>
    %730 = arith.mulf %729, %722 : vector<1x1xf32>
    %731 = arith.addf %689, %730 : vector<1x1xf32>
    %cst_204 = arith.constant 9.99999974E-5 : f32
    %732 = vector.broadcast %cst_204 : f32 to vector<1x1xf32>
    %733 = arith.addf %731, %732 : vector<1x1xf32>
    %734 = vector.broadcast %618 : f32 to vector<1x1xf32>
    %735 = arith.divf %734, %733 : vector<1x1xf32>
    %736 = arith.mulf %682, %735 : vector<1x1xf32>
    %737 = vector.broadcast %736 : vector<1x1xf32> to vector<2x128xf32>
    %738 = arith.mulf %632, %737 : vector<2x128xf32>
    %739 = arith.mulf %686, %735 : vector<1x1xf32>
    %740 = vector.broadcast %739 : vector<1x1xf32> to vector<2x128xf32>
    %741 = arith.mulf %670, %740 : vector<2x128xf32>
    %742 = arith.addf %738, %741 : vector<2x128xf32>
    %743 = arith.mulf %729, %735 : vector<1x1xf32>
    %744 = vector.broadcast %743 : vector<1x1xf32> to vector<2x128xf32>
    %745 = arith.mulf %718, %744 : vector<2x128xf32>
    %746 = arith.addf %742, %745 : vector<2x128xf32>
    %c4_205 = arith.constant 4 : index
    %c0_206 = arith.constant 0 : index
    %c0_207 = arith.constant 0 : index
    %747 = vector.load %arg7[%c4_205, %c0_206, %c0_207] : memref<8x2x128xf32, #tpu.memory_space<vmem>>, vector<1x2x128xf32>
    %748 = vector.shape_cast %747 : vector<1x2x128xf32> to vector<2x128xf32>
    %749 = vector.shape_cast %746 : vector<2x128xf32> to vector<1x2x128xf32>
    tpu.vector_store %arg7[%c4_205, %c0_206, %c0_207], %749 {strides = array<i32>} : memref<8x2x128xf32, #tpu.memory_space<vmem>>, vector<1x2x128xf32>,
    %c8_i32_208 = arith.constant 8 : i32
    %750 = arith.muli %arg0, %c8_i32_208 : i32
    %c5_i32 = arith.constant 5 : i32
    %751 = arith.addi %750, %c5_i32 : i32
    %c0_209 = arith.constant 0 : index
    %752 = arith.index_cast %751 : i32 to index
    %753 = memref.load %arg1[%c0_209, %752] : memref<15x16xf32, #tpu.memory_space<smem>>
    %c1_210 = arith.constant 1 : index
    %754 = arith.index_cast %751 : i32 to index
    %755 = memref.load %arg1[%c1_210, %754] : memref<15x16xf32, #tpu.memory_space<smem>>
    %c2_211 = arith.constant 2 : index
    %756 = arith.index_cast %751 : i32 to index
    %757 = memref.load %arg1[%c2_211, %756] : memref<15x16xf32, #tpu.memory_space<smem>>
    %c3_212 = arith.constant 3 : index
    %758 = arith.index_cast %751 : i32 to index
    %759 = memref.load %arg1[%c3_212, %758] : memref<15x16xf32, #tpu.memory_space<smem>>
    %c4_213 = arith.constant 4 : index
    %760 = arith.index_cast %751 : i32 to index
    %761 = memref.load %arg1[%c4_213, %760] : memref<15x16xf32, #tpu.memory_space<smem>>
    %c5_214 = arith.constant 5 : index
    %762 = arith.index_cast %751 : i32 to index
    %763 = memref.load %arg1[%c5_214, %762] : memref<15x16xf32, #tpu.memory_space<smem>>
    %c6_215 = arith.constant 6 : index
    %764 = arith.index_cast %751 : i32 to index
    %765 = memref.load %arg1[%c6_215, %764] : memref<15x16xf32, #tpu.memory_space<smem>>
    %c7_216 = arith.constant 7 : index
    %766 = arith.index_cast %751 : i32 to index
    %767 = memref.load %arg1[%c7_216, %766] : memref<15x16xf32, #tpu.memory_space<smem>>
    %768 = vector.broadcast %753 : f32 to vector<2x128xf32>
    %769 = arith.subf %0, %768 : vector<2x128xf32>
    %770 = arith.mulf %769, %769 : vector<2x128xf32>
    %771 = vector.broadcast %755 : f32 to vector<2x128xf32>
    %772 = arith.mulf %770, %771 : vector<2x128xf32>
    %773 = math.exp %772 : vector<2x128xf32>
    %774 = vector.broadcast %759 : f32 to vector<2x128xf32>
    %775 = arith.mulf %774, %1 : vector<2x128xf32>
    %cst_217 = arith.constant 1.000000e+00 : f32
    %776 = vector.broadcast %cst_217 : f32 to vector<2x128xf32>
    %777 = arith.addf %776, %775 : vector<2x128xf32>
    %778 = vector.broadcast %761 : f32 to vector<2x128xf32>
    %779 = arith.mulf %778, %2 : vector<2x128xf32>
    %780 = arith.addf %777, %779 : vector<2x128xf32>
    %781 = arith.mulf %780, %773 : vector<2x128xf32>
    %782 = math.absf %769 : vector<2x128xf32>
    %783 = vector.broadcast %757 : f32 to vector<2x128xf32>
    %784 = arith.mulf %782, %783 : vector<2x128xf32>
    %cst_218 = arith.constant 0.327591091 : f32
    %785 = vector.broadcast %cst_218 : f32 to vector<2x128xf32>
    %786 = arith.mulf %785, %784 : vector<2x128xf32>
    %cst_219 = arith.constant 1.000000e+00 : f32
    %787 = vector.broadcast %cst_219 : f32 to vector<2x128xf32>
    %788 = arith.addf %787, %786 : vector<2x128xf32>
    %789 = tpu.reciprocal %788 {approx = true} : vector<2x128xf32> -> vector<2x128xf32>
    %790 = arith.mulf %788, %789 : vector<2x128xf32>
    %cst_220 = arith.constant 2.000000e+00 : f32
    %791 = vector.broadcast %cst_220 : f32 to vector<2x128xf32>
    %792 = arith.subf %791, %790 : vector<2x128xf32>
    %793 = arith.mulf %789, %792 : vector<2x128xf32>
    %cst_221 = arith.constant 1.06140542 : f32
    %794 = vector.broadcast %cst_221 : f32 to vector<2x128xf32>
    %795 = arith.mulf %794, %793 : vector<2x128xf32>
    %cst_222 = arith.constant 1.45315206 : f32
    %796 = vector.broadcast %cst_222 : f32 to vector<2x128xf32>
    %797 = arith.subf %795, %796 : vector<2x128xf32>
    %798 = arith.mulf %797, %793 : vector<2x128xf32>
    %cst_223 = arith.constant 1.42141378 : f32
    %799 = vector.broadcast %cst_223 : f32 to vector<2x128xf32>
    %800 = arith.addf %798, %799 : vector<2x128xf32>
    %801 = arith.mulf %800, %793 : vector<2x128xf32>
    %cst_224 = arith.constant 0.284496725 : f32
    %802 = vector.broadcast %cst_224 : f32 to vector<2x128xf32>
    %803 = arith.subf %801, %802 : vector<2x128xf32>
    %804 = arith.mulf %803, %793 : vector<2x128xf32>
    %cst_225 = arith.constant 0.254829586 : f32
    %805 = vector.broadcast %cst_225 : f32 to vector<2x128xf32>
    %806 = arith.addf %804, %805 : vector<2x128xf32>
    %807 = arith.mulf %806, %793 : vector<2x128xf32>
    %808 = arith.mulf %807, %773 : vector<2x128xf32>
    %cst_226 = arith.constant 1.000000e+00 : f32
    %809 = vector.broadcast %cst_226 : f32 to vector<2x128xf32>
    %810 = arith.subf %809, %808 : vector<2x128xf32>
    %cst_227 = arith.constant 0.000000e+00 : f32
    %811 = vector.broadcast %cst_227 : f32 to vector<2x128xf32>
    %812 = arith.cmpf ole, %769, %811 : vector<2x128xf32>
    %cst_228 = arith.constant 0.000000e+00 : f32
    %813 = vector.broadcast %cst_228 : f32 to vector<2x128xf32>
    %814 = arith.subf %813, %810 : vector<2x128xf32>
    %815 = arith.select %812, %810, %814 : vector<2x128xi1>, vector<2x128xf32>
    %cst_229 = arith.constant 1.000000e+00 : f32
    %816 = vector.broadcast %cst_229 : f32 to vector<2x128xf32>
    %817 = arith.addf %816, %815 : vector<2x128xf32>
    %cst_230 = arith.constant 5.000000e-01 : f32
    %818 = vector.broadcast %cst_230 : f32 to vector<2x128xf32>
    %819 = arith.mulf %818, %817 : vector<2x128xf32>
    %cst_231 = arith.constant dense<0.000000e+00> : vector<2xf32>
    %820 = vector.multi_reduction <add>, %781, %cst_231 [1] : vector<2x128xf32> to vector<2xf32>
    %821 = vector.shape_cast %820 : vector<2xf32> to vector<2x1xf32>
    %cst_232 = arith.constant dense<0.000000e+00> : vector<1xf32>
    %822 = vector.multi_reduction <add>, %821, %cst_232 [0] : vector<2x1xf32> to vector<1xf32>
    %823 = vector.shape_cast %822 : vector<1xf32> to vector<1x1xf32>
    %cst_233 = arith.constant dense<0.000000e+00> : vector<2xf32>
    %824 = vector.multi_reduction <add>, %819, %cst_233 [1] : vector<2x128xf32> to vector<2xf32>
    %825 = vector.shape_cast %824 : vector<2xf32> to vector<2x1xf32>
    %cst_234 = arith.constant dense<0.000000e+00> : vector<1xf32>
    %826 = vector.multi_reduction <add>, %825, %cst_234 [0] : vector<2x1xf32> to vector<1xf32>
    %827 = vector.shape_cast %826 : vector<1xf32> to vector<1x1xf32>
    %cst_235 = arith.constant 9.99999974E-5 : f32
    %828 = vector.broadcast %cst_235 : f32 to vector<1x1xf32>
    %829 = arith.addf %823, %828 : vector<1x1xf32>
    %830 = vector.broadcast %763 : f32 to vector<1x1xf32>
    %831 = arith.divf %830, %829 : vector<1x1xf32>
    %cst_236 = arith.constant 9.99999974E-5 : f32
    %832 = vector.broadcast %cst_236 : f32 to vector<1x1xf32>
    %833 = arith.addf %827, %832 : vector<1x1xf32>
    %834 = vector.broadcast %765 : f32 to vector<1x1xf32>
    %835 = arith.divf %834, %833 : vector<1x1xf32>
    %836 = arith.mulf %831, %823 : vector<1x1xf32>
    %837 = arith.mulf %835, %827 : vector<1x1xf32>
    %838 = arith.addf %836, %837 : vector<1x1xf32>
    %c8_237 = arith.constant 8 : index
    %839 = arith.index_cast %751 : i32 to index
    %840 = memref.load %arg1[%c8_237, %839] : memref<15x16xf32, #tpu.memory_space<smem>>
    %c9_238 = arith.constant 9 : index
    %841 = arith.index_cast %751 : i32 to index
    %842 = memref.load %arg1[%c9_238, %841] : memref<15x16xf32, #tpu.memory_space<smem>>
    %c10_239 = arith.constant 10 : index
    %843 = arith.index_cast %751 : i32 to index
    %844 = memref.load %arg1[%c10_239, %843] : memref<15x16xf32, #tpu.memory_space<smem>>
    %c11_240 = arith.constant 11 : index
    %845 = arith.index_cast %751 : i32 to index
    %846 = memref.load %arg1[%c11_240, %845] : memref<15x16xf32, #tpu.memory_space<smem>>
    %c12_241 = arith.constant 12 : index
    %847 = arith.index_cast %751 : i32 to index
    %848 = memref.load %arg1[%c12_241, %847] : memref<15x16xf32, #tpu.memory_space<smem>>
    %c13_242 = arith.constant 13 : index
    %849 = arith.index_cast %751 : i32 to index
    %850 = memref.load %arg1[%c13_242, %849] : memref<15x16xf32, #tpu.memory_space<smem>>
    %c14_243 = arith.constant 14 : index
    %851 = arith.index_cast %751 : i32 to index
    %852 = memref.load %arg1[%c14_243, %851] : memref<15x16xf32, #tpu.memory_space<smem>>
    %853 = vector.broadcast %840 : f32 to vector<2x128xf32>
    %854 = arith.subf %3, %853 : vector<2x128xf32>
    %855 = vector.broadcast %842 : f32 to vector<2x128xf32>
    %856 = arith.subf %4, %855 : vector<2x128xf32>
    %857 = vector.broadcast %846 : f32 to vector<2x128xf32>
    %858 = arith.mulf %857, %856 : vector<2x128xf32>
    %859 = arith.addf %854, %858 : vector<2x128xf32>
    %860 = arith.mulf %859, %859 : vector<2x128xf32>
    %861 = vector.broadcast %844 : f32 to vector<2x128xf32>
    %862 = arith.mulf %861, %860 : vector<2x128xf32>
    %863 = arith.mulf %856, %856 : vector<2x128xf32>
    %864 = vector.broadcast %848 : f32 to vector<2x128xf32>
    %865 = arith.mulf %864, %863 : vector<2x128xf32>
    %866 = arith.addf %862, %865 : vector<2x128xf32>
    %867 = math.exp %866 : vector<2x128xf32>
    %cst_244 = arith.constant dense<0.000000e+00> : vector<2xf32>
    %868 = vector.multi_reduction <add>, %867, %cst_244 [1] : vector<2x128xf32> to vector<2xf32>
    %869 = vector.shape_cast %868 : vector<2xf32> to vector<2x1xf32>
    %cst_245 = arith.constant dense<0.000000e+00> : vector<1xf32>
    %870 = vector.multi_reduction <add>, %869, %cst_245 [0] : vector<2x1xf32> to vector<1xf32>
    %871 = vector.shape_cast %870 : vector<1xf32> to vector<1x1xf32>
    %872 = arith.mulf %852, %850 : f32
    %873 = vector.broadcast %850 : f32 to vector<1x1xf32>
    %874 = arith.mulf %873, %871 : vector<1x1xf32>
    %cst_246 = arith.constant 9.99999974E-5 : f32
    %875 = vector.broadcast %cst_246 : f32 to vector<1x1xf32>
    %876 = arith.addf %874, %875 : vector<1x1xf32>
    %877 = vector.broadcast %872 : f32 to vector<1x1xf32>
    %878 = arith.divf %877, %876 : vector<1x1xf32>
    %879 = arith.mulf %878, %871 : vector<1x1xf32>
    %880 = arith.addf %838, %879 : vector<1x1xf32>
    %cst_247 = arith.constant 9.99999974E-5 : f32
    %881 = vector.broadcast %cst_247 : f32 to vector<1x1xf32>
    %882 = arith.addf %880, %881 : vector<1x1xf32>
    %883 = vector.broadcast %767 : f32 to vector<1x1xf32>
    %884 = arith.divf %883, %882 : vector<1x1xf32>
    %885 = arith.mulf %831, %884 : vector<1x1xf32>
    %886 = vector.broadcast %885 : vector<1x1xf32> to vector<2x128xf32>
    %887 = arith.mulf %781, %886 : vector<2x128xf32>
    %888 = arith.mulf %835, %884 : vector<1x1xf32>
    %889 = vector.broadcast %888 : vector<1x1xf32> to vector<2x128xf32>
    %890 = arith.mulf %819, %889 : vector<2x128xf32>
    %891 = arith.addf %887, %890 : vector<2x128xf32>
    %892 = arith.mulf %878, %884 : vector<1x1xf32>
    %893 = vector.broadcast %892 : vector<1x1xf32> to vector<2x128xf32>
    %894 = arith.mulf %867, %893 : vector<2x128xf32>
    %895 = arith.addf %891, %894 : vector<2x128xf32>
    %c5_248 = arith.constant 5 : index
    %c0_249 = arith.constant 0 : index
    %c0_250 = arith.constant 0 : index
    %896 = vector.load %arg7[%c5_248, %c0_249, %c0_250] : memref<8x2x128xf32, #tpu.memory_space<vmem>>, vector<1x2x128xf32>
    %897 = vector.shape_cast %896 : vector<1x2x128xf32> to vector<2x128xf32>
    %898 = vector.shape_cast %895 : vector<2x128xf32> to vector<1x2x128xf32>
    tpu.vector_store %arg7[%c5_248, %c0_249, %c0_250], %898 {strides = array<i32>} : memref<8x2x128xf32, #tpu.memory_space<vmem>>, vector<1x2x128xf32>,
    %c8_i32_251 = arith.constant 8 : i32
    %899 = arith.muli %arg0, %c8_i32_251 : i32
    %c6_i32 = arith.constant 6 : i32
    %900 = arith.addi %899, %c6_i32 : i32
    %c0_252 = arith.constant 0 : index
    %901 = arith.index_cast %900 : i32 to index
    %902 = memref.load %arg1[%c0_252, %901] : memref<15x16xf32, #tpu.memory_space<smem>>
    %c1_253 = arith.constant 1 : index
    %903 = arith.index_cast %900 : i32 to index
    %904 = memref.load %arg1[%c1_253, %903] : memref<15x16xf32, #tpu.memory_space<smem>>
    %c2_254 = arith.constant 2 : index
    %905 = arith.index_cast %900 : i32 to index
    %906 = memref.load %arg1[%c2_254, %905] : memref<15x16xf32, #tpu.memory_space<smem>>
    %c3_255 = arith.constant 3 : index
    %907 = arith.index_cast %900 : i32 to index
    %908 = memref.load %arg1[%c3_255, %907] : memref<15x16xf32, #tpu.memory_space<smem>>
    %c4_256 = arith.constant 4 : index
    %909 = arith.index_cast %900 : i32 to index
    %910 = memref.load %arg1[%c4_256, %909] : memref<15x16xf32, #tpu.memory_space<smem>>
    %c5_257 = arith.constant 5 : index
    %911 = arith.index_cast %900 : i32 to index
    %912 = memref.load %arg1[%c5_257, %911] : memref<15x16xf32, #tpu.memory_space<smem>>
    %c6_258 = arith.constant 6 : index
    %913 = arith.index_cast %900 : i32 to index
    %914 = memref.load %arg1[%c6_258, %913] : memref<15x16xf32, #tpu.memory_space<smem>>
    %c7_259 = arith.constant 7 : index
    %915 = arith.index_cast %900 : i32 to index
    %916 = memref.load %arg1[%c7_259, %915] : memref<15x16xf32, #tpu.memory_space<smem>>
    %917 = vector.broadcast %902 : f32 to vector<2x128xf32>
    %918 = arith.subf %0, %917 : vector<2x128xf32>
    %919 = arith.mulf %918, %918 : vector<2x128xf32>
    %920 = vector.broadcast %904 : f32 to vector<2x128xf32>
    %921 = arith.mulf %919, %920 : vector<2x128xf32>
    %922 = math.exp %921 : vector<2x128xf32>
    %923 = vector.broadcast %908 : f32 to vector<2x128xf32>
    %924 = arith.mulf %923, %1 : vector<2x128xf32>
    %cst_260 = arith.constant 1.000000e+00 : f32
    %925 = vector.broadcast %cst_260 : f32 to vector<2x128xf32>
    %926 = arith.addf %925, %924 : vector<2x128xf32>
    %927 = vector.broadcast %910 : f32 to vector<2x128xf32>
    %928 = arith.mulf %927, %2 : vector<2x128xf32>
    %929 = arith.addf %926, %928 : vector<2x128xf32>
    %930 = arith.mulf %929, %922 : vector<2x128xf32>
    %931 = math.absf %918 : vector<2x128xf32>
    %932 = vector.broadcast %906 : f32 to vector<2x128xf32>
    %933 = arith.mulf %931, %932 : vector<2x128xf32>
    %cst_261 = arith.constant 0.327591091 : f32
    %934 = vector.broadcast %cst_261 : f32 to vector<2x128xf32>
    %935 = arith.mulf %934, %933 : vector<2x128xf32>
    %cst_262 = arith.constant 1.000000e+00 : f32
    %936 = vector.broadcast %cst_262 : f32 to vector<2x128xf32>
    %937 = arith.addf %936, %935 : vector<2x128xf32>
    %938 = tpu.reciprocal %937 {approx = true} : vector<2x128xf32> -> vector<2x128xf32>
    %939 = arith.mulf %937, %938 : vector<2x128xf32>
    %cst_263 = arith.constant 2.000000e+00 : f32
    %940 = vector.broadcast %cst_263 : f32 to vector<2x128xf32>
    %941 = arith.subf %940, %939 : vector<2x128xf32>
    %942 = arith.mulf %938, %941 : vector<2x128xf32>
    %cst_264 = arith.constant 1.06140542 : f32
    %943 = vector.broadcast %cst_264 : f32 to vector<2x128xf32>
    %944 = arith.mulf %943, %942 : vector<2x128xf32>
    %cst_265 = arith.constant 1.45315206 : f32
    %945 = vector.broadcast %cst_265 : f32 to vector<2x128xf32>
    %946 = arith.subf %944, %945 : vector<2x128xf32>
    %947 = arith.mulf %946, %942 : vector<2x128xf32>
    %cst_266 = arith.constant 1.42141378 : f32
    %948 = vector.broadcast %cst_266 : f32 to vector<2x128xf32>
    %949 = arith.addf %947, %948 : vector<2x128xf32>
    %950 = arith.mulf %949, %942 : vector<2x128xf32>
    %cst_267 = arith.constant 0.284496725 : f32
    %951 = vector.broadcast %cst_267 : f32 to vector<2x128xf32>
    %952 = arith.subf %950, %951 : vector<2x128xf32>
    %953 = arith.mulf %952, %942 : vector<2x128xf32>
    %cst_268 = arith.constant 0.254829586 : f32
    %954 = vector.broadcast %cst_268 : f32 to vector<2x128xf32>
    %955 = arith.addf %953, %954 : vector<2x128xf32>
    %956 = arith.mulf %955, %942 : vector<2x128xf32>
    %957 = arith.mulf %956, %922 : vector<2x128xf32>
    %cst_269 = arith.constant 1.000000e+00 : f32
    %958 = vector.broadcast %cst_269 : f32 to vector<2x128xf32>
    %959 = arith.subf %958, %957 : vector<2x128xf32>
    %cst_270 = arith.constant 0.000000e+00 : f32
    %960 = vector.broadcast %cst_270 : f32 to vector<2x128xf32>
    %961 = arith.cmpf ole, %918, %960 : vector<2x128xf32>
    %cst_271 = arith.constant 0.000000e+00 : f32
    %962 = vector.broadcast %cst_271 : f32 to vector<2x128xf32>
    %963 = arith.subf %962, %959 : vector<2x128xf32>
    %964 = arith.select %961, %959, %963 : vector<2x128xi1>, vector<2x128xf32>
    %cst_272 = arith.constant 1.000000e+00 : f32
    %965 = vector.broadcast %cst_272 : f32 to vector<2x128xf32>
    %966 = arith.addf %965, %964 : vector<2x128xf32>
    %cst_273 = arith.constant 5.000000e-01 : f32
    %967 = vector.broadcast %cst_273 : f32 to vector<2x128xf32>
    %968 = arith.mulf %967, %966 : vector<2x128xf32>
    %cst_274 = arith.constant dense<0.000000e+00> : vector<2xf32>
    %969 = vector.multi_reduction <add>, %930, %cst_274 [1] : vector<2x128xf32> to vector<2xf32>
    %970 = vector.shape_cast %969 : vector<2xf32> to vector<2x1xf32>
    %cst_275 = arith.constant dense<0.000000e+00> : vector<1xf32>
    %971 = vector.multi_reduction <add>, %970, %cst_275 [0] : vector<2x1xf32> to vector<1xf32>
    %972 = vector.shape_cast %971 : vector<1xf32> to vector<1x1xf32>
    %cst_276 = arith.constant dense<0.000000e+00> : vector<2xf32>
    %973 = vector.multi_reduction <add>, %968, %cst_276 [1] : vector<2x128xf32> to vector<2xf32>
    %974 = vector.shape_cast %973 : vector<2xf32> to vector<2x1xf32>
    %cst_277 = arith.constant dense<0.000000e+00> : vector<1xf32>
    %975 = vector.multi_reduction <add>, %974, %cst_277 [0] : vector<2x1xf32> to vector<1xf32>
    %976 = vector.shape_cast %975 : vector<1xf32> to vector<1x1xf32>
    %cst_278 = arith.constant 9.99999974E-5 : f32
    %977 = vector.broadcast %cst_278 : f32 to vector<1x1xf32>
    %978 = arith.addf %972, %977 : vector<1x1xf32>
    %979 = vector.broadcast %912 : f32 to vector<1x1xf32>
    %980 = arith.divf %979, %978 : vector<1x1xf32>
    %cst_279 = arith.constant 9.99999974E-5 : f32
    %981 = vector.broadcast %cst_279 : f32 to vector<1x1xf32>
    %982 = arith.addf %976, %981 : vector<1x1xf32>
    %983 = vector.broadcast %914 : f32 to vector<1x1xf32>
    %984 = arith.divf %983, %982 : vector<1x1xf32>
    %985 = arith.mulf %980, %972 : vector<1x1xf32>
    %986 = arith.mulf %984, %976 : vector<1x1xf32>
    %987 = arith.addf %985, %986 : vector<1x1xf32>
    %c8_280 = arith.constant 8 : index
    %988 = arith.index_cast %900 : i32 to index
    %989 = memref.load %arg1[%c8_280, %988] : memref<15x16xf32, #tpu.memory_space<smem>>
    %c9_281 = arith.constant 9 : index
    %990 = arith.index_cast %900 : i32 to index
    %991 = memref.load %arg1[%c9_281, %990] : memref<15x16xf32, #tpu.memory_space<smem>>
    %c10_282 = arith.constant 10 : index
    %992 = arith.index_cast %900 : i32 to index
    %993 = memref.load %arg1[%c10_282, %992] : memref<15x16xf32, #tpu.memory_space<smem>>
    %c11_283 = arith.constant 11 : index
    %994 = arith.index_cast %900 : i32 to index
    %995 = memref.load %arg1[%c11_283, %994] : memref<15x16xf32, #tpu.memory_space<smem>>
    %c12_284 = arith.constant 12 : index
    %996 = arith.index_cast %900 : i32 to index
    %997 = memref.load %arg1[%c12_284, %996] : memref<15x16xf32, #tpu.memory_space<smem>>
    %c13_285 = arith.constant 13 : index
    %998 = arith.index_cast %900 : i32 to index
    %999 = memref.load %arg1[%c13_285, %998] : memref<15x16xf32, #tpu.memory_space<smem>>
    %c14_286 = arith.constant 14 : index
    %1000 = arith.index_cast %900 : i32 to index
    %1001 = memref.load %arg1[%c14_286, %1000] : memref<15x16xf32, #tpu.memory_space<smem>>
    %1002 = vector.broadcast %989 : f32 to vector<2x128xf32>
    %1003 = arith.subf %3, %1002 : vector<2x128xf32>
    %1004 = vector.broadcast %991 : f32 to vector<2x128xf32>
    %1005 = arith.subf %4, %1004 : vector<2x128xf32>
    %1006 = vector.broadcast %995 : f32 to vector<2x128xf32>
    %1007 = arith.mulf %1006, %1005 : vector<2x128xf32>
    %1008 = arith.addf %1003, %1007 : vector<2x128xf32>
    %1009 = arith.mulf %1008, %1008 : vector<2x128xf32>
    %1010 = vector.broadcast %993 : f32 to vector<2x128xf32>
    %1011 = arith.mulf %1010, %1009 : vector<2x128xf32>
    %1012 = arith.mulf %1005, %1005 : vector<2x128xf32>
    %1013 = vector.broadcast %997 : f32 to vector<2x128xf32>
    %1014 = arith.mulf %1013, %1012 : vector<2x128xf32>
    %1015 = arith.addf %1011, %1014 : vector<2x128xf32>
    %1016 = math.exp %1015 : vector<2x128xf32>
    %cst_287 = arith.constant dense<0.000000e+00> : vector<2xf32>
    %1017 = vector.multi_reduction <add>, %1016, %cst_287 [1] : vector<2x128xf32> to vector<2xf32>
    %1018 = vector.shape_cast %1017 : vector<2xf32> to vector<2x1xf32>
    %cst_288 = arith.constant dense<0.000000e+00> : vector<1xf32>
    %1019 = vector.multi_reduction <add>, %1018, %cst_288 [0] : vector<2x1xf32> to vector<1xf32>
    %1020 = vector.shape_cast %1019 : vector<1xf32> to vector<1x1xf32>
    %1021 = arith.mulf %1001, %999 : f32
    %1022 = vector.broadcast %999 : f32 to vector<1x1xf32>
    %1023 = arith.mulf %1022, %1020 : vector<1x1xf32>
    %cst_289 = arith.constant 9.99999974E-5 : f32
    %1024 = vector.broadcast %cst_289 : f32 to vector<1x1xf32>
    %1025 = arith.addf %1023, %1024 : vector<1x1xf32>
    %1026 = vector.broadcast %1021 : f32 to vector<1x1xf32>
    %1027 = arith.divf %1026, %1025 : vector<1x1xf32>
    %1028 = arith.mulf %1027, %1020 : vector<1x1xf32>
    %1029 = arith.addf %987, %1028 : vector<1x1xf32>
    %cst_290 = arith.constant 9.99999974E-5 : f32
    %1030 = vector.broadcast %cst_290 : f32 to vector<1x1xf32>
    %1031 = arith.addf %1029, %1030 : vector<1x1xf32>
    %1032 = vector.broadcast %916 : f32 to vector<1x1xf32>
    %1033 = arith.divf %1032, %1031 : vector<1x1xf32>
    %1034 = arith.mulf %980, %1033 : vector<1x1xf32>
    %1035 = vector.broadcast %1034 : vector<1x1xf32> to vector<2x128xf32>
    %1036 = arith.mulf %930, %1035 : vector<2x128xf32>
    %1037 = arith.mulf %984, %1033 : vector<1x1xf32>
    %1038 = vector.broadcast %1037 : vector<1x1xf32> to vector<2x128xf32>
    %1039 = arith.mulf %968, %1038 : vector<2x128xf32>
    %1040 = arith.addf %1036, %1039 : vector<2x128xf32>
    %1041 = arith.mulf %1027, %1033 : vector<1x1xf32>
    %1042 = vector.broadcast %1041 : vector<1x1xf32> to vector<2x128xf32>
    %1043 = arith.mulf %1016, %1042 : vector<2x128xf32>
    %1044 = arith.addf %1040, %1043 : vector<2x128xf32>
    %c6_291 = arith.constant 6 : index
    %c0_292 = arith.constant 0 : index
    %c0_293 = arith.constant 0 : index
    %1045 = vector.load %arg7[%c6_291, %c0_292, %c0_293] : memref<8x2x128xf32, #tpu.memory_space<vmem>>, vector<1x2x128xf32>
    %1046 = vector.shape_cast %1045 : vector<1x2x128xf32> to vector<2x128xf32>
    %1047 = vector.shape_cast %1044 : vector<2x128xf32> to vector<1x2x128xf32>
    tpu.vector_store %arg7[%c6_291, %c0_292, %c0_293], %1047 {strides = array<i32>} : memref<8x2x128xf32, #tpu.memory_space<vmem>>, vector<1x2x128xf32>,
    %c8_i32_294 = arith.constant 8 : i32
    %1048 = arith.muli %arg0, %c8_i32_294 : i32
    %c7_i32 = arith.constant 7 : i32
    %1049 = arith.addi %1048, %c7_i32 : i32
    %c0_295 = arith.constant 0 : index
    %1050 = arith.index_cast %1049 : i32 to index
    %1051 = memref.load %arg1[%c0_295, %1050] : memref<15x16xf32, #tpu.memory_space<smem>>
    %c1_296 = arith.constant 1 : index
    %1052 = arith.index_cast %1049 : i32 to index
    %1053 = memref.load %arg1[%c1_296, %1052] : memref<15x16xf32, #tpu.memory_space<smem>>
    %c2_297 = arith.constant 2 : index
    %1054 = arith.index_cast %1049 : i32 to index
    %1055 = memref.load %arg1[%c2_297, %1054] : memref<15x16xf32, #tpu.memory_space<smem>>
    %c3_298 = arith.constant 3 : index
    %1056 = arith.index_cast %1049 : i32 to index
    %1057 = memref.load %arg1[%c3_298, %1056] : memref<15x16xf32, #tpu.memory_space<smem>>
    %c4_299 = arith.constant 4 : index
    %1058 = arith.index_cast %1049 : i32 to index
    %1059 = memref.load %arg1[%c4_299, %1058] : memref<15x16xf32, #tpu.memory_space<smem>>
    %c5_300 = arith.constant 5 : index
    %1060 = arith.index_cast %1049 : i32 to index
    %1061 = memref.load %arg1[%c5_300, %1060] : memref<15x16xf32, #tpu.memory_space<smem>>
    %c6_301 = arith.constant 6 : index
    %1062 = arith.index_cast %1049 : i32 to index
    %1063 = memref.load %arg1[%c6_301, %1062] : memref<15x16xf32, #tpu.memory_space<smem>>
    %c7_302 = arith.constant 7 : index
    %1064 = arith.index_cast %1049 : i32 to index
    %1065 = memref.load %arg1[%c7_302, %1064] : memref<15x16xf32, #tpu.memory_space<smem>>
    %1066 = vector.broadcast %1051 : f32 to vector<2x128xf32>
    %1067 = arith.subf %0, %1066 : vector<2x128xf32>
    %1068 = arith.mulf %1067, %1067 : vector<2x128xf32>
    %1069 = vector.broadcast %1053 : f32 to vector<2x128xf32>
    %1070 = arith.mulf %1068, %1069 : vector<2x128xf32>
    %1071 = math.exp %1070 : vector<2x128xf32>
    %1072 = vector.broadcast %1057 : f32 to vector<2x128xf32>
    %1073 = arith.mulf %1072, %1 : vector<2x128xf32>
    %cst_303 = arith.constant 1.000000e+00 : f32
    %1074 = vector.broadcast %cst_303 : f32 to vector<2x128xf32>
    %1075 = arith.addf %1074, %1073 : vector<2x128xf32>
    %1076 = vector.broadcast %1059 : f32 to vector<2x128xf32>
    %1077 = arith.mulf %1076, %2 : vector<2x128xf32>
    %1078 = arith.addf %1075, %1077 : vector<2x128xf32>
    %1079 = arith.mulf %1078, %1071 : vector<2x128xf32>
    %1080 = math.absf %1067 : vector<2x128xf32>
    %1081 = vector.broadcast %1055 : f32 to vector<2x128xf32>
    %1082 = arith.mulf %1080, %1081 : vector<2x128xf32>
    %cst_304 = arith.constant 0.327591091 : f32
    %1083 = vector.broadcast %cst_304 : f32 to vector<2x128xf32>
    %1084 = arith.mulf %1083, %1082 : vector<2x128xf32>
    %cst_305 = arith.constant 1.000000e+00 : f32
    %1085 = vector.broadcast %cst_305 : f32 to vector<2x128xf32>
    %1086 = arith.addf %1085, %1084 : vector<2x128xf32>
    %1087 = tpu.reciprocal %1086 {approx = true} : vector<2x128xf32> -> vector<2x128xf32>
    %1088 = arith.mulf %1086, %1087 : vector<2x128xf32>
    %cst_306 = arith.constant 2.000000e+00 : f32
    %1089 = vector.broadcast %cst_306 : f32 to vector<2x128xf32>
    %1090 = arith.subf %1089, %1088 : vector<2x128xf32>
    %1091 = arith.mulf %1087, %1090 : vector<2x128xf32>
    %cst_307 = arith.constant 1.06140542 : f32
    %1092 = vector.broadcast %cst_307 : f32 to vector<2x128xf32>
    %1093 = arith.mulf %1092, %1091 : vector<2x128xf32>
    %cst_308 = arith.constant 1.45315206 : f32
    %1094 = vector.broadcast %cst_308 : f32 to vector<2x128xf32>
    %1095 = arith.subf %1093, %1094 : vector<2x128xf32>
    %1096 = arith.mulf %1095, %1091 : vector<2x128xf32>
    %cst_309 = arith.constant 1.42141378 : f32
    %1097 = vector.broadcast %cst_309 : f32 to vector<2x128xf32>
    %1098 = arith.addf %1096, %1097 : vector<2x128xf32>
    %1099 = arith.mulf %1098, %1091 : vector<2x128xf32>
    %cst_310 = arith.constant 0.284496725 : f32
    %1100 = vector.broadcast %cst_310 : f32 to vector<2x128xf32>
    %1101 = arith.subf %1099, %1100 : vector<2x128xf32>
    %1102 = arith.mulf %1101, %1091 : vector<2x128xf32>
    %cst_311 = arith.constant 0.254829586 : f32
    %1103 = vector.broadcast %cst_311 : f32 to vector<2x128xf32>
    %1104 = arith.addf %1102, %1103 : vector<2x128xf32>
    %1105 = arith.mulf %1104, %1091 : vector<2x128xf32>
    %1106 = arith.mulf %1105, %1071 : vector<2x128xf32>
    %cst_312 = arith.constant 1.000000e+00 : f32
    %1107 = vector.broadcast %cst_312 : f32 to vector<2x128xf32>
    %1108 = arith.subf %1107, %1106 : vector<2x128xf32>
    %cst_313 = arith.constant 0.000000e+00 : f32
    %1109 = vector.broadcast %cst_313 : f32 to vector<2x128xf32>
    %1110 = arith.cmpf ole, %1067, %1109 : vector<2x128xf32>
    %cst_314 = arith.constant 0.000000e+00 : f32
    %1111 = vector.broadcast %cst_314 : f32 to vector<2x128xf32>
    %1112 = arith.subf %1111, %1108 : vector<2x128xf32>
    %1113 = arith.select %1110, %1108, %1112 : vector<2x128xi1>, vector<2x128xf32>
    %cst_315 = arith.constant 1.000000e+00 : f32
    %1114 = vector.broadcast %cst_315 : f32 to vector<2x128xf32>
    %1115 = arith.addf %1114, %1113 : vector<2x128xf32>
    %cst_316 = arith.constant 5.000000e-01 : f32
    %1116 = vector.broadcast %cst_316 : f32 to vector<2x128xf32>
    %1117 = arith.mulf %1116, %1115 : vector<2x128xf32>
    %cst_317 = arith.constant dense<0.000000e+00> : vector<2xf32>
    %1118 = vector.multi_reduction <add>, %1079, %cst_317 [1] : vector<2x128xf32> to vector<2xf32>
    %1119 = vector.shape_cast %1118 : vector<2xf32> to vector<2x1xf32>
    %cst_318 = arith.constant dense<0.000000e+00> : vector<1xf32>
    %1120 = vector.multi_reduction <add>, %1119, %cst_318 [0] : vector<2x1xf32> to vector<1xf32>
    %1121 = vector.shape_cast %1120 : vector<1xf32> to vector<1x1xf32>
    %cst_319 = arith.constant dense<0.000000e+00> : vector<2xf32>
    %1122 = vector.multi_reduction <add>, %1117, %cst_319 [1] : vector<2x128xf32> to vector<2xf32>
    %1123 = vector.shape_cast %1122 : vector<2xf32> to vector<2x1xf32>
    %cst_320 = arith.constant dense<0.000000e+00> : vector<1xf32>
    %1124 = vector.multi_reduction <add>, %1123, %cst_320 [0] : vector<2x1xf32> to vector<1xf32>
    %1125 = vector.shape_cast %1124 : vector<1xf32> to vector<1x1xf32>
    %cst_321 = arith.constant 9.99999974E-5 : f32
    %1126 = vector.broadcast %cst_321 : f32 to vector<1x1xf32>
    %1127 = arith.addf %1121, %1126 : vector<1x1xf32>
    %1128 = vector.broadcast %1061 : f32 to vector<1x1xf32>
    %1129 = arith.divf %1128, %1127 : vector<1x1xf32>
    %cst_322 = arith.constant 9.99999974E-5 : f32
    %1130 = vector.broadcast %cst_322 : f32 to vector<1x1xf32>
    %1131 = arith.addf %1125, %1130 : vector<1x1xf32>
    %1132 = vector.broadcast %1063 : f32 to vector<1x1xf32>
    %1133 = arith.divf %1132, %1131 : vector<1x1xf32>
    %1134 = arith.mulf %1129, %1121 : vector<1x1xf32>
    %1135 = arith.mulf %1133, %1125 : vector<1x1xf32>
    %1136 = arith.addf %1134, %1135 : vector<1x1xf32>
    %c8_323 = arith.constant 8 : index
    %1137 = arith.index_cast %1049 : i32 to index
    %1138 = memref.load %arg1[%c8_323, %1137] : memref<15x16xf32, #tpu.memory_space<smem>>
    %c9_324 = arith.constant 9 : index
    %1139 = arith.index_cast %1049 : i32 to index
    %1140 = memref.load %arg1[%c9_324, %1139] : memref<15x16xf32, #tpu.memory_space<smem>>
    %c10_325 = arith.constant 10 : index
    %1141 = arith.index_cast %1049 : i32 to index
    %1142 = memref.load %arg1[%c10_325, %1141] : memref<15x16xf32, #tpu.memory_space<smem>>
    %c11_326 = arith.constant 11 : index
    %1143 = arith.index_cast %1049 : i32 to index
    %1144 = memref.load %arg1[%c11_326, %1143] : memref<15x16xf32, #tpu.memory_space<smem>>
    %c12_327 = arith.constant 12 : index
    %1145 = arith.index_cast %1049 : i32 to index
    %1146 = memref.load %arg1[%c12_327, %1145] : memref<15x16xf32, #tpu.memory_space<smem>>
    %c13_328 = arith.constant 13 : index
    %1147 = arith.index_cast %1049 : i32 to index
    %1148 = memref.load %arg1[%c13_328, %1147] : memref<15x16xf32, #tpu.memory_space<smem>>
    %c14_329 = arith.constant 14 : index
    %1149 = arith.index_cast %1049 : i32 to index
    %1150 = memref.load %arg1[%c14_329, %1149] : memref<15x16xf32, #tpu.memory_space<smem>>
    %1151 = vector.broadcast %1138 : f32 to vector<2x128xf32>
    %1152 = arith.subf %3, %1151 : vector<2x128xf32>
    %1153 = vector.broadcast %1140 : f32 to vector<2x128xf32>
    %1154 = arith.subf %4, %1153 : vector<2x128xf32>
    %1155 = vector.broadcast %1144 : f32 to vector<2x128xf32>
    %1156 = arith.mulf %1155, %1154 : vector<2x128xf32>
    %1157 = arith.addf %1152, %1156 : vector<2x128xf32>
    %1158 = arith.mulf %1157, %1157 : vector<2x128xf32>
    %1159 = vector.broadcast %1142 : f32 to vector<2x128xf32>
    %1160 = arith.mulf %1159, %1158 : vector<2x128xf32>
    %1161 = arith.mulf %1154, %1154 : vector<2x128xf32>
    %1162 = vector.broadcast %1146 : f32 to vector<2x128xf32>
    %1163 = arith.mulf %1162, %1161 : vector<2x128xf32>
    %1164 = arith.addf %1160, %1163 : vector<2x128xf32>
    %1165 = math.exp %1164 : vector<2x128xf32>
    %cst_330 = arith.constant dense<0.000000e+00> : vector<2xf32>
    %1166 = vector.multi_reduction <add>, %1165, %cst_330 [1] : vector<2x128xf32> to vector<2xf32>
    %1167 = vector.shape_cast %1166 : vector<2xf32> to vector<2x1xf32>
    %cst_331 = arith.constant dense<0.000000e+00> : vector<1xf32>
    %1168 = vector.multi_reduction <add>, %1167, %cst_331 [0] : vector<2x1xf32> to vector<1xf32>
    %1169 = vector.shape_cast %1168 : vector<1xf32> to vector<1x1xf32>
    %1170 = arith.mulf %1150, %1148 : f32
    %1171 = vector.broadcast %1148 : f32 to vector<1x1xf32>
    %1172 = arith.mulf %1171, %1169 : vector<1x1xf32>
    %cst_332 = arith.constant 9.99999974E-5 : f32
    %1173 = vector.broadcast %cst_332 : f32 to vector<1x1xf32>
    %1174 = arith.addf %1172, %1173 : vector<1x1xf32>
    %1175 = vector.broadcast %1170 : f32 to vector<1x1xf32>
    %1176 = arith.divf %1175, %1174 : vector<1x1xf32>
    %1177 = arith.mulf %1176, %1169 : vector<1x1xf32>
    %1178 = arith.addf %1136, %1177 : vector<1x1xf32>
    %cst_333 = arith.constant 9.99999974E-5 : f32
    %1179 = vector.broadcast %cst_333 : f32 to vector<1x1xf32>
    %1180 = arith.addf %1178, %1179 : vector<1x1xf32>
    %1181 = vector.broadcast %1065 : f32 to vector<1x1xf32>
    %1182 = arith.divf %1181, %1180 : vector<1x1xf32>
    %1183 = arith.mulf %1129, %1182 : vector<1x1xf32>
    %1184 = vector.broadcast %1183 : vector<1x1xf32> to vector<2x128xf32>
    %1185 = arith.mulf %1079, %1184 : vector<2x128xf32>
    %1186 = arith.mulf %1133, %1182 : vector<1x1xf32>
    %1187 = vector.broadcast %1186 : vector<1x1xf32> to vector<2x128xf32>
    %1188 = arith.mulf %1117, %1187 : vector<2x128xf32>
    %1189 = arith.addf %1185, %1188 : vector<2x128xf32>
    %1190 = arith.mulf %1176, %1182 : vector<1x1xf32>
    %1191 = vector.broadcast %1190 : vector<1x1xf32> to vector<2x128xf32>
    %1192 = arith.mulf %1165, %1191 : vector<2x128xf32>
    %1193 = arith.addf %1189, %1192 : vector<2x128xf32>
    %c7_334 = arith.constant 7 : index
    %c0_335 = arith.constant 0 : index
    %c0_336 = arith.constant 0 : index
    %1194 = vector.load %arg7[%c7_334, %c0_335, %c0_336] : memref<8x2x128xf32, #tpu.memory_space<vmem>>, vector<1x2x128xf32>
    %1195 = vector.shape_cast %1194 : vector<1x2x128xf32> to vector<2x128xf32>
    %1196 = vector.shape_cast %1193 : vector<2x128xf32> to vector<1x2x128xf32>
    tpu.vector_store %arg7[%c7_334, %c0_335, %c0_336], %1196 {strides = array<i32>} : memref<8x2x128xf32, #tpu.memory_space<vmem>>, vector<1x2x128xf32>,
    return
  }
  func.func @transform_0(%arg0: i32) -> (i32, i32) {
    %c0_i32 = arith.constant 0 : i32
    %c0_i32_0 = arith.constant 0 : i32
    %c0_i32_1 = arith.constant 0 : i32
    return %c0_i32, %c0_i32_0 : i32, i32
  }
  func.func @transform_1(%arg0: i32) -> (i32, i32) {
    %c0_i32 = arith.constant 0 : i32
    %c0_i32_0 = arith.constant 0 : i32
    %c0_i32_1 = arith.constant 0 : i32
    return %c0_i32, %c0_i32_0 : i32, i32
  }
  func.func @transform_2(%arg0: i32) -> (i32, i32) {
    %c0_i32 = arith.constant 0 : i32
    %c0_i32_0 = arith.constant 0 : i32
    %c0_i32_1 = arith.constant 0 : i32
    return %c0_i32, %c0_i32_0 : i32, i32
  }
  func.func @transform_3(%arg0: i32) -> (i32, i32) {
    %c0_i32 = arith.constant 0 : i32
    %c0_i32_0 = arith.constant 0 : i32
    %c0_i32_1 = arith.constant 0 : i32
    return %c0_i32, %c0_i32_0 : i32, i32
  }
  func.func @transform_4(%arg0: i32) -> (i32, i32) {
    %c0_i32 = arith.constant 0 : i32
    %c0_i32_0 = arith.constant 0 : i32
    %c0_i32_1 = arith.constant 0 : i32
    return %c0_i32, %c0_i32_0 : i32, i32
  }
  func.func @transform_5(%arg0: i32) -> (i32, i32) {
    %c0_i32 = arith.constant 0 : i32
    %c0_i32_0 = arith.constant 0 : i32
    %c0_i32_1 = arith.constant 0 : i32
    return %c0_i32, %c0_i32_0 : i32, i32
  }
  func.func @transform_6(%arg0: i32) -> (i32, i32, i32) {
    %c0_i32 = arith.constant 0 : i32
    %c0_i32_0 = arith.constant 0 : i32
    %c0_i32_1 = arith.constant 0 : i32
    return %arg0, %c0_i32, %c0_i32_0 : i32, i32, i32
  }
}

</mosaic_0001>

<bundles_post_ra>
// kernel: tpu_custom_call.1
= control target key start
LH: loop header
LB: loop body
LE: loop exit
PB: predicated region body
PF: predicated region fallthrough
CT: control target
= control target key end

     0   :  { %s3938_s0 = inlined_call_operand.hbm [shape: f32[15,16], index: 0, kind: input, shape index: {}]   ;;  %s3939_s1 = inlined_call_operand.vmem [shape: f32[2,128], index: 1, kind: input, shape index: {}]   ;;  %s3940_s2 = inlined_call_operand.vmem [shape: f32[2,128], index: 2, kind: input, shape index: {}]   ;;  %s3941_s3 = inlined_call_operand.vmem [shape: f32[2,128], index: 3, kind: input, shape index: {}]   ;;  %s3942_s4 = inlined_call_operand.vmem [shape: f32[2,128], index: 4, kind: input, shape index: {}]   ;;  %s3943_s5 = inlined_call_operand.vmem [shape: f32[2,128], index: 5, kind: input, shape index: {}]   ;;  %s3944_s6 = inlined_call_operand.hbm [shape: f32[16,2,128], index: 6, kind: output, shape index: {}]  }
   0x1   :  { %4010 = sst [smem:[#allocation58_spill]] %s3938_s0 }
   0x2   :  { %4011 = sst [smem:[#allocation59_spill]] %s3939_s1 }
   0x3   :  { %4012 = sst [smem:[#allocation60_spill]] %s3940_s2 }
   0x4   :  { %4013 = sst [smem:[#allocation61_spill]] %s3941_s3 }
   0x5   :  { %4014 = sst [smem:[#allocation62_spill]] %s3942_s4 }
   0x6   :  { %4015 = sst [smem:[#allocation63_spill]] %s3943_s5 }
   0x7   :  { %4016 = sst [smem:[#allocation64_spill]] %s3944_s6 }
   0x8   :  { %11 = vsyncpa [#allocation4], 0 }
   0x9   :  { %12 = vsyncpa [#allocation3], 0 }
   0xa   :  { %14 = vsyncpa [#allocation3 + $0x1], 0  ;;  %s2434_s21 = smov 0   ;;  %s2436_s22 = smov 0  }
   0xb   :  { %s2438_s23 = smov 0   ;;  %s2440_s24 = smov 0  }
   0xc LB: > { %4017 = sst [smem:[#allocation8_spill]] %s2379_s21  ;;  %s2455_s25 = sadd.s32 4294967295, %s2391_s24   ;;  %s2391_s24 = sphi %s2440_s24, %s4162_s24   ;;  %s2387_s23 = sphi %s2438_s23, %s4165_s23   ;;  %s2383_s22 = sphi %s2436_s22, %s4164_s22   ;;  %s2379_s21 = sphi %s2434_s21, %s4163_s21  }
   0xd   : > { %4018 = sst [smem:[#allocation9_spill]] %s2383_s22  ;;  %s1774_s26 = sadd.s32 4294967294, %s2391_s24  }
   0xe   : > { %4019 = sst [smem:[#allocation10_spill]] %s2387_s23  ;;  %s2459_s27 = sadd.s32 1, %s2391_s24  }
   0xf   : > { %4020 = sst [smem:[#allocation11_spill]] %s2391_s24  ;;  %s153_s28 = sadd.s32 1, %s2387_s23 }
  0x10   : > { %4021 = sst [smem:[#allocation12_spill]] %s2455_s25  ;;  %s150_s29 = ssub.s32 %s2391_s24, %s2459_s27 }
  0x11   : > { %4022 = sst [smem:[#allocation13_spill]] %s2459_s27  ;;  %p163_p0 = scmp.ne.s32.totalorder %s2387_s23, %s2383_s22 }
  0x12   : > { %p151_p1 = scmp.eq.s32.totalorder %s150_s29, 0  ;;  %p164_p2 = scmp.eq.s32.totalorder %s2455_s25, 1 }
  0x13   : > { %p169_p3 = scmp.ne.s32.totalorder %s2383_s22, %s2379_s21  ;;  %p170_p4 = scmp.eq.s32.totalorder %s1774_s26, 1 }
  0x14   : > { %s2470_s30 = scalar_select %p151_p1, %s2387_s23, %s153_s28  }
  0x15   : > { %p2472_p5 = por %p164_p2, %p163_p0  ;;  %p2476_p6 = por %p170_p4, %p169_p3 }
  0x16   : > { %4023 = sst [smem:[#allocation14_spill]] %s2470_s30  ;;  %p1775_p7 = scmp.ge.s32.totalorder %s2391_s24, 1 }
  0x17   : > { %s4024_s7 = scalar_select %p2472_p5, 1, 0 }
  0x18   : > { %s4026_s8 = scalar_select %p2476_p6, 1, 0 }
  0x19   : > { %4025 = sst [smem:[#allocation15_spill]] %s4024_s7  ;;  %p177_p8 = scmp.lt.s32.totalorder %s2391_s24, 3 }
  0x1a   : > { %4027 = sst [smem:[#allocation16_spill]] %s4026_s8  ;;  %p2160_p10 = scmp.eq.s32.totalorder %s2455_s25, 0 }
  0x1b   : > { %p2482_p9 = pnand %p1775_p7, %p177_p8  ;;  %s4029_s0 = sld [smem:[#allocation58_spill]] }
  0x1d   : > { %p2152_p11 = pneg %p2482_p9 }
  0x1f   : > { %p2153_p12 = pnand %p2160_p10, %p2152_p11 }
  0x21   : > { %s2312_s12 = scalar_lea.hbm %s4029_s0, 256  ;;  %p2314_p0 = pneg %p2153_p12 }
  0x22   : > { %p2313_p13 = scmp.ne.s32.totalorder %s4029_s0, %s2312_s12  ;;  %p2319_p3 = scmp.lt.u32.totalorder %s2312_s12, %s4029_s0 }
  0x24   : > { %p2315_p1 = pnand %p2314_p0, %p2313_p13 }
  0x26   : > { %p2316_p2 = pneg %p2315_p1 }
  0x28   : > { %p2321_p4 = pnand %p2319_p3, %p2316_p2 }
  0x2a   : > { %2324 = shalt.err (!%p2321_p4)
}
  0x2b   : > { %s2393_s17 = smov [#allocation2]   ;;  %s2394_s18 = smov 128  }
  0x2c   : > { %s2395_s19 = smov 8   ;;  %218 = sbr.rel (%p2482_p9) target bundleno = 448 (0x1c0), region = 44 }
  0x2d   : > { %2155 = dma.hbm_to_smem (!%p2153_p12), %s4029_s0, 256, %s2393_s17, [#allocation4], %s2394_s18, %s2394_s18, %s2395_s19  }
  0x33   : > { %2370 = dma.done.wait (%p2160_p10), [#allocation4], 256  }
  0x34   : > { %2372 = vsyncadd (%p2160_p10), [#allocation4], 4294967040 }
  0x35   : > { %224 = sfence }
  0x36   : > { %s2510_s28 = sshll.u32 %s2455_s25, 3  ;;  %s4031_s1 = sld [smem:[#allocation59_spill]]  ;;  %vm323_vm0 = vcmask 1041408  }
  0x37   : > { %s251_s29 = sld [smem:[#allocation2 + %s2510_s28]]  ;;  %s252_s10 = sshra.s32 %s2510_s28, 7 }
  0x38   : > { %s2514_s11 = sshll.u32 %s252_s10, 7  ;;  %s2517_s9 = sand.u32 127, %s2510_s28 }
  0x39   : > { %4030 = sst [smem:[#allocation17_spill]] %s2517_s9  ;;  %s1922_s12 = sadd.s32 128, %s2514_s11 }
  0x3a   : > { %s1924_s13 = sadd.s32 256, %s2514_s11  ;;  %s258_s14 = sadd.s32 %s1922_s12, %s2517_s9 }
  0x3b   : > { %s262_s15 = sadd.s32 %s1924_s13, %s2517_s9  ;;  %s259_s18 = sld [smem:[#allocation2 + %s258_s14]] }
  0x3c   : > { %v2526_v0 = vld [vmem:[%s4031_s1] sm:$0x3]  ;;  %s263_s19 = sld [smem:[#allocation2 + %s262_s15]]  ;;  %s1926_s20 = sadd.s32 384, %s2514_s11 }
  0x3d   : > { %s1928_s26 = sadd.s32 512, %s2514_s11  ;;  %s266_s10 = sadd.s32 %s1926_s20, %s2517_s9  ;;  %v284_v1 = vstv %s251_s29 }
  0x3e   : > { %s270_s0 = sadd.s32 %s1928_s26, %s2517_s9  ;;  %s267_s30 = sld [smem:[#allocation2 + %s266_s10]]  ;;  %v2535_v2 = vsub.f32 %v2526_v0, %v284_v1 }
  0x3f   : > { %s2532_s23 = sld [smem:[#allocation2 + %s270_s0]]  ;;  %s431_s12 = sadd.s32 1, %s2510_s28 }
  0x40   : > { %s2539_s13 = sadd.s32 2, %s2510_s28  ;;  %v286_v3 = vmul.f32 %v2535_v2, %v2535_v2  ;;  %v298_v4 = vand.u32 2147483647, %v2535_v2  ;;  %s2544_s14 = sld [smem:[#allocation2 + %s431_s12]]  ;;  %vm318_vm1 = vcmp.le.f32.partialorder %v2535_v2, 0.0 }
  0x41   : > { %s433_s15 = sshra.s32 %s431_s12, 7  ;;  %v287_v5 = vstv %s259_s18  ;;  %s2548_s0 = sand.u32 127, %s431_s12 }
  0x42   : > { %v299_v6 = vstv %s263_s19  ;;  %s2546_s29 = sshll.u32 %s433_s15, 7  ;;  %4033 = sst [smem:[#allocation19_spill]] %s2548_s0  ;;  %v288_v8 = vmul.f32 %v287_v5, %v286_v3 }
  0x43   : > { %4032 = sst [smem:[#allocation18_spill]] %s2546_s29  ;;  %s4034_s2 = sld [smem:[#allocation60_spill]]  ;;  %v300_v9 = vmul.f32 %v299_v6, %v298_v4 }
  0x44   : > { %s1950_s18 = sadd.s32 128, %s2546_s29  ;;  %s1952_s19 = sadd.s32 256, %s2546_s29  ;;  %v289_v10 = vmul.f32 1.442695, %v288_v8  ;;  %v291_v11 = vstv %s267_s30 }
  0x45   : > { %s439_s20 = sadd.s32 %s1950_s18, %s2548_s0  ;;  %s443_s26 = sadd.s32 %s1952_s19, %s2548_s0  ;;  %v301_v12 = vmul.f32 0.3275911, %v300_v9  ;;  %v294_v15 = vstv %s2532_s23 }
  0x46   : > { %s440_s10 = sld [smem:[#allocation2 + %s439_s20]]  ;;  %s1954_s15 = sadd.s32 384, %s2546_s29  ;;  %2200 = vpow2.f32 %v289_v10  ;;  %v465_v16 = vstv %s2544_s14 }
  0x47   : > { %s444_s12 = sld [smem:[#allocation2 + %s443_s26]]  ;;  %s1956_s16 = sadd.s32 512, %s2546_s29  ;;  %v302_v17 = vadd.f32 1.0, %v301_v12  ;;  %v2574_v18 = vsub.f32 %v2526_v0, %v465_v16 }
  0x48   : > { %s4035_s3 = sld [smem:[#allocation61_spill]]  ;;  %s447_s18 = sadd.s32 %s1954_s15, %s2548_s0 }
  0x49   : > { %v2553_v7 = vld [vmem:[%s4034_s2] sm:$0x3]  ;;  %s451_s19 = sadd.s32 %s1956_s16, %s2548_s0  ;;  %s448_s30 = sld [smem:[#allocation2 + %s447_s18]]  ;;  %2202 = vrcp.f32 %v302_v17  ;;  %v467_v21 = vmul.f32 %v2574_v18, %v2574_v18  ;;  %v479_v22 = vand.u32 2147483647, %v2574_v18  ;;  %vm499_vm2 = vcmp.le.f32.partialorder %v2574_v18, 0.0 }
  0x4a   : > { %v292_v13 = vmul.f32 %v291_v11, %v2553_v7  ;;  %s2571_s20 = sld [smem:[#allocation2 + %s451_s19]]  ;;  %s614_s2 = sshra.s32 %s2539_s13, 7 }
  0x4b   : > { %s2577_s26 = sld [smem:[#allocation2 + %s2539_s13]]  ;;  %s2584_s1 = sshll.u32 %s614_s2, 7 }
  0x4c   : > { %v293_v19 = vadd.f32 1.0, %v292_v13  ;;  %4036 = sst [smem:[#allocation20_spill]] %s2584_s1  ;;  %s2587_s23 = sand.u32 127, %s2539_s13  ;;  %v468_v23 = vstv %s440_s10 }
  0x4d   : > { %4037 = sst [smem:[#allocation21_spill]] %s2587_s23  ;;  %v480_v24 = vstv %s444_s12  ;;  %s1978_s14 = sadd.s32 128, %s2584_s1  ;;  %v469_v25 = vmul.f32 %v468_v23, %v467_v21 }
  0x4e   : > { %v2565_v14 = vld [vmem:[%s4035_s3] sm:$0x3]  ;;  %s1980_s15 = sadd.s32 256, %s2584_s1  ;;  %v481_v26 = vmul.f32 %v480_v24, %v479_v22  ;;  %s620_s2 = sadd.s32 %s1978_s14, %s2587_s23 }
  0x4f   : > { %v295_v20 = vmul.f32 %v294_v15, %v2565_v14  ;;  %s624_s16 = sadd.s32 %s1980_s15, %s2587_s23  ;;  %s2593_s17 = sld [smem:[#allocation2 + %s620_s2]]  ;;  %v470_v28 = vmul.f32 1.442695, %v469_v25  ;;  %v472_v29 = vstv %s448_s30 }
  0x50   : > { %s2595_s18 = sld [smem:[#allocation2 + %s624_s16]]  ;;  %v482_v30 = vmul.f32 0.3275911, %v481_v26  ;;  %s1982_s13 = sadd.s32 384, %s2584_s1  ;;  %v473_v31 = vmul.f32 %v472_v29, %v2553_v7  ;;  %v475_v32 = vstv %s2571_s20  ;;  %v2613_v36 = vpop.eup %2200 }
  0x51   : > { %v296_v27 = vadd.f32 %v295_v20, %v293_v19  ;;  %s1984_s10 = sadd.s32 512, %s2584_s1  ;;  %s628_s12 = sadd.s32 %s1982_s13, %s2587_s23  ;;  %v646_v33 = vstv %s2577_s26  ;;  %2204 = vpow2.f32 %v470_v28  ;;  %v476_v38 = vmul.f32 %v475_v32, %v2565_v14 }
  0x52   : > { %s632_s19 = sadd.s32 %s1984_s10, %s2587_s23  ;;  %s2604_s14 = sld [smem:[#allocation2 + %s628_s12]]  ;;  %v2609_v34 = vsub.f32 %v2526_v0, %v646_v33  ;;  %v2611_v35 = vadd.f32 1.0, %v482_v30  ;;  %v474_v42 = vadd.f32 1.0, %v473_v31 }
  0x53   : > { %s2606_s15 = sld [smem:[#allocation2 + %s632_s19]]  ;;  %s793_s30 = sadd.s32 3, %s2510_s28  ;;  %v2620_v37 = vmul.f32 %v2613_v36, %v296_v27  ;;  %v2203_v41 = vpop.eup %2202 }
  0x54   : > { %s2617_s20 = sadd.s32 4, %s2510_s28  ;;  %v648_v39 = vmul.f32 %v2609_v34, %v2609_v34  ;;  %v660_v40 = vand.u32 2147483647, %v2609_v34  ;;  %s2626_s26 = sld [smem:[#allocation2 + %s793_s30]]  ;;  %2206 = vrcp.f32 %v2611_v35  ;;  %v304_v48 = vmul.f32 %v2203_v41, %v302_v17 }
  0x55   : > { %s795_s2 = sshra.s32 %s793_s30, 7  ;;  %v649_v43 = vstv %s2593_s17  ;;  %s2632_s13 = sand.u32 127, %s793_s30  ;;  %v324_v45 = vsel %vm323_vm0, %v2620_v37, 0.0  ;;  %v477_v52 = vadd.f32 %v476_v38, %v474_v42  ;;  %vm680_vm3 = vcmp.le.f32.partialorder %v2609_v34, 0.0 }
  0x56   : > { %v661_v44 = vstv %s2595_s18  ;;  %s2630_s16 = sshll.u32 %s795_s2, 7  ;;  %4039 = sst [smem:[#allocation23_spill]] %s2632_s13  ;;  %v650_v46 = vmul.f32 %v649_v43, %v648_v39  ;;  %325 = vadd.xlane.f32.xlu0 %v324_v45  ;;  %v305_v51 = vsub.f32 2.0, %v304_v48 }
  0x57   : > { %4038 = sst [smem:[#allocation22_spill]] %s2630_s16  ;;  %v662_v47 = vmul.f32 %v661_v44, %v660_v40  ;;  %s2006_s17 = sadd.s32 128, %s2630_s16 }
  0x58   : > { %s2008_s18 = sadd.s32 256, %s2630_s16  ;;  %s801_s10 = sadd.s32 %s2006_s17, %s2632_s13  ;;  %v651_v49 = vmul.f32 1.442695, %v650_v46  ;;  %v653_v50 = vstv %s2604_s14  ;;  %v2653_v57 = vmul.f32 %v2203_v41, %v305_v51 }
  0x59   : > { %s805_s12 = sadd.s32 %s2008_s18, %s2632_s13  ;;  %s2642_s19 = sld [smem:[#allocation2 + %s801_s10]]  ;;  %v654_v53 = vmul.f32 %v653_v50, %v2553_v7  ;;  %v656_v54 = vstv %s2606_s15  ;;  %v663_v55 = vmul.f32 0.3275911, %v662_v47 }
  0x5a   : > { %s2644_s30 = sld [smem:[#allocation2 + %s805_s12]]  ;;  %s2010_s2 = sadd.s32 384, %s2630_s16  ;;  %2208 = vpow2.f32 %v651_v49  ;;  %v827_v56 = vstv %s2626_s26  ;;  %v657_v62 = vmul.f32 %v656_v54, %v2565_v14  ;;  %v307_v63 = vmul.f32 1.0614054, %v2653_v57 }
  0x5b   : > { %s2012_s3 = sadd.s32 512, %s2630_s16  ;;  %s809_s17 = sadd.s32 %s2010_s2, %s2632_s13  ;;  %v2660_v58 = vsub.f32 %v2526_v0, %v827_v56  ;;  %v2662_v59 = vadd.f32 1.0, %v663_v55  ;;  %v2664_v60 = vpop.eup %2204  ;;  %v655_v61 = vadd.f32 1.0, %v654_v53 }
  0x5c   : > { %s813_s27 = sadd.s32 %s2012_s3, %s2632_s13  ;;  %s2655_s14 = sld [smem:[#allocation2 + %s809_s17]]  ;;  %v2673_v1 = vmul.f32 %v2664_v60, %v477_v52  ;;  %v1788_v8 = vadd.f32 -1.4531521, %v307_v63 }
  0x5d   : > { %s2657_s18 = sld [smem:[#allocation2 + %s813_s27]]  ;;  %s976_s15 = sshra.s32 %s2617_s20, 7  ;;  %v829_v3 = vmul.f32 %v2660_v58, %v2660_v58  ;;  %v841_v4 = vand.u32 2147483647, %v2660_v58  ;;  %2210 = vrcp.f32 %v2662_v59  ;;  %v658_v13 = vadd.f32 %v657_v62, %v655_v61 }
  0x5e   : > { %s2668_s3 = sld [smem:[#allocation2 + %s2617_s20]]  ;;  %4040 = vst [vmem:[#allocation24_spill] sm:$0xff] %v2673_v1  ;;  %s2678_s27 = sshll.u32 %s976_s15, 7  ;;  %v2207_v9 = vpop.eup %2206  ;;  %v504_v10 = vsel %vm323_vm0, %v2673_v1, 0.0  ;;  %v309_v15 = vmul.f32 %v1788_v8, %v2653_v57  ;;  %vm861_vm5 = vcmp.le.f32.partialorder %v2660_v58, 0.0 }
  0x5f   : > { %4041 = sst [smem:[#allocation25_spill]] %s2678_s27  ;;  %s2681_s26 = sand.u32 127, %s2617_s20  ;;  %v830_v5 = vstv %s2642_s19  ;;  %505 = vadd.xlane.f32.xlu1 %v504_v10  ;;  %v485_v16 = vmul.f32 %v2207_v9, %v2611_v35 }
  0x60   : > { %4042 = sst [smem:[#allocation26_spill]] %s2681_s26  ;;  %v842_v6 = vstv %s2644_s30  ;;  %s2034_s10 = sadd.s32 128, %s2678_s27  ;;  %v831_v11 = vmul.f32 %v830_v5, %v829_v3  ;;  %v310_v24 = vadd.f32 1.4214138, %v309_v15 }
  0x61   : > { %s2036_s12 = sadd.s32 256, %s2678_s27  ;;  %v843_v12 = vmul.f32 %v842_v6, %v841_v4  ;;  %s982_s20 = sadd.s32 %s2034_s10, %s2681_s26  ;;  %v486_v26 = vsub.f32 2.0, %v485_v16 }
  0x62   : > { %s986_s19 = sadd.s32 %s2036_s12, %s2681_s26  ;;  %s2692_s30 = sld [smem:[#allocation2 + %s982_s20]]  ;;  %v832_v17 = vmul.f32 1.442695, %v831_v11  ;;  %v834_v19 = vstv %s2655_s14  ;;  %v311_v30 = vmul.f32 %v310_v24, %v2653_v57 }
  0x63   : > { %s2694_s2 = sld [smem:[#allocation2 + %s986_s19]]  ;;  %v837_v20 = vstv %s2657_s18  ;;  %s2038_s17 = sadd.s32 384, %s2678_s27  ;;  %v844_v21 = vmul.f32 0.3275911, %v843_v12  ;;  %v835_v22 = vmul.f32 %v834_v19, %v2553_v7  ;;  %v2731_v38 = vmul.f32 %v2207_v9, %v486_v26 }
  0x64   : > { %s2040_s15 = sadd.s32 512, %s2678_s27  ;;  %s990_s10 = sadd.s32 %s2038_s17, %s2681_s26  ;;  %v1008_v23 = vstv %s2668_s3  ;;  %2212 = vpow2.f32 %v832_v17  ;;  %v2713_v27 = vpop.eup %2208  ;;  %v838_v29 = vmul.f32 %v837_v20, %v2565_v14  ;;  %v1789_v41 = vadd.f32 -0.28449672, %v311_v30 }
  0x65   : > { %s994_s12 = sadd.s32 %s2040_s15, %s2681_s26  ;;  %s2706_s20 = sld [smem:[#allocation2 + %s990_s10]]  ;;  %v2711_v25 = vsub.f32 %v2526_v0, %v1008_v23  ;;  %v836_v28 = vadd.f32 1.0, %v835_v22  ;;  %v2721_v31 = vadd.f32 1.0, %v844_v21  ;;  %v2724_v32 = vmul.f32 %v2713_v27, %v658_v13 }
  0x66   : > { %s2708_s19 = sld [smem:[#allocation2 + %s994_s12]]  ;;  %s1155_s14 = sadd.s32 5, %s2510_s28  ;;  %v488_v45 = vmul.f32 1.0614054, %v2731_v38  ;;  %v313_v47 = vmul.f32 %v1789_v41, %v2653_v57 }
  0x67   : > { %s2718_s18 = sadd.s32 6, %s2510_s28  ;;  %4043 = vst [vmem:[#allocation27_spill] sm:$0xff] %v2724_v32  ;;  %v1010_v33 = vmul.f32 %v2711_v25, %v2711_v25  ;;  %v1022_v35 = vand.u32 2147483647, %v2711_v25  ;;  %s2729_s3 = sld [smem:[#allocation2 + %s1155_s14]]  ;;  %v685_v42 = vsel %vm323_vm0, %v2724_v32, 0.0  ;;  %v2211_v46 = vpop.eup %2210  ;;  %2214 = vrcp.f32 %v2721_v31 }
  0x68   : > { %s1157_s17 = sshra.s32 %s1155_s14, 7  ;;  %v1011_v39 = vstv %s2692_s30  ;;  %s2737_s10 = sand.u32 127, %s1155_s14  ;;  %686 = vadd.xlane.f32.xlu0 %v685_v42  ;;  %v839_v48 = vadd.f32 %v838_v29, %v836_v28  ;;  %v666_v51 = vmul.f32 %v2211_v46, %v2662_v59  ;;  %v314_v54 = vadd.f32 0.2548296, %v313_v47 }
  0x69   : > { %v1023_v40 = vstv %s2694_s2  ;;  %s2735_s15 = sshll.u32 %s1157_s17, 7  ;;  %v1012_v43 = vmul.f32 %v1011_v39, %v1010_v33  ;;  %v1804_v55 = vadd.f32 -1.4531521, %v488_v45  ;;  %s4053_s5 = sld [smem:[#allocation63_spill]]  ;;  %vm1042_vm4 = vcmp.le.f32.partialorder %v2711_v25, 0.0 }
  0x6a   : > { %4044 = sst [smem:[#allocation28_spill]] %s2735_s15  ;;  %v1024_v44 = vmul.f32 %v1023_v40, %v1022_v35  ;;  %s2062_s12 = sadd.s32 128, %s2735_s15  ;;  %v667_v61 = vsub.f32 2.0, %v666_v51  ;;  %v315_v63 = vmul.f32 %v314_v54, %v2653_v57 }
  0x6b   : > { %s2064_s8 = sadd.s32 256, %s2735_s15  ;;  %s1163_s30 = sadd.s32 %s2062_s12, %s2737_s10  ;;  %v1013_v49 = vmul.f32 1.442695, %v1012_v43  ;;  %v1015_v50 = vstv %s2706_s20  ;;  %v490_v3 = vmul.f32 %v1804_v55, %v2731_v38 }
  0x6c   : > { %s1167_s2 = sadd.s32 %s2064_s8, %s2737_s10  ;;  %s2749_s14 = sld [smem:[#allocation2 + %s1163_s30]]  ;;  %v1016_v52 = vmul.f32 %v1015_v50, %v2553_v7  ;;  %v1018_v53 = vstv %s2708_s19  ;;  %v1025_v62 = vmul.f32 0.3275911, %v1024_v44  ;;  %v2776_v5 = vmul.f32 %v2211_v46, %v667_v61 }
  0x6d   : > { %s2751_s17 = sld [smem:[#allocation2 + %s1167_s2]]  ;;  %s2066_s8 = sadd.s32 384, %s2735_s15  ;;  %2216 = vpow2.f32 %v1013_v49  ;;  %v1189_v56 = vstv %s2729_s3  ;;  %v1019_v10 = vmul.f32 %v1018_v53, %v2565_v14  ;;  %v316_v12 = vmul.f32 %v2613_v36, %v315_v63 }
  0x6e   : > { %s2068_s12 = sadd.s32 512, %s2735_s15  ;;  %s1171_s21 = sadd.s32 %s2066_s8, %s2737_s10  ;;  %v2766_v59 = vsub.f32 %v2526_v0, %v1189_v56  ;;  %v2770_v4 = vpop.eup %2212  ;;  %v2778_v6 = vadd.f32 1.0, %v1025_v62  ;;  %v1017_v9 = vadd.f32 1.0, %v1016_v52  ;;  %v669_v13 = vmul.f32 1.0614054, %v2776_v5 }
  0x6f   : > { %s1175_s24 = sadd.s32 %s2068_s12, %s2737_s10  ;;  %s2761_s20 = sld [smem:[#allocation2 + %s1171_s21]]  ;;  %v2781_v8 = vmul.f32 %v2770_v4, %v839_v48  ;;  %v491_v17 = vadd.f32 1.4214138, %v490_v3  ;;  %v317_v36 = vsub.f32 1.0, %v316_v12 }
  0x70   : > { %s2763_s30 = sld [smem:[#allocation2 + %s1175_s24]]  ;;  %s1338_s3 = sshra.s32 %s2718_s18, 7  ;;  %v1191_v57 = vmul.f32 %v2766_v59, %v2766_v59  ;;  %v1821_v19 = vadd.f32 -1.4531521, %v669_v13  ;;  %2218 = vrcp.f32 %v2778_v6  ;;  %v1020_v21 = vadd.f32 %v1019_v10, %v1017_v9 }
  0x71   : > { %s2773_s19 = sld [smem:[#allocation2 + %s2718_s18]]  ;;  %4045 = vst [vmem:[#allocation29_spill] sm:$0xff] %v2781_v8  ;;  %s2786_s21 = sshll.u32 %s1338_s3, 7  ;;  %v866_v15 = vsel %vm323_vm0, %v2781_v8, 0.0  ;;  %v2806_v20 = vpop.eup %2214  ;;  %v492_v24 = vmul.f32 %v491_v17, %v2731_v38  ;;  %v319_v30 = vsub.f32 0.0, %v317_v36  ;;  %vm1223_vm7 = vcmp.le.f32.partialorder %v2766_v59, 0.0 }
  0x72   : > { %4046 = sst [smem:[#allocation30_spill]] %s2786_s21  ;;  %s2789_s24 = sand.u32 127, %s2718_s18  ;;  %v1192_v11 = vstv %s2749_s14  ;;  %867 = vadd.xlane.f32.xlu1 %v866_v15  ;;  %v1203_v33 = vand.u32 2147483647, %v2766_v59  ;;  %v671_v39 = vmul.f32 %v1821_v19, %v2776_v5  ;;  %v847_v44 = vmul.f32 %v2806_v20, %v2721_v31 }
  0x73   : > { %4047 = sst [smem:[#allocation31_spill]] %s2789_s24  ;;  %s2090_s2 = sadd.s32 128, %s2786_s21  ;;  %v1193_v16 = vmul.f32 %v1192_v11, %v1191_v57  ;;  %v1204_v41 = vstv %s2751_s17  ;;  %v2833_v42 = vsel %vm318_vm1, %v317_v36, %v319_v30  ;;  %v1805_v43 = vadd.f32 -0.28449672, %v492_v24 }
  0x74   : > { %s2092_s8 = sadd.s32 256, %s2786_s21  ;;  %s1344_s12 = sadd.s32 %s2090_s2, %s2789_s24  ;;  %v672_v2 = vadd.f32 1.4214138, %v671_v39  ;;  %v1205_v50 = vmul.f32 %v1204_v41, %v1203_v33  ;;  %v848_v55 = vsub.f32 2.0, %v847_v44 }
  0x75   : > { %s1348_s3 = sadd.s32 %s2092_s8, %s2789_s24  ;;  %s2800_s18 = sld [smem:[#allocation2 + %s1344_s12]]  ;;  %v1194_v22 = vmul.f32 1.442695, %v1193_v16  ;;  %v1196_v23 = vstv %s2761_s20  ;;  %v494_v54 = vmul.f32 %v1805_v43, %v2731_v38 }
  0x76   : > { %s2802_s14 = sld [smem:[#allocation2 + %s1348_s3]]  ;;  %s2094_s2 = sadd.s32 384, %s2786_s21  ;;  %v1197_v26 = vmul.f32 %v1196_v23, %v2553_v7  ;;  %v1199_v28 = vstv %s2763_s30  ;;  %v673_v53 = vmul.f32 %v672_v2, %v2776_v5  ;;  %v2874_v15 = vmul.f32 %v2806_v20, %v848_v55 }
  0x77   : > { %s2096_s8 = sadd.s32 512, %s2786_s21  ;;  %s1352_s12 = sadd.s32 %s2094_s2, %s2789_s24  ;;  %v1370_v29 = vstv %s2773_s19  ;;  %2220 = vpow2.f32 %v1194_v22  ;;  %v2826_v40 = vpop.eup %2216  ;;  %v1200_v47 = vmul.f32 %v1199_v28, %v2565_v14  ;;  %v495_v11 = vadd.f32 0.2548296, %v494_v54 }
  0x78   : > { %s1356_s3 = sadd.s32 %s2096_s8, %s2789_s24  ;;  %s2818_s6 = sld [smem:[#allocation2 + %s1352_s12]]  ;;  %v2823_v35 = vsub.f32 %v2526_v0, %v1370_v29  ;;  %v2838_v45 = vmul.f32 %v2826_v40, %v1020_v21  ;;  %v1198_v46 = vadd.f32 1.0, %v1197_v26  ;;  %v1822_v57 = vadd.f32 -0.28449672, %v673_v53 }
  0x79   : > { %s2820_s20 = sld [smem:[#allocation2 + %s1356_s3]]  ;;  %s1517_s30 = sadd.s32 7, %s2510_s28  ;;  %v496_v19 = vmul.f32 %v495_v11, %v2731_v38  ;;  %v850_v20 = vmul.f32 1.0614054, %v2874_v15  ;;  %v2908_v29 = vmul.f32 0.3275911, %v1205_v50 }
  0x7a   : > { %4048 = vst [vmem:[#allocation32_spill] sm:$0xff] %v2838_v45  ;;  %v1372_v48 = vmul.f32 %v2823_v35, %v2823_v35  ;;  %s2843_s17 = sld [smem:[#allocation2 + %s1517_s30]]  ;;  %s1519_s28 = sshra.s32 %s1517_s30, 7  ;;  %v1047_v31 = vsel %vm323_vm0, %v2838_v45, 0.0  ;;  %v1384_v52 = vand.u32 2147483647, %v2823_v35  ;;  %v1201_v56 = vadd.f32 %v1200_v47, %v1198_v46  ;;  %v2219_v3 = vpop.eup %2218 }
  0x7b   : > { %v1373_v49 = vstv %s2800_s18  ;;  %s2846_s19 = sshll.u32 %s1519_s28, 7  ;;  %s2848_s8 = sand.u32 127, %s1517_s30  ;;  %1048 = vadd.xlane.f32.xlu0 %v1047_v31  ;;  %v1028_v13 = vmul.f32 %v2219_v3, %v2778_v6  ;;  %v675_v36 = vmul.f32 %v1822_v57, %v2776_v5  ;;  %v497_v28 = vmul.f32 %v2664_v60, %v496_v19 }
  0x7c   : > { %4049 = sst [smem:[#allocation33_spill]] %s2846_s19  ;;  %v1374_v51 = vmul.f32 %v1373_v49, %v1372_v48  ;;  %s2118_s12 = sadd.s32 128, %s2846_s19  ;;  %v1385_v63 = vstv %s2802_s14  ;;  %v1838_v46 = vadd.f32 -1.4531521, %v850_v20  ;;  %vm1404_vm6 = vcmp.le.f32.partialorder %v2823_v35, 0.0 }
  0x7d   : > { %4050 = sst [smem:[#allocation34_spill]] %s2848_s8  ;;  %s2120_s3 = sadd.s32 256, %s2846_s19  ;;  %v1386_v16 = vmul.f32 %v1385_v63, %v1384_v52  ;;  %v1029_v6 = vsub.f32 2.0, %v1028_v13  ;;  %v676_v26 = vadd.f32 0.2548296, %v675_v36  ;;  %v498_v44 = vsub.f32 1.0, %v497_v28 }
  0x7e   : > { %s1525_s18 = sadd.s32 %s2118_s12, %s2848_s8  ;;  %s1529_s30 = sadd.s32 %s2120_s3, %s2848_s8  ;;  %v1375_v61 = vmul.f32 1.442695, %v1374_v51  ;;  %v1377_v62 = vstv %s2818_s6 }
  0x7f   : > { %s2861_s28 = sld [smem:[#allocation2 + %s1525_s18]]  ;;  %v1378_v9 = vmul.f32 %v1377_v62, %v2553_v7  ;;  %v1380_v10 = vstv %s2820_s20  ;;  %s2122_s12 = sadd.s32 384, %s2846_s19  ;;  %v2914_v39 = vmul.f32 %v2219_v3, %v1029_v6  ;;  %v1387_v41 = vmul.f32 0.3275911, %v1386_v16 }
  0x80   : > { %s2863_s2 = sld [smem:[#allocation2 + %s1529_s30]]  ;;  %s2124_s3 = sadd.s32 512, %s2846_s19  ;;  %2222 = vpow2.f32 %v1375_v61  ;;  %v1551_v12 = vstv %s2843_s17  ;;  %v1381_v23 = vmul.f32 %v1380_v10, %v2565_v14  ;;  %v677_v60 = vmul.f32 %v676_v26, %v2776_v5  ;;  %v2931_v5 = vld [vmem:[%s4053_s5] sm:$0x3] }
  0x81   : > { %s1533_s7 = sadd.s32 %s2122_s12, %s2848_s8  ;;  %s1537_s25 = sadd.s32 %s2124_s3, %s2848_s8  ;;  %v2881_v17 = vsub.f32 %v2526_v0, %v1551_v12  ;;  %v2885_v21 = vpop.eup %2220  ;;  %v1379_v22 = vadd.f32 1.0, %v1378_v9  ;;  %v1031_v2 = vmul.f32 1.0614054, %v2914_v39  ;;  %v500_v52 = vsub.f32 0.0, %v498_v44 }
  0x82   : > { %s2876_s6 = sld [smem:[#allocation2 + %s1533_s7]]  ;;  %s4051_s20 = sadd.s32 1024, %s2584_s1  ;;  %v2894_v0 = vmul.f32 %v2885_v21, %v1201_v56  ;;  %v678_v51 = vmul.f32 %v2713_v27, %v677_v60  ;;  %v852_v62 = vmul.f32 %v1838_v46, %v2874_v15  ;;  %v2953_v63 = vadd.f32 1.0, %v1387_v41 }
  0x83   : > { %s2878_s14 = sld [smem:[#allocation2 + %s1537_s25]]  ;;  %s718_s17 = sadd.s32 %s4051_s20, %s2587_s23  ;;  %v1553_v38 = vmul.f32 %v2881_v17, %v2881_v17  ;;  %v1565_v43 = vand.u32 2147483647, %v2881_v17  ;;  %v1382_v47 = vadd.f32 %v1381_v23, %v1379_v22  ;;  %v1855_v55 = vadd.f32 -1.4531521, %v1031_v2 }
  0x84   : > { %s1994_s18 = sadd.s32 1152, %s2584_s1  ;;  %4052 = vst [vmem:[#allocation35_spill] sm:$0xff] %v2894_v0  ;;  %s2899_s25 = sld [smem:[#allocation2 + %s718_s17]]  ;;  %v1228_v30 = vsel %vm323_vm0, %v2894_v0, 0.0  ;;  %v679_v27 = vsub.f32 1.0, %v678_v51  ;;  %v2963_v10 = vsel %vm499_vm2, %v498_v44, %v500_v52  ;;  %v3002_v46 = vadd.f32 1.0, %v2908_v29 }
  0x85   : > { %s722_s7 = sadd.s32 %s1994_s18, %s2587_s23  ;;  %v1554_v24 = vstv %s2861_s28  ;;  %s1996_s12 = sadd.s32 1280, %s2584_s1  ;;  %1229 = vadd.xlane.f32.xlu1 %v1228_v30  ;;  %v1033_v57 = vmul.f32 %v1855_v55, %v2914_v39  ;;  %v853_v23 = vadd.f32 1.4214138, %v852_v62  ;;  %vm1585_vm8 = vcmp.le.f32.partialorder %v2881_v17, 0.0 }
  0x86   : > { %s2904_s30 = sld [smem:[#allocation2 + %s722_s7]]  ;;  %v1555_v33 = vmul.f32 %v1554_v24, %v1553_v38  ;;  %s726_s3 = sadd.s32 %s1996_s12, %s2587_s23  ;;  %v1566_v50 = vstv %s2863_s2  ;;  %v681_v16 = vsub.f32 0.0, %v679_v27 }
  0x87   : > { %s1998_s20 = sadd.s32 1408, %s2584_s1  ;;  %s2917_s28 = sld [smem:[#allocation2 + %s726_s3]]  ;;  %v1034_v6 = vadd.f32 1.4214138, %v1033_v57 }
  0x88   : > { %s730_s17 = sadd.s32 %s1998_s20, %s2587_s23  ;;  %v1556_v48 = vmul.f32 1.442695, %v1555_v33  ;;  %v1558_v49 = vstv %s2876_s6  ;;  %s2000_s7 = sadd.s32 1536, %s2584_s1  ;;  %v2981_v22 = vsel %vm680_vm3, %v679_v27, %v681_v16 }
  0x89   : > { %s2922_s18 = sld [smem:[#allocation2 + %s730_s17]]  ;;  %v1559_v31 = vmul.f32 %v1558_v49, %v2553_v7  ;;  %s734_s20 = sadd.s32 %s2000_s7, %s2587_s23  ;;  %v1561_v53 = vstv %s2878_s14  ;;  %v1035_v24 = vmul.f32 %v1034_v6, %v2914_v39 }
  0x8a   : > { %s1936_s22 = sadd.s32 1024, %s2514_s11  ;;  %2224 = vpow2.f32 %v1556_v48  ;;  %s4054_s4 = sld [smem:[#allocation62_spill]]  ;;  %v744_v54 = vstv %s2899_s25  ;;  %v2946_v56 = vpop.eup %2222  ;;  %v1562_v12 = vmul.f32 %v1561_v53, %v2565_v14  ;;  %v1567_v14 = vmul.f32 %v1566_v50, %v1565_v43 }
  0x8b   : > { %s2942_s2 = sld [smem:[#allocation2 + %s734_s20]]  ;;  %s357_s12 = sadd.s32 %s1936_s22, %s2517_s9  ;;  %v2956_v3 = vmul.f32 %v2946_v56, %v1382_v47  ;;  %v1560_v11 = vadd.f32 1.0, %v1559_v31  ;;  %2226 = vrcp.f32 %v2953_v63  ;;  %v1856_v41 = vadd.f32 -0.28449672, %v1035_v24 }
  0x8c   : > { %v746_v61 = vstv %s2904_s30  ;;  %s2949_s7 = sld [smem:[#allocation2 + %s357_s12]]  ;;  %s1938_s3 = sadd.s32 1152, %s2514_s11  ;;  %v854_v43 = vmul.f32 %v853_v23, %v2874_v15  ;;  %v1568_v47 = vmul.f32 0.3275911, %v1567_v14  ;;  %2228 = vrcp.f32 %v3002_v46 }
  0x8d   : > { %4055 = vst [vmem:[#allocation36_spill] sm:$0xff] %v2956_v3  ;;  %v747_v9 = vsub.f32 %v2931_v5, %v746_v61  ;;  %s361_s22 = sadd.s32 %s1938_s3, %s2517_s9  ;;  %s1940_s14 = sadd.s32 1280, %s2514_s11  ;;  %v1409_v18 = vsel %vm323_vm0, %v2956_v3, 0.0  ;;  %v1563_v26 = vadd.f32 %v1562_v12, %v1560_v11  ;;  %v752_v34 = vstv %s2917_s28 }
  0x8e   : > { %s2968_s25 = sld [smem:[#allocation2 + %s361_s22]]  ;;  %s365_s30 = sadd.s32 %s1940_s14, %s2517_s9  ;;  %1410 = vadd.xlane.f32.xlu0 %v1409_v18  ;;  %v1037_v31 = vmul.f32 %v1856_v41, %v2914_v39  ;;  %v1839_v29 = vadd.f32 -0.28449672, %v854_v43  ;;  %v3022_v55 = vadd.f32 1.0, %v1568_v47 }
  0x8f   : > { %v748_v36 = vstv %s2922_s18  ;;  %v754_v19 = vmul.f32 %v747_v9, %v747_v9  ;;  %s2974_s20 = sld [smem:[#allocation2 + %s365_s30]]  ;;  %s1942_s6 = sadd.s32 1408, %s2514_s11 }
  0x90   : > { %v2940_v7 = vld [vmem:[%s4054_s4] sm:$0x3]  ;;  %v749_v20 = vmul.f32 %v748_v36, %v747_v9  ;;  %s369_s17 = sadd.s32 %s1942_s6, %s2517_s9  ;;  %s1944_s12 = sadd.s32 1536, %s2514_s11  ;;  %v856_v12 = vmul.f32 %v1839_v29, %v2874_v15  ;;  %2230 = vrcp.f32 %v3022_v55 }
  0x91   : > { %v745_v13 = vsub.f32 %v2940_v7, %v744_v54  ;;  %v755_v38 = vstv %s2942_s2  ;;  %s2984_s18 = sld [smem:[#allocation2 + %s369_s17]]  ;;  %s373_s3 = sadd.s32 %s1944_s12, %s2517_s9  ;;  %v1038_v54 = vadd.f32 0.2548296, %v1037_v31 }
  0x92   : > { %s2989_s22 = sld [smem:[#allocation2 + %s373_s3]]  ;;  %v383_v30 = vstv %s2949_s7  ;;  %s2048_s14 = sadd.s32 1024, %s2678_s27  ;;  %v756_v33 = vmul.f32 %v755_v38, %v754_v19  ;;  %v857_v14 = vadd.f32 0.2548296, %v856_v12 }
  0x93   : > { %v750_v28 = vadd.f32 %v749_v20, %v745_v13  ;;  %s1080_s30 = sadd.s32 %s2048_s14, %s2681_s26  ;;  %s2050_s2 = sadd.s32 1152, %s2678_s27  ;;  %v384_v49 = vsub.f32 %v2940_v7, %v383_v30  ;;  %v1039_v11 = vmul.f32 %v1038_v54, %v2914_v39 }
  0x94   : > { %v385_v44 = vstv %s2968_s25  ;;  %s2998_s6 = sld [smem:[#allocation2 + %s1080_s30]]  ;;  %s1084_s17 = sadd.s32 %s2050_s2, %s2681_s26  ;;  %v3004_v48 = vpop.eup %2224 }
  0x95   : > { %v751_v60 = vmul.f32 %v750_v28, %v750_v28  ;;  %v386_v2 = vsub.f32 %v2931_v5, %v385_v44  ;;  %s3008_s28 = sld [smem:[#allocation2 + %s1084_s17]]  ;;  %s2052_s7 = sadd.s32 1280, %s2678_s27  ;;  %v3013_v50 = vmul.f32 %v3004_v48, %v1563_v26  ;;  %v391_v57 = vstv %s2974_s20  ;;  %v2227_v36 = vpop.eup %2226 }
  0x96   : > { %s1088_s25 = sadd.s32 %s2052_s7, %s2681_s26  ;;  %s2054_s12 = sadd.s32 1408, %s2678_s27  ;;  %v1040_v39 = vmul.f32 %v2826_v40, %v1039_v11  ;;  %v1390_v38 = vmul.f32 %v2227_v36, %v2953_v63  ;;  %v858_v40 = vmul.f32 %v857_v14, %v2874_v15  ;;  %v2229_v15 = vpop.eup %2228 }
  0x97   : > { %4056 = vst [vmem:[#allocation37_spill] sm:$0xff] %v3013_v50  ;;  %v753_v51 = vmul.f32 %v752_v34, %v751_v60  ;;  %v387_v52 = vstv %s2984_s18  ;;  %v393_v53 = vmul.f32 %v386_v2, %v386_v2  ;;  %s3019_s3 = sld [smem:[#allocation2 + %s1088_s25]]  ;;  %s1092_s14 = sadd.s32 %s2054_s12, %s2681_s26  ;;  %v1590_v61 = vsel %vm323_vm0, %v3013_v50, 0.0 }
  0x98   : > { %v388_v62 = vmul.f32 %v387_v52, %v386_v2  ;;  %v394_v9 = vstv %s2989_s22  ;;  %s3027_s30 = sld [smem:[#allocation2 + %s1092_s14]]  ;;  %s2056_s2 = sadd.s32 1536, %s2678_s27  ;;  %1591 = vadd.xlane.f32.xlu1 %v1590_v61  ;;  %v1041_v26 = vsub.f32 1.0, %v1040_v39  ;;  %v1391_v63 = vsub.f32 2.0, %v1390_v38 }
  0x99   : > { %v757_v27 = vadd.f32 %v756_v33, %v753_v51  ;;  %s1096_s18 = sadd.s32 %s2056_s2, %s2681_s26  ;;  %s1964_s17 = sadd.s32 1024, %s2546_s29  ;;  %v395_v19 = vmul.f32 %v394_v9, %v393_v53  ;;  %v859_v43 = vmul.f32 %v2770_v4, %v858_v40  ;;  %v1209_v25 = vmul.f32 %v2229_v15, %v3002_v46 }
  0x9a   : > { %v389_v16 = vadd.f32 %v388_v62, %v384_v49  ;;  %s3035_s7 = sld [smem:[#allocation2 + %s1096_s18]]  ;;  %v1106_v18 = vstv %s2998_s6  ;;  %s537_s22 = sadd.s32 %s1964_s17, %s2548_s0  ;;  %v1043_v41 = vsub.f32 0.0, %v1041_v26  ;;  %v3066_v47 = vmul.f32 %v2227_v36, %v1391_v63 }
  0x9b   : > { %v758_v13 = vmul.f32 1.442695, %v757_v27  ;;  %v1108_v6 = vstv %s3008_s28  ;;  %s3041_s20 = sld [smem:[#allocation2 + %s537_s22]]  ;;  %s1966_s25 = sadd.s32 1152, %s2546_s29  ;;  %v1107_v24 = vsub.f32 %v2940_v7, %v1106_v18  ;;  %v860_v52 = vsub.f32 1.0, %v859_v43  ;;  %v3085_v27 = vpop.eup %2230 }
  0x9c   : > { %v390_v20 = vmul.f32 %v389_v16, %v389_v16  ;;  %v1109_v23 = vsub.f32 %v2931_v5, %v1108_v6  ;;  %s541_s6 = sadd.s32 %s1966_s25, %s2548_s0  ;;  %s1968_s12 = sadd.s32 1280, %s2546_s29  ;;  %v3074_v31 = vsel %vm1042_vm4, %v1041_v26, %v1043_v41  ;;  %v1393_v61 = vmul.f32 1.0614054, %v3066_v47 }
  0x9d   : > { %2232 = vpow2.f32 %v758_v13  ;;  %s3050_s28 = sld [smem:[#allocation2 + %s541_s6]]  ;;  %s545_s14 = sadd.s32 %s1968_s12, %s2548_s0  ;;  %v1114_v51 = vstv %s3019_s3  ;;  %v862_v11 = vsub.f32 0.0, %v860_v52  ;;  %v1210_v12 = vsub.f32 2.0, %v1209_v25 }
  0x9e   : > { %v392_v28 = vmul.f32 %v391_v57, %v390_v20  ;;  %v1110_v30 = vstv %s3027_s30  ;;  %v1116_v34 = vmul.f32 %v1109_v23, %v1109_v23  ;;  %s3056_s2 = sld [smem:[#allocation2 + %s545_s14]]  ;;  %s1970_s18 = sadd.s32 1408, %s2546_s29  ;;  %v1889_v46 = vadd.f32 -1.4531521, %v1393_v61 }
  0x9f   : > { %v1111_v33 = vmul.f32 %v1110_v30, %v1109_v23  ;;  %s549_s17 = sadd.s32 %s1970_s18, %s2548_s0  ;;  %s1972_s22 = sadd.s32 1536, %s2546_s29  ;;  %v1571_v39 = vmul.f32 %v3085_v27, %v3022_v55  ;;  %v3113_v20 = vsel %vm861_vm5, %v860_v52, %v862_v11  ;;  %v3116_v38 = vmul.f32 %v2229_v15, %v1210_v12 }
  0xa0   : > { %v396_v60 = vadd.f32 %v395_v19, %v392_v28  ;;  %v1117_v44 = vstv %s3035_s7  ;;  %s3063_s30 = sld [smem:[#allocation2 + %s549_s17]]  ;;  %s553_s25 = sadd.s32 %s1972_s22, %s2548_s0  ;;  %v1395_v23 = vmul.f32 %v1889_v46, %v3066_v47 }
  0xa1   : > { %v1112_v49 = vadd.f32 %v1111_v33, %v1107_v24  ;;  %s3068_s6 = sld [smem:[#allocation2 + %s553_s25]]  ;;  %v563_v2 = vstv %s3041_s20  ;;  %s2104_s12 = sadd.s32 1024, %s2786_s21  ;;  %v1118_v29 = vmul.f32 %v1117_v44, %v1116_v34  ;;  %v1212_v30 = vmul.f32 1.0614054, %v3116_v38 }
  0xa2   : > { %v397_v4 = vmul.f32 1.442695, %v396_v60  ;;  %s1442_s7 = sadd.s32 %s2104_s12, %s2789_s24  ;;  %s2106_s14 = sadd.s32 1152, %s2786_s21  ;;  %v564_v62 = vsub.f32 %v2940_v7, %v563_v2  ;;  %v1396_v58 = vadd.f32 1.4214138, %v1395_v23  ;;  %v1572_v60 = vsub.f32 2.0, %v1571_v39 }
  0xa3   : > { %v1113_v53 = vmul.f32 %v1112_v49, %v1112_v49  ;;  %v565_v54 = vstv %s3050_s28  ;;  %s3080_s18 = sld [smem:[#allocation2 + %s1442_s7]]  ;;  %s1446_s17 = sadd.s32 %s2106_s14, %s2789_s24  ;;  %v1872_v15 = vadd.f32 -1.4531521, %v1212_v30 }
  0xa4   : > { %2234 = vpow2.f32 %v397_v4  ;;  %v566_v9 = vsub.f32 %v2931_v5, %v565_v54  ;;  %s3089_s3 = sld [smem:[#allocation2 + %s1446_s17]]  ;;  %s2108_s20 = sadd.s32 1280, %s2786_s21  ;;  %v571_v40 = vstv %s3056_s2  ;;  %v1397_v43 = vmul.f32 %v1396_v58, %v3066_v47 }
  0xa5   : > { %v1115_v57 = vmul.f32 %v1114_v51, %v1113_v53  ;;  %s1450_s28 = sadd.s32 %s2108_s20, %s2789_s24  ;;  %s2110_s22 = sadd.s32 1408, %s2786_s21  ;;  %v1214_v52 = vmul.f32 %v1872_v15, %v3116_v38  ;;  %v3146_v53 = vmul.f32 %v3085_v27, %v1572_v60 }
  0xa6   : > { %v567_v16 = vstv %s3063_s30  ;;  %v573_v18 = vmul.f32 %v566_v9, %v566_v9  ;;  %s3098_s25 = sld [smem:[#allocation2 + %s1450_s28]]  ;;  %s1454_s12 = sadd.s32 %s2110_s22, %s2789_s24 }
  0xa7   : > { %v3095_v13 = vpop.eup %2232  ;;  %v1119_v19 = vadd.f32 %v1118_v29, %v1115_v57  ;;  %v568_v6 = vmul.f32 %v567_v16, %v566_v9  ;;  %s3103_s7 = sld [smem:[#allocation2 + %s1454_s12]]  ;;  %s2112_s14 = sadd.s32 1536, %s2786_s21  ;;  %v574_v14 = vstv %s3068_s6  ;;  %v1890_v29 = vadd.f32 -0.28449672, %v1397_v43 }
  0xa8   : > { %4057 = vst [vmem:[#allocation38_spill] sm:$0xff] %v3095_v13  ;;  %v760_v36 = vsel %vm323_vm0, %v3095_v13, 0.0  ;;  %s1458_s30 = sadd.s32 %s2112_s14, %s2789_s24  ;;  %s2020_s17 = sadd.s32 1024, %s2630_s16  ;;  %v575_v63 = vmul.f32 %v574_v14, %v573_v18  ;;  %v1215_v12 = vadd.f32 1.4214138, %v1214_v52 }
  0xa9   : > { %761 = vadd.xlane.f32.xlu0 %v760_v36  ;;  %v1120_v24 = vmul.f32 1.442695, %v1119_v19  ;;  %v569_v26 = vadd.f32 %v568_v6, %v564_v62  ;;  %s3118_s20 = sld [smem:[#allocation2 + %s1458_s30]]  ;;  %v1468_v55 = vstv %s3080_s18  ;;  %s899_s28 = sadd.s32 %s2020_s17, %s2632_s13  ;;  %v1399_v27 = vmul.f32 %v1890_v29, %v3066_v47 }
  0xaa   : > { %v1470_v28 = vstv %s3089_s3  ;;  %s3124_s6 = sld [smem:[#allocation2 + %s899_s28]]  ;;  %s2022_s22 = sadd.s32 1152, %s2630_s16  ;;  %v1469_v41 = vsub.f32 %v2940_v7, %v1468_v55  ;;  %v1574_v19 = vmul.f32 1.0614054, %v3146_v53  ;;  %v1216_v39 = vmul.f32 %v1215_v12, %v3116_v38 }
  0xab   : > { %2236 = vpow2.f32 %v1120_v24  ;;  %v570_v34 = vmul.f32 %v569_v26, %v569_v26  ;;  %v1471_v33 = vsub.f32 %v2931_v5, %v1470_v28  ;;  %s903_s12 = sadd.s32 %s2022_s22, %s2632_s13  ;;  %s2024_s18 = sadd.s32 1280, %s2630_s16  ;;  %v1400_v36 = vadd.f32 0.2548296, %v1399_v27 }
  0xac   : > { %s3132_s2 = sld [smem:[#allocation2 + %s903_s12]]  ;;  %s907_s3 = sadd.s32 %s2024_s18, %s2632_s13  ;;  %v1476_v9 = vstv %s3098_s25  ;;  %v1906_v26 = vadd.f32 -1.4531521, %v1574_v19  ;;  %v1873_v58 = vadd.f32 -0.28449672, %v1216_v39  ;;  %v321_v39 = vadd.f32 1.0, %v2833_v42 }
  0xad   : > { %v572_v44 = vmul.f32 %v571_v40, %v570_v34  ;;  %v1472_v49 = vstv %s3103_s7  ;;  %v1478_v2 = vmul.f32 %v1471_v33, %v1471_v33  ;;  %s3137_s14 = sld [smem:[#allocation2 + %s907_s3]]  ;;  %s2026_s30 = sadd.s32 1408, %s2630_s16  ;;  %v1401_v24 = vmul.f32 %v1400_v36, %v3066_v47 }
  0xae   : > { %v3140_v4 = vpop.eup %2234  ;;  %v1473_v51 = vmul.f32 %v1472_v49, %v1471_v33  ;;  %s911_s17 = sadd.s32 %s2026_s30, %s2632_s13  ;;  %s2028_s28 = sadd.s32 1536, %s2630_s16  ;;  %v1576_v43 = vmul.f32 %v1906_v26, %v3146_v53 }
  0xaf   : > { %v399_v54 = vsel %vm323_vm0, %v3140_v4, 0.0  ;;  %v576_v61 = vadd.f32 %v575_v63, %v572_v44  ;;  %v1479_v25 = vstv %s3118_s20  ;;  %s3151_s7 = sld [smem:[#allocation2 + %s911_s17]]  ;;  %s915_s22 = sadd.s32 %s2028_s28, %s2632_s13  ;;  %v1402_v47 = vmul.f32 %v2946_v56, %v1401_v24 }
  0xb0   : > { %400 = vadd.xlane.f32.xlu1 %v399_v54  ;;  %v1474_v62 = vadd.f32 %v1473_v51, %v1469_v41  ;;  %s3155_s12 = sld [smem:[#allocation2 + %s915_s22]]  ;;  %s2076_s18 = sadd.s32 1024, %s2735_s15  ;;  %v1480_v11 = vmul.f32 %v1479_v25, %v1478_v2  ;;  %v925_v46 = vstv %s3124_s6  ;;  %v1218_v41 = vmul.f32 %v1873_v58, %v3116_v38 }
  0xb1   : > { %v577_v57 = vmul.f32 1.442695, %v576_v61  ;;  %s1261_s3 = sadd.s32 %s2076_s18, %s2737_s10  ;;  %s2078_s20 = sadd.s32 1152, %s2735_s15  ;;  %v926_v23 = vsub.f32 %v2940_v7, %v925_v46  ;;  %v1403_v56 = vsub.f32 1.0, %v1402_v47  ;;  %v1577_v61 = vadd.f32 1.4214138, %v1576_v43 }
  0xb2   : > { %v1475_v16 = vmul.f32 %v1474_v62, %v1474_v62  ;;  %v927_v18 = vstv %s3132_s2  ;;  %s3163_s30 = sld [smem:[#allocation2 + %s1261_s3]]  ;;  %s1265_s25 = sadd.s32 %s2078_s20, %s2737_s10  ;;  %v1219_v29 = vadd.f32 0.2548296, %v1218_v41 }
  0xb3   : > { %2238 = vpow2.f32 %v577_v57  ;;  %v928_v6 = vsub.f32 %v2931_v5, %v927_v18  ;;  %s3168_s17 = sld [smem:[#allocation2 + %s1265_s25]]  ;;  %s2080_s6 = sadd.s32 1280, %s2735_s15  ;;  %v933_v44 = vstv %s3137_s14  ;;  %v1405_v62 = vsub.f32 0.0, %v1403_v56 }
  0xb4   : > { %v1477_v14 = vmul.f32 %v1476_v9, %v1475_v16  ;;  %s1269_s2 = sadd.s32 %s2080_s6, %s2737_s10  ;;  %s2082_s28 = sadd.s32 1408, %s2735_s15  ;;  %v1220_v9 = vmul.f32 %v1219_v29, %v3116_v38  ;;  %v864_v29 = vadd.f32 1.0, %v3113_v20 }
  0xb5   : > { %v3176_v55 = vpop.eup %2236  ;;  %v929_v40 = vstv %s3151_s7  ;;  %v935_v28 = vmul.f32 %v928_v6, %v928_v6  ;;  %s3179_s22 = sld [smem:[#allocation2 + %s1269_s2]]  ;;  %s1273_s18 = sadd.s32 %s2082_s28, %s2737_s10  ;;  %v3218_v18 = vsel %vm1404_vm6, %v1403_v56, %v1405_v62 }
  0xb6   : > { %4058 = vst [vmem:[#allocation39_spill] sm:$0xff] %v3176_v55  ;;  %v1122_v30 = vsel %vm323_vm0, %v3176_v55, 0.0  ;;  %v1481_v34 = vadd.f32 %v1480_v11, %v1477_v14  ;;  %v930_v63 = vmul.f32 %v929_v40, %v928_v6  ;;  %v936_v33 = vstv %s3155_s12  ;;  %s3185_s3 = sld [smem:[#allocation2 + %s1273_s18]]  ;;  %s2084_s20 = sadd.s32 1536, %s2735_s15 }
  0xb7   : > { %1123 = vadd.xlane.f32.xlu0 %v1122_v30  ;;  %s1277_s7 = sadd.s32 %s2084_s20, %s2737_s10  ;;  %s2132_s25 = sadd.s32 1024, %s2846_s19  ;;  %v937_v2 = vmul.f32 %v936_v33, %v935_v28  ;;  %v1578_v11 = vmul.f32 %v1577_v61, %v3146_v53  ;;  %v1221_v38 = vmul.f32 %v2885_v21, %v1220_v9  ;;  %v3236_v30 = vmul.f32 0.5, %v321_v39 }
  0xb8   : > { %v1482_v15 = vmul.f32 1.442695, %v1481_v34  ;;  %v931_v60 = vadd.f32 %v930_v63, %v926_v23  ;;  %s3195_s12 = sld [smem:[#allocation2 + %s1277_s7]]  ;;  %v1287_v49 = vstv %s3163_s30  ;;  %s1623_s6 = sadd.s32 %s2132_s25, %s2848_s8  ;;  %v502_v34 = vadd.f32 1.0, %v2963_v10 }
  0xb9   : > { %v1289_v51 = vstv %s3168_s17  ;;  %s3200_s2 = sld [smem:[#allocation2 + %s1623_s6]]  ;;  %s2134_s28 = sadd.s32 1152, %s2846_s19  ;;  %v1288_v25 = vsub.f32 %v2940_v7, %v1287_v49  ;;  %v1222_v14 = vsub.f32 1.0, %v1221_v38  ;;  %v1907_v26 = vadd.f32 -0.28449672, %v1578_v11 }
  0xba   : > { %2240 = vpow2.f32 %v1482_v15  ;;  %v932_v52 = vmul.f32 %v931_v60, %v931_v60  ;;  %v1290_v54 = vsub.f32 %v2931_v5, %v1289_v51  ;;  %s1627_s18 = sadd.s32 %s2134_s28, %s2848_s8  ;;  %s2136_s14 = sadd.s32 1280, %s2846_s19 }
  0xbb   : > { %s3208_s30 = sld [smem:[#allocation2 + %s1627_s18]]  ;;  %s1631_s17 = sadd.s32 %s2136_s14, %s2848_s8  ;;  %v1295_v23 = vstv %s3179_s22  ;;  %v1224_v58 = vsub.f32 0.0, %v1222_v14  ;;  %v1580_v43 = vmul.f32 %v1907_v26, %v3146_v53 }
  0xbc   : > { %v934_v27 = vmul.f32 %v933_v44, %v932_v52  ;;  %v1291_v57 = vstv %s3185_s3  ;;  %s2138_s20 = sadd.s32 1408, %s2846_s19  ;;  %v1297_v16 = vmul.f32 %v1290_v54, %v1290_v54  ;;  %s2140_s25 = sadd.s32 1536, %s2846_s19 }
  0xbd   : > { %v3214_v46 = vpop.eup %2238  ;;  %v1292_v12 = vmul.f32 %v1291_v57, %v1290_v54  ;;  %s1635_s7 = sadd.s32 %s2138_s20, %s2848_s8  ;;  %s1639_s6 = sadd.s32 %s2140_s25, %s2848_s8  ;;  %v1225_v47 = vsel %vm1223_vm7, %v1222_v14, %v1224_v58  ;;  %v1581_v51 = vadd.f32 0.2548296, %v1580_v43  ;;  %v3259_v57 = vmul.f32 0.5, %v864_v29 }
  0xbe   : > { %4059 = vst [vmem:[#allocation40_spill] sm:$0xff] %v3214_v46  ;;  %v579_v36 = vsel %vm323_vm0, %v3214_v46, 0.0  ;;  %v938_v19 = vadd.f32 %v937_v2, %v934_v27  ;;  %v1298_v6 = vstv %s3195_s12  ;;  %s1636_s3 = sld [smem:[#allocation2 + %s1635_s7]]  ;;  %v1226_v11 = vadd.f32 1.0, %v1225_v47  ;;  %s1930_s22 = sadd.s32 640, %s2514_s11 }
  0xbf   : > { %580 = vadd.xlane.f32.xlu1 %v579_v36  ;;  %v1293_v35 = vadd.f32 %v1292_v12, %v1288_v25  ;;  %s3229_s28 = sld [smem:[#allocation2 + %s1639_s6]]  ;;  %v1649_v24 = vstv %s3200_s2  ;;  %v1299_v28 = vmul.f32 %v1298_v6, %v1297_v16  ;;  %v1582_v61 = vmul.f32 %v1581_v51, %v3146_v53  ;;  %4062 = vst [vmem:[#allocation43_spill] sm:$0xff] %v3259_v57  ;;  %s1958_s12 = sadd.s32 640, %s2546_s29 }
  0xc0   : > { %v939_v21 = vmul.f32 1.442695, %v938_v19  ;;  %s3232_s18 = sld [smem:[#allocation2 + %s1631_s17]]  ;;  %v1650_v41 = vsub.f32 %v2940_v7, %v1649_v24  ;;  %v3251_v7 = vmul.f32 0.5, %v502_v34  ;;  %v683_v36 = vadd.f32 1.0, %v2981_v22  ;;  %s1986_s2 = sadd.s32 640, %s2584_s1 }
  0xc1   : > { %v1294_v40 = vmul.f32 %v1293_v35, %v1293_v35  ;;  %v1651_v42 = vstv %s3208_s30  ;;  %v1583_v9 = vmul.f32 %v3004_v48, %v1582_v61  ;;  %v876_v19 = vsel %vm323_vm0, %v3259_v57, 0.0  ;;  %s274_s14 = sadd.s32 %s1930_s22, %s2517_s9  ;;  %s455_s30 = sadd.s32 %s1958_s12, %s2548_s0 }
  0xc2   : > { %2242 = vpow2.f32 %v939_v21  ;;  %v1652_v63 = vsub.f32 %v2931_v5, %v1651_v42  ;;  %v334_v5 = vsel %vm323_vm0, %v3236_v30, 0.0  ;;  %4061 = vst [vmem:[#allocation42_spill] sm:$0xff] %v3251_v7  ;;  %v514_v27 = vsel %vm323_vm0, %v3251_v7, 0.0  ;;  %s636_s17 = sadd.s32 %s1986_s2, %s2587_s23  ;;  %s3305_s20 = sld [smem:[#allocation2 + %s274_s14]] }
  0xc3   : > { %v1296_v33 = vmul.f32 %v1295_v23, %v1294_v40  ;;  %v1584_v20 = vsub.f32 1.0, %v1583_v9  ;;  %v3269_v6 = vmul.f32 0.5, %v1226_v11  ;;  %v3271_v21 = vmul.f32 0.5, %v683_v36  ;;  %s2014_s7 = sadd.s32 640, %s2630_s16  ;;  %s3308_s25 = sld [smem:[#allocation2 + %s455_s30]] }
  0xc4   : > { %v3244_v15 = vpop.eup %2240  ;;  %v1653_v60 = vstv %s1636_s3  ;;  %v1659_v10 = vmul.f32 %v1652_v63, %v1652_v63  ;;  %v1045_v23 = vadd.f32 1.0, %v3074_v31  ;;  %v1407_v31 = vadd.f32 1.0, %v3218_v18  ;;  %s2042_s3 = sadd.s32 640, %s2678_s27  ;;  %s3312_s6 = sld [smem:[#allocation2 + %s636_s17]] }
  0xc5   : > { %4060 = vst [vmem:[#allocation41_spill] sm:$0xff] %v3244_v15  ;;  %v1484_v44 = vsel %vm323_vm0, %v3244_v15, 0.0  ;;  %v1300_v49 = vadd.f32 %v1299_v28, %v1296_v33  ;;  %v1654_v2 = vmul.f32 %v1653_v60, %v1652_v63  ;;  %v1660_v59 = vstv %s3229_s28  ;;  %4064 = vst [vmem:[#allocation45_spill] sm:$0xff] %v3269_v6  ;;  %s2070_s28 = sadd.s32 640, %s2735_s15  ;;  %s2098_s22 = sadd.s32 640, %s2786_s21 }
  0xc6   : > { %1485 = vadd.xlane.f32.xlu0 %v1484_v44  ;;  %v1657_v54 = vstv %s3232_s18  ;;  %v1661_v62 = vmul.f32 %v1660_v59, %v1659_v10  ;;  %v1586_v48 = vsub.f32 0.0, %v1584_v20  ;;  %4065 = vst [vmem:[#allocation46_spill] sm:$0xff] %v3271_v21  ;;  %v1238_v17 = vsel %vm323_vm0, %v3269_v6, 0.0  ;;  %s817_s18 = sadd.s32 %s2014_s7, %s2632_s13  ;;  %s998_s12 = sadd.s32 %s2042_s3, %s2681_s26 }
  0xc7   : > { %v1301_v56 = vmul.f32 1.442695, %v1300_v49  ;;  %v1655_v52 = vadd.f32 %v1654_v2, %v1650_v41  ;;  %v695_v40 = vsel %vm323_vm0, %v3271_v21, 0.0  ;;  %v3284_v28 = vmul.f32 0.5, %v1045_v23  ;;  %s2126_s2 = sadd.s32 640, %s2846_s19  ;;  %s1179_s14 = sadd.s32 %s2070_s28, %s2737_s10 }
  0xc8   : > { %v1587_v39 = vsel %vm1585_vm8, %v1584_v20, %v1586_v48  ;;  %v3291_v34 = vmul.f32 0.5, %v1407_v31  ;;  %s2002_s30 = sadd.s32 1664, %s2584_s1  ;;  %s3321_s4 = sld [smem:[#allocation2 + %s817_s18]] }
  0xc9   : > { %2244 = vpow2.f32 %v1301_v56  ;;  %v1656_v25 = vmul.f32 %v1655_v52, %v1655_v52  ;;  %v1588_v14 = vadd.f32 1.0, %v1587_v39  ;;  %4068 = vst [vmem:[#allocation49_spill] sm:$0xff] %v3284_v28  ;;  %v1057_v42 = vsel %vm323_vm0, %v3284_v28, 0.0  ;;  %s1360_s5 = sadd.s32 %s2098_s22, %s2789_s24  ;;  %s3324_s17 = sld [smem:[#allocation2 + %s998_s12]] }
  0xca   : > { %335 = vadd.xlane.f32.xlu0 %v334_v5  ;;  %4069 = vst [vmem:[#allocation50_spill] sm:$0xff] %v3291_v34  ;;  %v1419_v18 = vsel %vm323_vm0, %v3291_v34, 0.0  ;;  %4071 = sst [smem:[#allocation52_spill]] %s3312_s6  ;;  %s1541_s6 = sadd.s32 %s2126_s2, %s2848_s8 }
  0xcb   : > { %v1658_v12 = vmul.f32 %v1657_v54, %v1656_v25  ;;  %v3278_v22 = vmul.f32 0.5, %v1588_v14  ;;  %s3327_s7 = sld [smem:[#allocation2 + %s1179_s14]]  ;;  %s738_s3 = sadd.s32 %s2002_s30, %s2587_s23 }
  0xcc   : > { %v3261_v16 = vpop.eup %2242  ;;  %s3330_s28 = sld [smem:[#allocation2 + %s1360_s5]]  ;;  %s2004_s19 = sadd.s32 1792, %s2584_s1 }
  0xcd   : > { %4063 = vst [vmem:[#allocation44_spill] sm:$0xff] %v3261_v16  ;;  %v941_v38 = vsel %vm323_vm0, %v3261_v16, 0.0  ;;  %v1662_v53 = vadd.f32 %v1661_v62, %v1658_v12  ;;  %4067 = vst [vmem:[#allocation48_spill] sm:$0xff] %v3278_v22  ;;  %v1600_v58 = vsel %vm323_vm0, %v3278_v22, 0.0  ;;  %s3333_s18 = sld [smem:[#allocation2 + %s1541_s6]]  ;;  %s1946_s22 = sadd.s32 1664, %s2514_s11 }
  0xce   : > { %942 = vadd.xlane.f32.xlu1 %v941_v38  ;;  %515 = vadd.xlane.f32.xlu0 %v514_v27  ;;  %4072 = sst [smem:[#allocation53_spill]] %s3321_s4  ;;  %s742_s2 = sadd.s32 %s2004_s19, %s2587_s23 }
  0xcf   : > { %v1663_v35 = vmul.f32 1.442695, %v1662_v53  ;;  %4073 = sst [smem:[#allocation54_spill]] %s3324_s17  ;;  %s1948_s17 = sadd.s32 1792, %s2514_s11 }
  0xd0   : > { %s3336_s12 = sld [smem:[#allocation2 + %s738_s3]]  ;;  %s2058_s8 = sadd.s32 1664, %s2678_s27 }
  0xd1   : > { %2246 = vpow2.f32 %v1663_v35  ;;  %4074 = sst [smem:[#allocation55_spill]] %s3327_s7  ;;  %s377_s14 = sadd.s32 %s1946_s22, %s2517_s9 }
  0xd2   : > { %877 = vadd.xlane.f32.xlu0 %v876_v19  ;;  %4075 = sst [smem:[#allocation56_spill]] %s3330_s28  ;;  %s2060_s30 = sadd.s32 1792, %s2678_s27 }
  0xd3   : > { %v3274_v24 = vpop.eup %2244  ;;  %4076 = sst [smem:[#allocation57_spill]] %s3333_s18  ;;  %s381_s5 = sadd.s32 %s1948_s17, %s2517_s9 }
  0xd4   : > { %4066 = vst [vmem:[#allocation47_spill] sm:$0xff] %v3274_v24  ;;  %v1303_v26 = vsel %vm323_vm0, %v3274_v24, 0.0  ;;  %s1974_s1 = sadd.s32 1664, %s2546_s29  ;;  %s3346_s6 = sld [smem:[#allocation2 + %s742_s2]] }
  0xd5   : > { %1304 = vadd.xlane.f32.xlu1 %v1303_v26  ;;  %s1100_s3 = sadd.s32 %s2058_s8, %s2681_s26  ;;  %s3349_s18 = sld [smem:[#allocation2 + %s377_s14]]  ;;  %v345_v26 = vstv %s3305_s20 }
  0xd6   : > { %1239 = vadd.xlane.f32.xlu0 %v1238_v17  ;;  %s1104_s19 = sadd.s32 %s2060_s30, %s2681_s26  ;;  %s3352_s23 = sld [smem:[#allocation2 + %s381_s5]] }
  0xd7   : > { %s557_s22 = sadd.s32 %s1974_s1, %s2548_s0  ;;  %s3355_s17 = sld [smem:[#allocation2 + %s1100_s3]] }
  0xd8   : > { %s1976_s27 = sadd.s32 1792, %s2546_s29  ;;  %s3358_s2 = sld [smem:[#allocation2 + %s1104_s19]] }
  0xd9   : > { %696 = vadd.xlane.f32.xlu1 %v695_v40  ;;  %s2114_s8 = sadd.s32 1664, %s2786_s21  ;;  %s3361_s14 = sld [smem:[#allocation2 + %s557_s22]] }
  0xda   : > { %1601 = vadd.xlane.f32.xlu0 %v1600_v58  ;;  %s2116_s30 = sadd.s32 1792, %s2786_s21  ;;  %s561_s1 = sadd.s32 %s1976_s27, %s2548_s0 }
  0xdb   : > { %v3295_v63 = vpop.eup %2246  ;;  %s2032_s5 = sadd.s32 1792, %s2630_s16  ;;  %s1462_s3 = sadd.s32 %s2114_s8, %s2789_s24 }
  0xdc   : > { %4070 = vst [vmem:[#allocation51_spill] sm:$0xff] %v3295_v63  ;;  %v1665_v33 = vsel %vm323_vm0, %v3295_v63, 0.0  ;;  %s2030_s26 = sadd.s32 1664, %s2630_s16  ;;  %s1466_s19 = sadd.s32 %s2116_s30, %s2789_s24 }
  0xdd   : > { %1058 = vadd.xlane.f32.xlu1 %v1057_v42  ;;  %s2088_s22 = sadd.s32 1792, %s2735_s15  ;;  %s3373_s21 = sld [smem:[#allocation2 + %s561_s1]]  ;;  %v4102_v3 = vstv %s3355_s17 }
  0xde   : > { %s923_s9 = sadd.s32 %s2032_s5, %s2632_s13  ;;  %s919_s27 = sadd.s32 %s2030_s26, %s2632_s13 }
  0xdf   : > { %s2086_s8 = sadd.s32 1664, %s2735_s15  ;;  %s3381_s24 = sld [smem:[#allocation2 + %s1466_s19]] }
  0xe0   : > { %s1285_s1 = sadd.s32 %s2088_s22, %s2737_s10  ;;  %s3387_s5 = sld [smem:[#allocation2 + %s923_s9]] }
  0xe1   : > { %1420 = vadd.xlane.f32.xlu1 %v1419_v18  ;;  %s3390_s15 = sld [smem:[#allocation2 + %s1462_s3]]  ;;  %s1281_s13 = sadd.s32 %s2086_s8, %s2737_s10 }
  0xe2   : > { %s3397_s9 = sld [smem:[#allocation2 + %s919_s27]]  ;;  %s1960_s28 = sadd.s32 768, %s2546_s29 }
  0xe3   : > { %v326_v47 = vpop.xlane.xlu0 %325  ;;  %s3399_s19 = sld [smem:[#allocation2 + %s1285_s1]]  ;;  %s4083_s3 = smul.f32 %s3346_s6, %s3336_s12 }
  0xe4   : > { %v327_v41 = vsel %vm323_vm0, %v326_v47, 0.0  ;;  %s4080_s8 = sld [smem:[#allocation20_spill]]  ;;  %s4081_s22 = sld [smem:[#allocation17_spill]] }
  0xe5   : > { %1666 = vadd.xlane.f32.xlu1 %v1665_v33  ;;  %v328_v60 = vrot.slane %v327_v41, 4  ;;  %s3408_s16 = sld [smem:[#allocation2 + %s1281_s13]]  ;;  %s1932_s13 = sadd.s32 768, %s2514_s11 }
  0xe6   : > { %s4082_s26 = sld [smem:[#allocation21_spill]]  ;;  %s4084_s7 = sld [smem:[#allocation25_spill]] }
  0xe7   : > { %v329_v2 = vadd.f32 %v328_v60, %v327_v41  ;;  %s4085_s4 = smul.f32 %s3352_s23, %s3349_s18  ;;  %s459_s29 = sadd.s32 %s1960_s28, %s2548_s0 }
  0xe8   : > { %s4086_s6 = sld [smem:[#allocation22_spill]] }
  0xe9   : > { %v330_v10 = vrot.slane %v329_v2, 2  ;;  %s4098_s20 = sld [smem:[#allocation34_spill]] }
  0xea   : > { %s1988_s27 = sadd.s32 768, %s4080_s8  ;;  %s278_s1 = sadd.s32 %s1932_s13, %s4081_s22 }
  0xeb   : > { %v331_v56 = vadd.f32 %v330_v10, %v329_v2  ;;  %s3452_s23 = sld [smem:[#allocation2 + %s278_s1]]  ;;  %s4089_s8 = smul.f32 %s3373_s21, %s3361_s14 }
  0xec   : > { %v506_v43 = vpop.xlane.xlu1 %505  ;;  %s640_s30 = sadd.s32 %s1988_s27, %s4082_s26  ;;  %s1934_s27 = sadd.s32 896, %s2514_s11 }
  0xed   : > { %v507_v51 = vsel %vm323_vm0, %v506_v43, 0.0  ;;  %v332_v61 = vrot.slane %v331_v56, 1  ;;  %s2044_s13 = sadd.s32 768, %s4084_s7  ;;  %s3454_s28 = sld [smem:[#allocation2 + %s640_s30]] }
  0xee   : > { %v508_v29 = vrot.slane %v507_v51, 4  ;;  %s3462_s11 = sld [smem:[#allocation2 + %s459_s29]]  ;;  %s282_s30 = sadd.s32 %s1934_s27, %s4081_s22 }
  0xef   : > { %v3376_v12 = vadd.f32 %v332_v61, %v331_v56  ;;  %s4091_s7 = sld [smem:[#allocation23_spill]]  ;;  %s4092_s21 = sld [smem:[#allocation31_spill]] }
  0xf0   : > { %v509_v62 = vadd.f32 %v508_v29, %v507_v51  ;;  %s4094_s27 = smul.f32 %s3387_s5, %s3397_s9  ;;  %s4096_s26 = sld [smem:[#allocation33_spill]] }
  0xf1   : > { %v344_v40 = vadd.f32 0.0001, %v3376_v12  ;;  %s4097_s0 = smul.f32 %s3399_s19, %s3408_s16 }
  0xf2   : > { %v510_v53 = vrot.slane %v509_v62, 2 }
  0xf3   : > { %2248 = vrcp.f32 %v344_v40 }
  0xf4   : > { %v511_v42 = vadd.f32 %v510_v53, %v509_v62  ;;  %v3428_v53 = vstv %s4083_s3  ;;  %s4087_s3 = smul.f32 %s3358_s2, %s3355_s17  ;;  %s4090_s2 = sld [smem:[#allocation30_spill]] }
  0xf5   : > { %v687_v44 = vpop.xlane.xlu0 %686  ;;  %s4107_s17 = sld [smem:[#allocation18_spill]] }
  0xf6   : > { %v688_v25 = vsel %vm323_vm0, %v687_v44, 0.0  ;;  %v3447_v40 = vstv %s4087_s3  ;;  %s2016_s3 = sadd.s32 768, %s4086_s6  ;;  %s2142_s5 = sadd.s32 1664, %s4096_s26 }
  0xf7   : > { %v689_v11 = vrot.slane %v688_v25, 4  ;;  %s821_s22 = sadd.s32 %s2016_s3, %s4091_s7 }
  0xf9   : > { %v690_v35 = vadd.f32 %v689_v11, %v688_v25 }
  0xfa   : > { %s2100_s29 = sadd.s32 768, %s4090_s2  ;;  %s4095_s2 = sld [smem:[#allocation28_spill]] }
  0xfb   : > { %s1364_s3 = sadd.s32 %s2100_s29, %s4092_s21 }
  0xfc   : > { %s3514_s19 = sld [smem:[#allocation2 + %s1364_s3]] }
  0xff   : > { %v868_v49 = vpop.xlane.xlu1 %867 }
 0x100   : > { %v869_v9 = vsel %vm323_vm0, %v868_v49, 0.0  ;;  %v691_v49 = vrot.slane %v690_v35, 2 }
 0x101   : > { %v870_v36 = vrot.slane %v869_v9, 4 }
 0x103   : > { %v871_v18 = vadd.f32 %v870_v36, %v869_v9  ;;  %v410_v36 = vstv %s3349_s18  ;;  %s2128_s18 = sadd.s32 768, %s4096_s26 }
 0x105   : > { %v872_v61 = vrot.slane %v871_v18, 2 }
 0x108   : > { %v1049_v5 = vpop.xlane.xlu0 %1048 }
 0x109   : > { %v1050_v27 = vsel %vm323_vm0, %v1049_v5, 0.0 }
 0x10a   : > { %v1051_v48 = vrot.slane %v1050_v27, 4 }
 0x10c   : > { %v1052_v33 = vadd.f32 %v1051_v48, %v1050_v27 }
 0x10e   : > { %v1053_v25 = vrot.slane %v1052_v33, 2 }
 0x112   : > { %v1230_v59 = vpop.xlane.xlu1 %1229 }
 0x113   : > { %v1231_v20 = vsel %vm323_vm0, %v1230_v59, 0.0 }
 0x114   : > { %v1232_v14 = vrot.slane %v1231_v20, 4 }
 0x116   : > { %v1233_v10 = vadd.f32 %v1232_v14, %v1231_v20  ;;  %v692_v20 = vadd.f32 %v691_v49, %v690_v35 }
 0x11b   : > { %v1411_v52 = vpop.xlane.xlu0 %1410 }
 0x11c   : > { %v1412_v47 = vsel %vm323_vm0, %v1411_v52, 0.0  ;;  %v512_v52 = vrot.slane %v511_v42, 1 }
 0x11d   : > { %v1413_v51 = vrot.slane %v1412_v47, 4 }
 0x11e   : > { %v3442_v35 = vadd.f32 %v512_v52, %v511_v42  ;;  %v693_v42 = vrot.slane %v692_v20, 1 }
 0x11f   : > { %v1414_v48 = vadd.f32 %v1413_v51, %v1412_v47 }
 0x120   : > { %v3473_v2 = vadd.f32 %v693_v42, %v692_v20 }
 0x125   : > { %v1592_v54 = vpop.xlane.xlu1 %1591 }
 0x126   : > { %v1593_v5 = vsel %vm323_vm0, %v1592_v54, 0.0 }
 0x127   : > { %v1594_v62 = vrot.slane %v1593_v5, 4 }
 0x129   : > { %v1595_v47 = vadd.f32 %v1594_v62, %v1593_v5  ;;  %v1415_v5 = vrot.slane %v1414_v48, 2 }
 0x136   : > { %v762_v38 = vpop.xlane.xlu0 %761 }
 0x137   : > { %v763_v23 = vsel %vm323_vm0, %v762_v38, 0.0  ;;  %v1234_v38 = vrot.slane %v1233_v10, 2 }
 0x138   : > { %v764_v60 = vrot.slane %v763_v23, 4 }
 0x13a   : > { %v765_v27 = vadd.f32 %v764_v60, %v763_v23  ;;  %v873_v23 = vadd.f32 %v872_v61, %v871_v18  ;;  %v1235_v18 = vadd.f32 %v1234_v38, %v1233_v10  ;;  %v524_v10 = vadd.f32 0.0001, %v3442_v35 }
 0x13c   : > { %v766_v60 = vrot.slane %v765_v27, 2  ;;  %v874_v62 = vrot.slane %v873_v23, 1  ;;  %v1236_v58 = vrot.slane %v1235_v18, 1  ;;  %2250 = vrcp.f32 %v524_v10 }
 0x13d   : > { %v401_v19 = vpop.xlane.xlu1 %400 }
 0x13e   : > { %v402_v39 = vsel %vm323_vm0, %v401_v19, 0.0  ;;  %v3436_v19 = vstv %s4085_s4  ;;  %s4088_s4 = sld [smem:[#allocation26_spill]]  ;;  %v767_v56 = vadd.f32 %v766_v60, %v765_v27  ;;  %v3499_v42 = vadd.f32 %v874_v62, %v873_v23 }
 0x13f   : > { %v403_v17 = vrot.slane %v402_v39, 4 }
 0x141   : > { %v404_v44 = vadd.f32 %v403_v17, %v402_v39  ;;  %v1054_v17 = vadd.f32 %v1053_v25, %v1052_v33  ;;  %v3459_v33 = vstv %s4089_s8  ;;  %s4093_s8 = smul.f32 %s3381_s24, %s3390_s15  ;;  %v3483_v25 = vstv %s4094_s27  ;;  %s3503_s24 = sld [smem:[#allocation2 + %s821_s22]] }
 0x142   : > { %s4112_s27 = sld [smem:[#allocation52_spill]] }
 0x143   : > { %v405_v11 = vrot.slane %v404_v44, 2  ;;  %v3478_v41 = vstv %s4093_s8  ;;  %s4110_s8 = sld [smem:[#allocation19_spill]] }
 0x144   : > { %v1124_v29 = vpop.xlane.xlu0 %1123  ;;  %s1002_s1 = sadd.s32 %s2044_s13, %s4088_s4  ;;  %s3485_s13 = sld [smem:[#allocation2 + %s282_s30]] }
 0x145   : > { %v1125_v54 = vsel %vm323_vm0, %v1124_v29, 0.0  ;;  %v406_v49 = vadd.f32 %v405_v11, %v404_v44  ;;  %v1055_v11 = vrot.slane %v1054_v17, 1  ;;  %s3487_s4 = sld [smem:[#allocation2 + %s1002_s1]]  ;;  %v3492_v29 = vstv %s4097_s0  ;;  %s2072_s0 = sadd.s32 768, %s4095_s2 }
 0x146   : > { %v1126_v14 = vrot.slane %v1125_v54, 4  ;;  %s1183_s30 = sadd.s32 %s2072_s0, %s2737_s10  ;;  %s1643_s1 = sadd.s32 %s2142_s5, %s4098_s20 }
 0x147   : > { %v407_v59 = vrot.slane %v406_v49, 1  ;;  %v3501_v61 = vadd.f32 %v1055_v11, %v1054_v17  ;;  %s3537_s29 = sld [smem:[#allocation2 + %s1183_s30]] }
 0x148   : > { %v1127_v52 = vadd.f32 %v1126_v14, %v1125_v54  ;;  %v2249_v54 = vpop.eup %2248  ;;  %v1596_v14 = vrot.slane %v1595_v47, 2  ;;  %s3539_s22 = sld [smem:[#allocation2 + %s1643_s1]] }
 0x149   : > { %v3497_v20 = vmul.f32 %v2249_v54, %v345_v26  ;;  %v705_v26 = vadd.f32 0.0001, %v3473_v2  ;;  %s4117_s30 = sld [smem:[#allocation54_spill]]  ;;  %s4118_s1 = sld [smem:[#allocation56_spill]] }
 0x14a   : > { %v1128_v27 = vrot.slane %v1127_v52, 2  ;;  %v1597_v39 = vadd.f32 %v1596_v14, %v1595_v47  ;;  %v1067_v14 = vadd.f32 0.0001, %v3501_v61 }
 0x14b   : > { %v3519_v11 = vmul.f32 %v3497_v20, %v3376_v12  ;;  %2252 = vrcp.f32 %v705_v26  ;;  %v4099_v12 = vstv %s3336_s12  ;;  %s1545_s12 = sadd.s32 %s2128_s18, %s4098_s20  ;;  %s4130_s18 = sld [smem:[#allocation25_spill]] }
 0x14c   : > { %v581_v44 = vpop.xlane.xlu1 %580  ;;  %v1598_v17 = vrot.slane %v1597_v39, 1 }
 0x14d   : > { %v582_v38 = vsel %vm323_vm0, %v581_v44, 0.0  ;;  %v1416_v44 = vadd.f32 %v1415_v5, %v1414_v48  ;;  %v768_v48 = vrot.slane %v767_v56, 1  ;;  %v3505_v5 = vadd.f32 %v407_v59, %v406_v49 }
 0x14e   : > { %v583_v43 = vrot.slane %v582_v38, 4  ;;  %v1129_v59 = vadd.f32 %v1128_v27, %v1127_v52  ;;  %v3542_v9 = vadd.f32 %v1598_v17, %v1597_v39 }
 0x14f   : > { %v1417_v47 = vrot.slane %v1416_v44, 1  ;;  %v3526_v10 = vadd.f32 %v768_v48, %v767_v56  ;;  %v411_v52 = vmul.f32 %v410_v36, %v3505_v5 }
 0x150   : > { %v584_v60 = vadd.f32 %v583_v43, %v582_v38  ;;  %v3510_v38 = vadd.f32 %v1236_v58, %v1235_v18  ;;  %v886_v58 = vadd.f32 0.0001, %v3499_v42  ;;  %v1130_v51 = vrot.slane %v1129_v59, 1 }
 0x151   : > { %v3534_v54 = vadd.f32 %v1417_v47, %v1416_v44  ;;  %v772_v26 = vmul.f32 %v4099_v12, %v3526_v10  ;;  %v412_v44 = vadd.f32 0.0001, %v411_v52  ;;  %v2251_v47 = vpop.eup %2250 }
 0x152   : > { %v585_v43 = vrot.slane %v584_v60, 2  ;;  %v1248_v27 = vadd.f32 0.0001, %v3510_v38  ;;  %2254 = vrcp.f32 %v886_v58 }
 0x153   : > { %v1486_v23 = vpop.xlane.xlu0 %1485  ;;  %2256 = vrcp.f32 %v1067_v14 }
 0x154   : > { %v586_v49 = vadd.f32 %v585_v43, %v584_v60  ;;  %v1487_v62 = vsel %vm323_vm0, %v1486_v23, 0.0  ;;  %2258 = vrcp.f32 %v1248_v27 }
 0x155   : > { %v1488_v18 = vrot.slane %v1487_v62, 4  ;;  %2260 = vrcp.f32 %v412_v44 }
 0x156   : > { %v587_v60 = vrot.slane %v586_v49, 1 }
 0x157   : > { %v336_v43 = vpop.xlane.xlu0 %335  ;;  %v1489_v56 = vadd.f32 %v1488_v18, %v1487_v62  ;;  %v1429_v62 = vadd.f32 0.0001, %v3534_v54  ;;  %v3551_v18 = vadd.f32 %v1130_v51, %v1129_v59  ;;  %v4101_v51 = vstv %s3361_s14  ;;  %s4109_s14 = sld [smem:[#allocation53_spill]] }
 0x158   : > { %v337_v31 = vsel %vm323_vm0, %v336_v43, 0.0  ;;  %v3547_v43 = vadd.f32 %v587_v60, %v586_v49  ;;  %v4100_v60 = vstv %s3308_s25  ;;  %s2144_s25 = sadd.s32 1792, %s4096_s26 }
 0x159   : > { %v338_v36 = vrot.slane %v337_v31, 4  ;;  %v1490_v14 = vrot.slane %v1489_v56, 2  ;;  %v3557_v12 = vmul.f32 %v2251_v47, %v4100_v60  ;;  %2262 = vrcp.f32 %v1429_v62 }
 0x15a   : > { %v591_v59 = vmul.f32 %v4101_v51, %v3547_v43  ;;  %v1134_v47 = vmul.f32 %v4102_v3, %v3551_v18 }
 0x15b   : > { %v943_v23 = vpop.xlane.xlu1 %942  ;;  %v339_v63 = vadd.f32 %v338_v36, %v337_v31  ;;  %v516_v22 = vpop.xlane.xlu0 %515  ;;  %v1610_v31 = vadd.f32 0.0001, %v3542_v9  ;;  %v773_v36 = vadd.f32 0.0001, %v772_v26  ;;  %v1491_v60 = vadd.f32 %v1490_v14, %v1489_v56 }
 0x15c   : > { %v944_v39 = vsel %vm323_vm0, %v943_v23, 0.0  ;;  %v517_v17 = vsel %vm323_vm0, %v516_v22, 0.0  ;;  %v3569_v26 = vpop.eup %2252  ;;  %v3573_v44 = vmul.f32 %v3557_v12, %v3442_v35 }
 0x15d   : > { %v945_v52 = vrot.slane %v944_v39, 4  ;;  %v340_v49 = vrot.slane %v339_v63, 2  ;;  %v518_v27 = vrot.slane %v517_v17, 4  ;;  %2264 = vrcp.f32 %v1610_v31 }
 0x15e   : > { %2266 = vrcp.f32 %v773_v36  ;;  %v3584_v31 = vadd.f32 0.0001, %v1134_v47  ;;  %v1492_v34 = vrot.slane %v1491_v60, 1 }
 0x15f   : > { %v946_v23 = vadd.f32 %v945_v52, %v944_v39  ;;  %v341_v58 = vadd.f32 %v340_v49, %v339_v63  ;;  %v519_v22 = vadd.f32 %v518_v27, %v517_v17  ;;  %v878_v48 = vpop.xlane.xlu0 %877  ;;  %v3575_v17 = vpop.eup %2254 }
 0x160   : > { %v879_v50 = vsel %vm323_vm0, %v878_v48, 0.0  ;;  %v592_v48 = vadd.f32 0.0001, %v591_v59  ;;  %v3578_v14 = vpop.eup %2256 }
 0x161   : > { %v947_v55 = vrot.slane %v946_v23, 2  ;;  %v342_v24 = vrot.slane %v341_v58, 1  ;;  %v520_v39 = vrot.slane %v519_v22, 2  ;;  %v880_v62 = vrot.slane %v879_v50, 4  ;;  %v3582_v15 = vpop.eup %2258 }
 0x162   : > { %v1305_v63 = vpop.xlane.xlu1 %1304  ;;  %2268 = vrcp.f32 %v592_v48  ;;  %v2261_v47 = vpop.eup %2260 }
 0x163   : > { %v948_v52 = vadd.f32 %v947_v55, %v946_v23  ;;  %v1306_v3 = vsel %vm323_vm0, %v1305_v63, 0.0  ;;  %v1240_v56 = vpop.xlane.xlu0 %1239  ;;  %v3580_v27 = vadd.f32 %v342_v24, %v341_v58  ;;  %v521_v51 = vadd.f32 %v520_v39, %v519_v22  ;;  %v3598_v48 = vpop.eup %2262 }
 0x164   : > { %v1307_v49 = vrot.slane %v1306_v3, 4  ;;  %v881_v35 = vadd.f32 %v880_v62, %v879_v50  ;;  %v1241_v36 = vsel %vm323_vm0, %v1240_v56, 0.0  ;;  %v4103_v56 = vstv %s3397_s9  ;;  %s3653_s9 = sld [smem:[#allocation2 + %s1545_s12]] }
 0x165   : > { %v949_v28 = vrot.slane %v948_v52, 1  ;;  %v348_v55 = vadd.f32 0.0001, %v3580_v27  ;;  %v522_v63 = vrot.slane %v521_v51, 1  ;;  %v1242_v58 = vrot.slane %v1241_v36, 4 }
 0x166   : > { %v1308_v59 = vadd.f32 %v1307_v49, %v1306_v3  ;;  %v697_v23 = vpop.xlane.xlu1 %696  ;;  %v882_v45 = vrot.slane %v881_v35, 2  ;;  %v3593_v3 = vadd.f32 %v1492_v34, %v1491_v60 }
 0x167   : > { %v3588_v24 = vadd.f32 %v949_v28, %v948_v52  ;;  %v698_v50 = vsel %vm323_vm0, %v697_v23, 0.0  ;;  %v1602_v22 = vpop.xlane.xlu0 %1601  ;;  %2270 = vrcp.f32 %v348_v55  ;;  %v3591_v6 = vadd.f32 %v522_v63, %v521_v51 }
 0x168   : > { %v1309_v39 = vrot.slane %v1308_v59, 2  ;;  %v699_v62 = vrot.slane %v698_v50, 4  ;;  %v883_v0 = vadd.f32 %v882_v45, %v881_v35  ;;  %v1243_v13 = vadd.f32 %v1242_v58, %v1241_v36  ;;  %v3606_v45 = vpop.eup %2264 }
 0x169   : > { %v953_v49 = vmul.f32 %v4103_v56, %v3588_v24  ;;  %v528_v23 = vadd.f32 0.0001, %v3591_v6  ;;  %v1603_v55 = vsel %vm323_vm0, %v1602_v22, 0.0  ;;  %v3603_v51 = vmul.f32 %v2261_v47, %v3436_v19 }
 0x16a   : > { %v1310_v28 = vadd.f32 %v1309_v39, %v1308_v59  ;;  %v700_v52 = vadd.f32 %v699_v62, %v698_v50  ;;  %v1059_v21 = vpop.xlane.xlu1 %1058  ;;  %v884_v63 = vrot.slane %v883_v0, 1  ;;  %v3608_v50 = vpop.eup %2266  ;;  %v4104_v58 = vstv %s3390_s15  ;;  %s1647_s15 = sadd.s32 %s2144_s25, %s4098_s20  ;;  %s4120_s25 = sld [smem:[#allocation57_spill]] }
 0x16b   : > { %v954_v34 = vadd.f32 0.0001, %v953_v49  ;;  %v1060_v60 = vsel %vm323_vm0, %v1059_v21, 0.0  ;;  %2272 = vrcp.f32 %v528_v23  ;;  %v1496_v22 = vmul.f32 %v4104_v58, %v3593_v3 }
 0x16c   : > { %v1311_v35 = vrot.slane %v1310_v28, 1  ;;  %v701_v36 = vrot.slane %v700_v52, 2  ;;  %v1061_v59 = vrot.slane %v1060_v60, 4  ;;  %v3613_v39 = vadd.f32 %v884_v63, %v883_v0 }
 0x16d   : > { %v1244_v19 = vrot.slane %v1243_v13, 2  ;;  %v1604_v47 = vrot.slane %v1603_v55, 4  ;;  %2274 = vrcp.f32 %v954_v34  ;;  %v416_v0 = vmul.f32 %v3603_v51, %v3505_v5 }
 0x16e   : > { %v3615_v21 = vadd.f32 %v1311_v35, %v1310_v28  ;;  %v702_v62 = vadd.f32 %v701_v36, %v700_v52  ;;  %v1062_v56 = vadd.f32 %v1061_v59, %v1060_v60  ;;  %v1421_v49 = vpop.xlane.xlu1 %1420  ;;  %v890_v23 = vadd.f32 0.0001, %v3613_v39  ;;  %v2269_v35 = vpop.eup %2268 }
 0x16f   : > { %v1422_v32 = vsel %vm323_vm0, %v1421_v49, 0.0  ;;  %v1245_v16 = vadd.f32 %v1244_v19, %v1243_v13  ;;  %v1605_v57 = vadd.f32 %v1604_v47, %v1603_v55  ;;  %v4105_v63 = vstv %s3408_s16  ;;  %s3637_s16 = sld [smem:[#allocation2 + %s1647_s15]] }
 0x170   : > { %v1315_v34 = vmul.f32 %v4105_v63, %v3615_v21  ;;  %v703_v28 = vrot.slane %v702_v62, 1  ;;  %v1063_v52 = vrot.slane %v1062_v56, 2  ;;  %2276 = vrcp.f32 %v890_v23  ;;  %s4121_s15 = sld [smem:[#allocation20_spill]] }
 0x171   : > { %v1423_v60 = vrot.slane %v1422_v32, 4  ;;  %v1246_v36 = vrot.slane %v1245_v16, 1  ;;  %v1606_v59 = vrot.slane %v1605_v57, 2  ;;  %v2271_v58 = vpop.eup %2270  ;;  %v1497_v13 = vadd.f32 0.0001, %v1496_v22 }
 0x172   : > { %v1316_v55 = vadd.f32 0.0001, %v1315_v34  ;;  %v3627_v19 = vadd.f32 %v703_v28, %v702_v62  ;;  %v1064_v5 = vadd.f32 %v1063_v52, %v1062_v56  ;;  %v1667_v47 = vpop.xlane.xlu1 %1666  ;;  %v4106_v49 = vstv %s3452_s23  ;;  %s1962_s23 = sadd.s32 896, %s4107_s17  ;;  %s4132_s17 = sld [smem:[#allocation26_spill]] }
 0x173   : > { %v3631_v63 = vmul.f32 %v2271_v58, %v4106_v49  ;;  %v1424_v8 = vadd.f32 %v1423_v60, %v1422_v32  ;;  %v3633_v46 = vadd.f32 %v1246_v36, %v1245_v16  ;;  %v1668_v23 = vsel %vm323_vm0, %v1667_v47, 0.0  ;;  %s463_s3 = sadd.s32 %s1962_s23, %s4110_s8  ;;  %s4134_s23 = sld [smem:[#allocation30_spill]] }
 0x174   : > { %2278 = vrcp.f32 %v1316_v55  ;;  %v709_v7 = vadd.f32 0.0001, %v3627_v19  ;;  %v1065_v1 = vrot.slane %v1064_v5, 1  ;;  %v1669_v22 = vrot.slane %v1668_v23, 4 }
 0x175   : > { %v353_v62 = vmul.f32 %v3631_v63, %v3580_v27  ;;  %v1425_v56 = vrot.slane %v1424_v8, 2  ;;  %v1252_v32 = vadd.f32 0.0001, %v3633_v46  ;;  %v1607_v16 = vadd.f32 %v1606_v59, %v1605_v57  ;;  %v2273_v34 = vpop.eup %2272  ;;  %s1675_s5 = smul.f32 %s3637_s16, %s3539_s22 }
 0x176   : > { %v3644_v28 = vmul.f32 %v2269_v35, %v3459_v33  ;;  %2280 = vrcp.f32 %v709_v7  ;;  %v3646_v52 = vadd.f32 %v1065_v1, %v1064_v5  ;;  %v1670_v60 = vadd.f32 %v1669_v22, %v1668_v23 }
 0x177   : > { %v354_v36 = vadd.f32 %v353_v62, %v3519_v11  ;;  %v4108_v58 = vstv %s3462_s11  ;;  %v1426_v27 = vadd.f32 %v1425_v56, %v1424_v8  ;;  %2282 = vrcp.f32 %v1252_v32  ;;  %v2275_v57 = vpop.eup %2274  ;;  %s2018_s11 = sadd.s32 896, %s4086_s6  ;;  %s4113_s6 = sld [smem:[#allocation55_spill]] }
 0x178   : > { %v3651_v55 = vmul.f32 %v2273_v34, %v4108_v58  ;;  %2284 = vrcp.f32 %v3584_v31  ;;  %v1071_v1 = vadd.f32 0.0001, %v3646_v52  ;;  %v1671_v7 = vrot.slane %v1670_v60, 2  ;;  %s825_s0 = sadd.s32 %s2018_s11, %s4091_s7  ;;  %s3693_s7 = sld [smem:[#allocation2 + %s463_s3]] }
 0x179   : > { %v1608_v33 = vrot.slane %v1607_v16, 1  ;;  %2286 = vrcp.f32 %v1497_v13  ;;  %v417_v11 = vadd.f32 %v416_v0, %v354_v36  ;;  %v1427_v8 = vrot.slane %v1426_v27, 1  ;;  %s2102_s11 = sadd.s32 896, %s4134_s23 }
 0x17a   : > { %v533_v35 = vmul.f32 %v3651_v55, %v3591_v6  ;;  %v4111_v59 = vstv %s4109_s14  ;;  %2288 = vrcp.f32 %v1071_v1  ;;  %v1672_v5 = vadd.f32 %v1671_v7, %v1670_v60  ;;  %v2277_v13 = vpop.eup %2276  ;;  %s1368_s3 = sadd.s32 %s2102_s11, %s4092_s21 }
 0x17b   : > { %v3664_v31 = vmul.f32 %v3575_v17, %v4111_v59  ;;  %v3666_v47 = vadd.f32 %v1608_v33, %v1607_v16  ;;  %v596_v0 = vmul.f32 %v3644_v28, %v3547_v43  ;;  %v418_v49 = vadd.f32 0.0001, %v417_v11  ;;  %s3839_s21 = sld [smem:[#allocation2 + %s1368_s3]] }
 0x17c   : > { %v534_v6 = vadd.f32 %v533_v35, %v3573_v44  ;;  %v3672_v23 = vadd.f32 %v1427_v8, %v1426_v27  ;;  %v3675_v22 = vmul.f32 %v2275_v57, %v3483_v25  ;;  %v4114_v17 = vstv %s3503_s24  ;;  %s3704_s24 = sld [smem:[#allocation2 + %s825_s0]] }
 0x17d   : > { %v3680_v62 = vmul.f32 %v2277_v13, %v4114_v17  ;;  %v1673_v56 = vrot.slane %v1672_v5, 1  ;;  %v1614_v32 = vadd.f32 0.0001, %v3666_v47  ;;  %v4115_v43 = vstv %s4112_s27 }
 0x17e   : > { %v3688_v16 = vmul.f32 %v3569_v26, %v4115_v43  ;;  %2290 = vrcp.f32 %v418_v49  ;;  %v597_v44 = vadd.f32 %v596_v0, %v534_v6  ;;  %v1433_v34 = vadd.f32 0.0001, %v3672_v23  ;;  %v2279_v25 = vpop.eup %2278 }
 0x17f   : > { %v894_v60 = vmul.f32 %v3664_v31, %v3499_v42  ;;  %v895_v36 = vmul.f32 %v3680_v62, %v3613_v39  ;;  %v3697_v58 = vadd.f32 %v1673_v56, %v1672_v5  ;;  %2292 = vrcp.f32 %v1614_v32 }
 0x180   : > { %v4116_v26 = vstv %s4113_s6  ;;  %v598_v57 = vadd.f32 0.0001, %v597_v44  ;;  %2294 = vrcp.f32 %v1433_v34  ;;  %v1615_v1 = vstv %s3653_s9  ;;  %v2281_v42 = vpop.eup %2280  ;;  %s2130_s6 = sadd.s32 896, %s4096_s26 }
 0x181   : > { %v3702_v27 = vmul.f32 %v3582_v15, %v4116_v26  ;;  %v958_v7 = vmul.f32 %v3675_v22, %v3588_v24  ;;  %v896_v39 = vadd.f32 %v895_v36, %v894_v60  ;;  %v3709_v33 = vstv %s1675_s5  ;;  %v2283_v15 = vpop.eup %2282  ;;  %s1549_s0 = sadd.s32 %s2130_s6, %s4098_s20  ;;  %s4150_s20 = sld [smem:[#allocation12_spill]] }
 0x182   : > { %v4119_v11 = vstv %s3539_s22  ;;  %v713_v8 = vmul.f32 %v3688_v16, %v3473_v2  ;;  %v3718_v59 = vmul.f32 %v3608_v50, %v3428_v53  ;;  %v4122_v5 = vstv %s3454_s28  ;;  %v2285_v24 = vpop.eup %2284  ;;  %s4127_s28 = sld [smem:[#allocation21_spill]]  ;;  %s4129_s22 = sld [smem:[#allocation9_spill]] }
 0x183   : > { %v1677_v35 = vmul.f32 %v4119_v11, %v3697_v58  ;;  %v3722_v13 = vmul.f32 %v2281_v42, %v4122_v5  ;;  %2296 = vrcp.f32 %v598_v57  ;;  %v3725_v0 = vmul.f32 %v2279_v25, %v3492_v29  ;;  %v2287_v2 = vpop.eup %2286  ;;  %s3849_s26 = sld [smem:[#allocation2 + %s1549_s0]] }
 0x184   : > { %v959_v49 = vadd.f32 %v958_v7, %v896_v39  ;;  %v4123_v6 = vstv %s3537_s29  ;;  %v4124_v32 = vstv %s4117_s30  ;;  %v1256_v50 = vmul.f32 %v3702_v27, %v3510_v38  ;;  %v2289_v34 = vpop.eup %2288  ;;  %s1990_s29 = sadd.s32 896, %s4121_s15 }
 0x185   : > { %v3729_v17 = vmul.f32 %v2283_v15, %v4123_v6  ;;  %v1678_v56 = vadd.f32 0.0001, %v1677_v35  ;;  %v3734_v53 = vmul.f32 %v3578_v14, %v4124_v32  ;;  %v4125_v43 = vstv %s4118_s1 }
 0x186   : > { %v3741_v44 = vmul.f32 %v3598_v48, %v4125_v43  ;;  %v714_v29 = vmul.f32 %v3722_v13, %v3627_v19  ;;  %v4126_v25 = vstv %s4120_s25  ;;  %v960_v36 = vadd.f32 0.0001, %v959_v49  ;;  %s4158_s25 = sld [smem:[#allocation64_spill]] }
 0x187   : > { %v3748_v60 = vmul.f32 %v3606_v45, %v4126_v25  ;;  %v1257_v14 = vmul.f32 %v3729_v17, %v3633_v46  ;;  %2298 = vrcp.f32 %v1678_v56  ;;  %v777_v38 = vmul.f32 %v3718_v59, %v3526_v10 }
 0x188   : > { %v3756_v48 = vmul.f32 %v2285_v24, %v3447_v40  ;;  %v715_v19 = vadd.f32 %v714_v29, %v713_v8  ;;  %v4128_v26 = vstv %s3487_s4  ;;  %v1320_v45 = vmul.f32 %v3725_v0, %v3615_v21  ;;  %v2291_v7 = vpop.eup %2290  ;;  %s644_s16 = sadd.s32 %s1990_s29, %s4127_s28  ;;  %s2074_s4 = sadd.s32 896, %s4095_s2 }
 0x189   : > { %v3760_v57 = vmul.f32 %v2289_v34, %v4128_v26  ;;  %v599_v42 = vstv %s3693_s7  ;;  %2300 = vrcp.f32 %v960_v36  ;;  %v1258_v46 = vadd.f32 %v1257_v14, %v1256_v50  ;;  %v2293_v35 = vpop.eup %2292  ;;  %s241_s12 = sand.u32 1, %s4129_s22   ;;  %s2046_s2 = sadd.s32 896, %s4130_s18 }
 0x18a   : > { %v1075_v10 = vmul.f32 %v3734_v53, %v3501_v61  ;;  %v778_v40 = vadd.f32 %v777_v38, %v715_v19  ;;  %v961_v11 = vstv %s3704_s24  ;;  %v1437_v21 = vmul.f32 %v3741_v44, %v3534_v54  ;;  %v2295_v24 = vpop.eup %2294  ;;  %s1187_s14 = sadd.s32 %s2074_s4, %s2737_s10  ;;  %s3799_s9 = sshll.u32 %s241_s12, 4 }
 0x18b   : > { %v1076_v39 = vmul.f32 %v3760_v57, %v3646_v52  ;;  %v1618_v15 = vmul.f32 %v3748_v60, %v3542_v9  ;;  %v4131_v8 = vstv %s3485_s13  ;;  %v1321_v61 = vadd.f32 %v1320_v45, %v1258_v46  ;;  %s3787_s13 = sld [smem:[#allocation2 + %s644_s16]]  ;;  %v4135_v45 = vld [vmem:[#allocation24_spill] sm:$0xff]  ;;  %s3825_s27 = scalar_lea.vmem [#allocation5], %s3799_s9 }
 0x18c   : > { %v421_v5 = vmul.f32 %v2291_v7, %v4131_v8  ;;  %v1139_v52 = vmul.f32 %v3756_v48, %v3551_v18  ;;  %v779_v49 = vadd.f32 0.0001, %v778_v40  ;;  %v3782_v56 = vmul.f32 %v2293_v35, %v1615_v1  ;;  %s3809_s10 = sld [smem:[#allocation2 + %s1187_s14]]  ;;  %s2145_s7 = sshll.u32 %s4150_s20, 8 }
 0x18d   : > { %v1077_v6 = vadd.f32 %v1076_v39, %v1075_v10  ;;  %v4133_v50 = vstv %s3514_s19  ;;  %v2297_v29 = vpop.eup %2296  ;;  %v3795_v18 = vmul.f32 %v2287_v2, %v3478_v41  ;;  %s1006_s19 = sadd.s32 %s2046_s2, %s4132_s17  ;;  %v4137_v39 = vld [vmem:[#allocation40_spill] sm:$0xff]  ;;  %s1712_s24 = sshll.u32 %s3825_s27, 4  ;;  %s3892_s24 = int_to_ptr.vmem [resolvable:$true] %s1712_s24 }
 0x18e   : > { %v422_v54 = vmul.f32 %v421_v5, %v3497_v20  ;;  %v424_v32 = vmul.f32 %v421_v5, %v3631_v63  ;;  %v427_v9 = vmul.f32 %v421_v5, %v3603_v51  ;;  %v3791_v43 = vmul.f32 %v2295_v24, %v4133_v50  ;;  %s3816_s8 = sld [smem:[#allocation2 + %s1006_s19]]  ;;  %v4140_v50 = vld [vmem:[#allocation44_spill] sm:$0xff]  ;;  %s3890_s15 = scalar_lea.hbm %s4158_s25, %s2145_s7 }
 0x18f   : > { %2302 = vrcp.f32 %v779_v49  ;;  %v1140_v1 = vadd.f32 %v1139_v52, %v1077_v6  ;;  %v1322_v20 = vadd.f32 0.0001, %v1321_v61  ;;  %v601_v34 = vmul.f32 %v2297_v29, %v599_v42  ;;  %v4138_v52 = vld [vmem:[#allocation29_spill] sm:$0xff]  ;;  %v4139_v6 = vld [vmem:[#allocation43_spill] sm:$0xff]  ;;  %s3897_s28 = scalar_lea.sflag [#allocation3], %s241_s12  ;;  %s2325_s29 = scalar_lea.vmem %s3892_s24, 256 }
 0x190   : > { %v423_v63 = vmul.f32 %v422_v54, %v2620_v37  ;;  %v425_v51 = vmul.f32 %v424_v32, %v3236_v30  ;;  %v1619_v25 = vmul.f32 %v3782_v56, %v3666_v47  ;;  %v428_v36 = vmul.f32 %v3140_v4, %v427_v9  ;;  %p2326_p7 = scmp.ne.s32.totalorder %s3892_s24, %s2325_s29  ;;  %s2396_s18 = smov [#allocation5]  }
 0x191   : > { %v1141_v41 = vadd.f32 0.0001, %v1140_v1  ;;  %v1438_v2 = vmul.f32 %v3791_v43, %v3672_v23  ;;  %2304 = vrcp.f32 %v1322_v20  ;;  %v2299_v14 = vpop.eup %2298  ;;  %v602_v37 = vmul.f32 %v601_v34, %v3557_v12  ;;  %s2329_s16 = sshll.u32 %s2396_s18, 4  ;;  %s2330_s16 = int_to_ptr.vmem [resolvable:$false] %s2329_s16 }
 0x192   : > { %v426_v38 = vadd.f32 %v425_v51, %v423_v63  ;;  %v604_v30 = vmul.f32 %v601_v34, %v3651_v55  ;;  %v607_v19 = vmul.f32 %v601_v34, %v3644_v28  ;;  %v1501_v4 = vmul.f32 %v3795_v18, %v3593_v3  ;;  %v4136_v55 = vld [vmem:[#allocation42_spill] sm:$0xff]  ;;  %p2327_p8 = pnand %p2326_p7, %p2472_p5  ;;  %s2331_s4 = scalar_lea.vmem %s2330_s16, 512 }
 0x193   : > { %2306 = vrcp.f32 %v1141_v41  ;;  %v1439_v47 = vadd.f32 %v1438_v2, %v1437_v21  ;;  %v3820_v23 = vmul.f32 %v2299_v14, %v3709_v33  ;;  %v2301_v26 = vpop.eup %2300  ;;  %v603_v42 = vmul.f32 %v602_v37, %v4135_v45  ;;  %v4142_v2 = vld [vmem:[#allocation46_spill] sm:$0xff]  ;;  %v4144_v45 = vld [vmem:[#allocation35_spill] sm:$0xff]  ;;  %p2332_p10 = scmp.lt.s32.totalorder %s3892_s24, %s2330_s16  ;;  %p2333_p11 = scmp.lt.s32.totalorder %s2331_s4, %s2325_s29 }
 0x194   : > { %v429_v12 = vadd.f32 %v428_v36, %v426_v38  ;;  %v605_v28 = vmul.f32 %v604_v30, %v4136_v55  ;;  %v1620_v46 = vadd.f32 %v1619_v25, %v1618_v15  ;;  %v963_v7 = vmul.f32 %v2301_v26, %v961_v11  ;;  %v4141_v36 = vld [vmem:[#allocation27_spill] sm:$0xff]  ;;  %v4143_v37 = vld [vmem:[#allocation38_spill] sm:$0xff]  ;;  %v4145_v55 = vld [vmem:[#allocation45_spill] sm:$0xff]  ;;  %p2328_p9 = pneg %p2327_p8 }
 0x195   : > { %v1502_v10 = vadd.f32 %v1501_v4, %v1439_v47  ;;  %v780_v3 = vstv %s3787_s13  ;;  %v608_v33 = vmul.f32 %v4137_v39, %v607_v19  ;;  %v1682_v35 = vmul.f32 %v3820_v23, %v3697_v58  ;;  %v4149_v39 = vld [vmem:[#allocation39_spill] sm:$0xff]  ;;  %p2334_p12 = por %p2333_p11, %p2332_p10 }
 0x196   : > { %430 = vst [vmem:[%s3825_s27] sm:$0x3] %v429_v12  ;;  %v606_v40 = vadd.f32 %v605_v28, %v603_v42  ;;  %v964_v21 = vmul.f32 %v963_v7, %v3664_v31  ;;  %v966_v11 = vmul.f32 %v963_v7, %v3680_v62  ;;  %v969_v15 = vmul.f32 %v963_v7, %v3675_v22 }
 0x197   : > { %v1503_v8 = vadd.f32 0.0001, %v1502_v10  ;;  %v1683_v61 = vadd.f32 %v1682_v35, %v1620_v46  ;;  %v1323_v58 = vstv %s3809_s10  ;;  %v1142_v22 = vstv %s3816_s8  ;;  %v4147_v10 = vld [vmem:[#allocation49_spill] sm:$0xff]  ;;  %p2335_p13 = pnand %p2334_p12, %p2328_p9 }
 0x198   : > { %v609_v5 = vadd.f32 %v608_v33, %v606_v40  ;;  %v965_v49 = vmul.f32 %v964_v21, %v4138_v52  ;;  %v967_v54 = vmul.f32 %v966_v11, %v4139_v6  ;;  %v970_v29 = vmul.f32 %v4140_v50, %v969_v15  ;;  %v4156_v50 = vld [vmem:[#allocation48_spill] sm:$0xff] }
 0x199   : > { %v2303_v24 = vpop.eup %2302  ;;  %2308 = vrcp.f32 %v1503_v8  ;;  %v1684_v31 = vadd.f32 0.0001, %v1683_v61  ;;  %v1504_v12 = vstv %s3839_s21  ;;  %v1685_v21 = vstv %s3849_s26 }
 0x19a   : > { %v782_v32 = vmul.f32 %v2303_v24, %v780_v3  ;;  %1813 = vst [vmem:[%s3825_s27 + $0x2] sm:$0x3] %v609_v5  ;;  %v968_v9 = vadd.f32 %v967_v54, %v965_v49  ;;  %v4151_v24 = vld [vmem:[#allocation36_spill] sm:$0xff]  ;;  %v4152_v49 = vld [vmem:[#allocation50_spill] sm:$0xff] }
 0x19b   : > { %v2305_v62 = vpop.eup %2304  ;;  %2310 = vrcp.f32 %v1684_v31 }
 0x19c   : > { %v783_v1 = vmul.f32 %v782_v32, %v3688_v16  ;;  %v785_v20 = vmul.f32 %v782_v32, %v3722_v13  ;;  %v788_v63 = vmul.f32 %v782_v32, %v3718_v59  ;;  %v1325_v51 = vmul.f32 %v2305_v62, %v1323_v58  ;;  %v4153_v58 = vld [vmem:[#allocation41_spill] sm:$0xff] }
 0x19d   : > { %v2307_v34 = vpop.eup %2306  ;;  %v971_v25 = vadd.f32 %v970_v29, %v968_v9 }
 0x19e   : > { %v784_v41 = vmul.f32 %v783_v1, %v4141_v36  ;;  %v786_v14 = vmul.f32 %v785_v20, %v4142_v2  ;;  %v1144_v38 = vmul.f32 %v2307_v34, %v1142_v22  ;;  %v789_v30 = vmul.f32 %v4143_v37, %v788_v63  ;;  %v4155_v22 = vld [vmem:[#allocation37_spill] sm:$0xff]  ;;  %v4157_v20 = vld [vmem:[#allocation51_spill] sm:$0xff] }
 0x19f   : > { %1847 = vst [vmem:[%s3825_s27 + $0x6] sm:$0x3] %v971_v25  ;;  %v1326_v16 = vmul.f32 %v1325_v51, %v3702_v27  ;;  %v1328_v59 = vmul.f32 %v1325_v51, %v3729_v17  ;;  %v1331_v13 = vmul.f32 %v1325_v51, %v3725_v0  ;;  %v4146_v27 = vld [vmem:[#allocation32_spill] sm:$0xff] }
 0x1a0   : > { %v787_v19 = vadd.f32 %v786_v14, %v784_v41  ;;  %v1145_v4 = vmul.f32 %v1144_v38, %v3734_v53  ;;  %v1147_v47 = vmul.f32 %v1144_v38, %v3760_v57  ;;  %v1150_v26 = vmul.f32 %v1144_v38, %v3756_v48  ;;  %v4148_v53 = vld [vmem:[#allocation47_spill] sm:$0xff] }
 0x1a1   : > { %v1327_v42 = vmul.f32 %v1326_v16, %v4144_v45  ;;  %v1329_v28 = vmul.f32 %v1328_v59, %v4145_v55  ;;  %v1332_v40 = vmul.f32 %v4148_v53, %v1331_v13 }
 0x1a2   : > { %v790_v46 = vadd.f32 %v789_v30, %v787_v19  ;;  %v1146_v7 = vmul.f32 %v1145_v4, %v4146_v27  ;;  %v1148_v17 = vmul.f32 %v1147_v47, %v4147_v10  ;;  %v1151_v48 = vmul.f32 %v4149_v39, %v1150_v26 }
 0x1a3   : > { %v2309_v0 = vpop.eup %2308  ;;  %v1330_v3 = vadd.f32 %v1329_v28, %v1327_v42 }
 0x1a4   : > { %1830 = vst [vmem:[%s3825_s27 + $0x4] sm:$0x3] %v790_v46  ;;  %v1149_v57 = vadd.f32 %v1148_v17, %v1146_v7  ;;  %v1506_v33 = vmul.f32 %v2309_v0, %v1504_v12 }
 0x1a5   : > { %v1333_v35 = vadd.f32 %v1332_v40, %v1330_v3  ;;  %v2311_v61 = vpop.eup %2310 }
 0x1a6   : > { %v1152_v11 = vadd.f32 %v1151_v48, %v1149_v57  ;;  %v1507_v15 = vmul.f32 %v1506_v33, %v3741_v44  ;;  %v1509_v8 = vmul.f32 %v1506_v33, %v3791_v43  ;;  %v1512_v5 = vmul.f32 %v1506_v33, %v3795_v18 }
 0x1a7   : > { %1881 = vst [vmem:[%s3825_s27 + $0xa] sm:$0x3] %v1333_v35  ;;  %v1687_v54 = vmul.f32 %v2311_v61, %v1685_v21 }
 0x1a8   : > { %1864 = vst [vmem:[%s3825_s27 + $0x8] sm:$0x3] %v1152_v11  ;;  %v1508_v52 = vmul.f32 %v1507_v15, %v4151_v24  ;;  %v1510_v6 = vmul.f32 %v1509_v8, %v4152_v49  ;;  %v1513_v32 = vmul.f32 %v4153_v58, %v1512_v5 }
 0x1a9   : > { %v1688_v44 = vmul.f32 %v1687_v54, %v3748_v60  ;;  %v1690_v43 = vmul.f32 %v1687_v54, %v3782_v56  ;;  %v1693_v18 = vmul.f32 %v1687_v54, %v3820_v23 }
 0x1aa   : > { %v1511_v31 = vadd.f32 %v1510_v6, %v1508_v52 }
 0x1ab   : > { %v1689_v9 = vmul.f32 %v1688_v44, %v4155_v22  ;;  %v1691_v29 = vmul.f32 %v1690_v43, %v4156_v50  ;;  %v1694_v63 = vmul.f32 %v4157_v20, %v1693_v18 }
 0x1ac   : > { %v1514_v62 = vadd.f32 %v1513_v32, %v1511_v31 }
 0x1ad   : > { %v1692_v1 = vadd.f32 %v1691_v29, %v1689_v9 }
 0x1ae   : > { %1898 = vst [vmem:[%s3825_s27 + $0xc] sm:$0x3] %v1514_v62 }
 0x1af   : > { %v1695_v60 = vadd.f32 %v1694_v63, %v1692_v1 }
 0x1b1   : > { %1915 = vst [vmem:[%s3825_s27 + $0xe] sm:$0x3] %v1695_v60 }
 0x1b2   : > { %2338 = shalt.err (!%p2335_p13)
}
 0x1b3   : > { %s2339_s22 = scalar_lea.hbm %s3890_s15, 256  ;;  %s2343_s17 = scalar_lea.hbm %s4158_s25, 512 }
 0x1b4   : > { %p2340_p0 = scmp.ne.s32.totalorder %s3890_s15, %s2339_s22  ;;  %p2344_p3 = scmp.lt.u32.totalorder %s3890_s15, %s4158_s25 }
 0x1b5   : > { %p2345_p4 = scmp.lt.u32.totalorder %s2343_s17, %s2339_s22  ;;  %p2347_p8 = scmp.lt.u32.totalorder %s2339_s22, %s3890_s15 }
 0x1b6   : > { %p2341_p1 = pnand %p2340_p0, %p2472_p5 }
 0x1b7   : > { %p2346_p7 = por %p2345_p4, %p2344_p3 }
 0x1b8   : > { %p2342_p2 = pneg %p2341_p1 }
 0x1b9   : > { %p2348_p9 = por %p2347_p8, %p2346_p7 }
 0x1bb   : > { %p2349_p10 = pnand %p2348_p9, %p2342_p2 }
 0x1bd   : > { %2352 = shalt.err (!%p2349_p10)
}
 0x1be   : > { %s2397_s9 = smov 32   ;;  %s2398_s23 = smov 2  }
 0x1bf   : > { %2150 = dma.vmem_to_hbm [thread:$0]  (%p2472_p5), %s3892_s24, 256, %s3890_s15, %s3897_s28, %s2397_s9, %s2397_s9, %s2398_s23  }
 0x1c0 PF: > { %s4159_s19 = sld [smem:[#allocation11_spill]]  ;;  %s4160_s10 = sld [smem:[#allocation8_spill]] }
 0x1c6   : > { %p2162_p11 = scmp.ge.s32.totalorder %s4159_s19, 2  ;;  %s1727_s11 = sand.u32 1, %s4160_s10  }
 0x1c7   : > { %s1728_s27 = scalar_lea.sflag [#allocation3], %s1727_s11 }
 0x1c8   : > { %p2157_p12 = pnand %p2162_p11, %p2476_p6 }
 0x1ca   : > { %2374 = dma.done.wait (!%p2157_p12), %s1728_s27, 256  }
 0x1cb   : > { %2376 = vsyncadd (!%p2157_p12), %s1728_s27, 4294967040  ;;  %s4162_s24 = sld [smem:[#allocation13_spill]]  ;;  %s4163_s21 = sld [smem:[#allocation9_spill]] }
 0x1cc   : > { %s4164_s22 = sld [smem:[#allocation10_spill]]  ;;  %s4165_s23 = sld [smem:[#allocation14_spill]] }
 0x1d1   : > { %p17_p13 = scmp.ge.s32.totalorder %s4162_s24, 4  }
 0x1d3   :  { %19 = sbr.rel (!%p17_p13) target bundleno = 12 (0xc), region = 88 }
 0x1da   :  { %1733 = vsyncpa [#allocation3], 1 }
 0x1db   :  { %1735 = vsyncpa [#allocation3 + $0x1], 1 }
 0x1dc   :  { %1736 = vsyncpa [#allocation4], 1 }
 0x1dd   :  { %1738 = vsyncpa [#allocation4 + $0x1], 1 }

</bundles_post_ra>
